<compile_context>
chip_gen: v7x
topology: tpu7x:2x2x1
jax: 0.10.0
libtpu: 0.0.40
codegen_flags: <defaults>
</compile_context>

<pallas_src>
import jax
import jax.numpy as jnp
from jax.experimental import pallas as pl
from jax.experimental.pallas import tpu as pltpu

# ----------------------- hyper-parameters (match the module) -----------------------
B    = 2                 # args.batch_size (== actual batch -> diff == 0)
W    = 8                 # args.window (sequence length)
C    = 9                 # data.original_columns (module hardcodes 9 outputs)
H    = 16                # args.hidden_state_features
HIDC = 8                 # args.hidCNN
CK   = 3                 # args.CNN_kernel
HU   = 4                 # args.hidden_state_features_uni_lstm
HW   = 4                 # args.highway_window
OUT  = 9                 # hard-coded "9" in the module
TC   = W - CK + 1        # conv output length
CB   = C * B             # univariate LSTM rows, ordered f*B + b
F32  = jnp.float32

VSPEC = pl.BlockSpec(memory_space=pltpu.MemorySpace.VMEM)


def _sigmoid(x):
    # exact sigmoid, lowered through a single EUP tanh
    return 0.5 * jnp.tanh(0.5 * x) + 0.5


def _tile_lanes(a, n):
    # jnp.tile along lanes via explicit concatenation (reshape-free)
    return jnp.concatenate([a] * n, axis=1)


# =============================== fused kernel ======================================
def _tpa_kernel(xmv_ref, xuni_ref,
                wih_ref, bmv_ref, whh_ref,
                uwih_ref, ub_ref, uwhh_ref,
                wconv_ref, convb_ref,
                amt_ref, fsmt_ref, cvmt_ref, fint_ref,
                ampk_ref, cvpk_ref, hmpk_ref, fmt_ref, brt_ref,
                hww_ref, hwb_ref,
                rep8_ref, rep16_ref, rep9_ref,
                sumi8_ref, sumi16_ref, sumi9_ref, sumo8_ref,
                out_ref):
    wih = wih_ref[...]; bmv = bmv_ref[...]; whh = whh_ref[...]
    uwih = uwih_ref[...]; ub = ub_ref[...]; uwhh = uwhh_ref[...]

    # ---------------- hoisted input projections (off the recurrence chain) ----------
    xg = [jnp.dot(xmv_ref[t], wih, preferred_element_type=F32) + bmv
          for t in range(W)]                                     # W x (B, 4H)
    xu = xuni_ref[...]                                           # (CB, W)
    xgu = [xu[:, t:t + 1] * uwih + ub for t in range(W)]         # W x (CB, 4HU)

    # ---------------- interleaved LSTM recurrences (fused gate matmuls) -------------
    h = jnp.zeros((B, H), F32);  c = jnp.zeros((B, H), F32)
    hu = jnp.zeros((CB, HU), F32);  cu = jnp.zeros((CB, HU), F32)
    h_list, hu_list = [], []
    for t in range(W):
        # multivariate LSTM step: one (B,H)x(H,4H) matmul
        g = xg[t] + jnp.dot(h, whh, preferred_element_type=F32)          # (B, 4H)
        sg = _sigmoid(g); tg = jnp.tanh(g)
        c = sg[:, H:2 * H] * c + sg[:, 0:H] * tg[:, 2 * H:3 * H]
        h = sg[:, 3 * H:4 * H] * jnp.tanh(c)
        h_list.append(h)
        # univariate LSTM step (all C*B scalar series): one (CB,HU)x(HU,4HU) matmul
        gu = xgu[t] + jnp.dot(hu, uwhh, preferred_element_type=F32)      # (CB, 4HU)
        sgu = _sigmoid(gu); tgu = jnp.tanh(gu)
        cu = sgu[:, HU:2 * HU] * cu + sgu[:, 0:HU] * tgu[:, 2 * HU:3 * HU]
        hu = sgu[:, 3 * HU:4 * HU] * jnp.tanh(cu)
        hu_list.append(hu)

    hn = h_list[-1]                                              # (B, H)
    hcat = jnp.concatenate(h_list, axis=1)                       # (B, W*H)  col t*H+j
    uh = jnp.concatenate(hu_list, axis=1)                        # (CB, W*HU) col 4t+u
    # per-batch flat buffer, column 32f+4t+u  (== torch cat(...).view raw layout)
    xnat = jnp.concatenate([uh[f * B:(f + 1) * B, :] for f in range(C)], axis=1)       # (B, 288)
    lhf = jnp.concatenate([hu_list[-1][f * B:(f + 1) * B, :] for f in range(C)], axis=1)  # (B, 36)

    rep8 = rep8_ref[...]; rep16 = rep16_ref[...]; rep9 = rep9_ref[...]
    sumi8 = sumi8_ref[...]; sumi16 = sumi16_ref[...]; sumi9 = sumi9_ref[...]
    sumo8 = sumo8_ref[...]

    # ---------------- Conv2d as one Toeplitz matmul + ReLU (dropout == id) ----------
    s = jnp.maximum(jnp.dot(hcat, wconv_ref[...], preferred_element_type=F32)
                    + convb_ref[...], 0.0)                       # (B, TC*HIDC) col tc*8+k

    # ---------------- multivariate TPA attention, batched over B --------------------
    # v[b,k] = sum_j AM[b,k,j] * hn[b,j]
    v = jnp.dot(jnp.dot(hn, rep8, preferred_element_type=F32) * amt_ref[...],
                sumi8, preferred_element_type=F32)               # (B, HIDC)
    sc = jnp.dot(s * _tile_lanes(v, TC), sumo8, preferred_element_type=F32)   # (B, TC)
    sc = sc - jnp.max(sc, axis=1, keepdims=True)
    e = jnp.exp(sc)
    alpha = e / jnp.sum(e, axis=1, keepdims=True)                # exact softmax
    ctx = jnp.dot(jnp.dot(alpha, rep8[:TC, :TC * HIDC], preferred_element_type=F32) * s,
                  sumi8[:TC * HIDC, :], preferred_element_type=F32)           # (B, HIDC)
    hint = (jnp.dot(jnp.dot(hn, rep16[:H, :H * H], preferred_element_type=F32) * fsmt_ref[...],
                    sumi16[:H * H, :], preferred_element_type=F32)
            + jnp.dot(jnp.dot(ctx, rep16[:HIDC, :HIDC * H], preferred_element_type=F32) * cvmt_ref[...],
                      sumi16[:HIDC * H, :], preferred_element_type=F32))      # (B, H)

    # ---------------- univariate attention (features along lanes, scrambled view) ---
    # lh_{b,c'}[a] = lhf[b, 9a+c'] ;  AH_{b,c'}[w',u'] = xnat[b, 36w'+9u'+c']
    lh_t = [_tile_lanes(lhf[:, C * a:C * (a + 1)], HU) for a in range(HU)]
    vm = ampk_ref[0] * lh_t[0]
    for a in range(1, HU):
        vm = vm + ampk_ref[a] * lh_t[a]                          # (B, HU*C)
    xsl = [xnat[:, HU * C * w:HU * C * (w + 1)] for w in range(W)]
    sw = []
    for w in range(W):
        pw = xsl[w] * vm
        sw.append(pw[:, 0:C] + pw[:, C:2 * C] + pw[:, 2 * C:3 * C] + pw[:, 3 * C:4 * C])  # (B, C)
    m = sw[0]
    for w in range(1, W):
        m = jnp.maximum(m, sw[w])
    ew = [jnp.exp(x - m) for x in sw]
    den = ew[0]
    for w in range(1, W):
        den = den + ew[w]
    inv = 1.0 / den                                              # exact softmax denom
    aw = [x * inv for x in ew]
    ctxu = _tile_lanes(aw[0], HU) * xsl[0]
    for w in range(1, W):
        ctxu = ctxu + _tile_lanes(aw[w], HU) * xsl[w]            # (B, HU*C)
    ctx_t = [_tile_lanes(ctxu[:, C * a:C * (a + 1)], HU) for a in range(HU)]
    h1 = cvpk_ref[0] * ctx_t[0] + hmpk_ref[0] * lh_t[0]
    for a in range(1, HU):
        h1 = h1 + cvpk_ref[a] * ctx_t[a] + hmpk_ref[a] * lh_t[a]  # (B, HU*C)
    hout = jnp.dot(jnp.dot(h1, rep16, preferred_element_type=F32) * fmt_ref[...],
                   sumi16, preferred_element_type=F32)           # (B, H)
    hi2 = jnp.dot(jnp.dot(hout, rep16[:H, :H * H], preferred_element_type=F32) * brt_ref[...],
                  sumi16[:H * H, :], preferred_element_type=F32)  # (B, H)

    comb = hint + hi2
    res = jnp.dot(jnp.dot(comb, rep9, preferred_element_type=F32) * fint_ref[...],
                  sumi9, preferred_element_type=F32)             # (B, OUT)

    # ---------------- highway network ------------------------------------------------
    xhw = jnp.concatenate([xmv_ref[W - HW + w][:, 0:OUT] for w in range(HW)], axis=1)  # (B, HW*OUT)
    z = jnp.dot(xhw * hww_ref[...], sumi9[:HW * OUT, :], preferred_element_type=F32) + hwb_ref[...]
    out_ref[...] = res + z                                       # single (B, OUT) store


# ------------------------------- parameters & packing -------------------------------
def init_params(key):
    ks = jax.random.split(key, 20)
    s = 0.1
    p = {
        'lstm_w_ih': s * jax.random.normal(ks[0], (4 * H, C)),
        'lstm_w_hh': s * jax.random.normal(ks[1], (4 * H, H)),
        'lstm_b_ih': s * jax.random.normal(ks[2], (4 * H,)),
        'lstm_b_hh': s * jax.random.normal(ks[3], (4 * H,)),
        'uni_w_ih': s * jax.random.normal(ks[4], (4 * HU, 1)),
        'uni_w_hh': s * jax.random.normal(ks[5], (4 * HU, HU)),
        'uni_b_ih': s * jax.random.normal(ks[6], (4 * HU,)),
        'uni_b_hh': s * jax.random.normal(ks[7], (4 * HU,)),
        'conv_w': s * jax.random.normal(ks[8], (HIDC, 1, CK, H)),
        'conv_b': s * jax.random.normal(ks[9], (HIDC,)),
        'attention_matrix': s * jax.random.normal(ks[10], (B, HIDC, H)),
        'context_vector_matrix': s * jax.random.normal(ks[11], (B, H, HIDC)),
        'final_state_matrix': s * jax.random.normal(ks[12], (B, H, H)),
        'final_matrix': s * jax.random.normal(ks[13], (B, OUT, H)),
        'attention_matrix_uni': s * jax.random.normal(ks[14], (B, HU, HU, C)),
        'context_vector_matrix_uni': s * jax.random.normal(ks[15], (B, HU, HU, C)),
        'final_hidden_uni_matrix': s * jax.random.normal(ks[16], (B, HU, HU, C)),
        'final_uni_matrix': s * jax.random.normal(ks[17], (B, H, HU, C)),
        'bridge_matrix': s * jax.random.normal(ks[18], (B, H, H)),
        'highway_w': s * jax.random.normal(ks[19], (1, HW)),
        'highway_b': jnp.zeros((1,)),
    }
    return jax.tree.map(lambda a: a.astype(F32), p)


def pack_params(p):
    """One-time packing into kernel-friendly 2-D layouts (outside jit)."""
    eye = lambda n: jnp.eye(n, dtype=F32)

    def rep_mat(n, r):      # (n, n*r): out col j*r+i gets in col j
        return jnp.kron(eye(n), jnp.ones((1, r), F32))

    def sum_inner(n, r):    # (n*r, r): sums over outer blocks j, keeps inner i
        return jnp.tile(eye(r), (n, 1))

    def sum_outer(n, r):    # (n*r, n): sums inner i within each block j
        return jnp.kron(eye(n), jnp.ones((r, 1), F32))

    # conv as Toeplitz matmul
    wconv = jnp.zeros((W * H, TC * HIDC), F32)
    cw = p['conv_w']
    for tc in range(TC):
        for cc in range(CK):
            wconv = wconv.at[(tc + cc) * H:(tc + cc + 1) * H,
                             tc * HIDC:(tc + 1) * HIDC].set(cw[:, 0, cc, :].T)

    pp = {
        # LSTMs (PyTorch gate order i,f,g,o; fused 4H-wide recurrent weights)
        'wih_t': p['lstm_w_ih'].T,                                           # (C, 4H)
        'bmv': (p['lstm_b_ih'] + p['lstm_b_hh'])[None, :],                   # (1, 4H)
        'whh_cat': p['lstm_w_hh'].T,                                         # (H, 4H)
        'uwih_row': p['uni_w_ih'].T,                                         # (1, 4HU)
        'ub': (p['uni_b_ih'] + p['uni_b_hh'])[None, :],                      # (1, 4HU)
        'uwhh_cat': p['uni_w_hh'].T,                                         # (HU, 4HU)
        # conv
        'wconv': wconv,                                                      # (W*H, TC*HIDC)
        'convb_t': jnp.tile(p['conv_b'], TC)[None, :],                       # (1, TC*HIDC)
        # multivariate TPA (flattened per-batch matrices, col = in*dim_out + out)
        'amt_flat': jnp.transpose(p['attention_matrix'], (0, 2, 1)).reshape(B, H * HIDC),
        'fsmt_flat': jnp.transpose(p['final_state_matrix'], (0, 2, 1)).reshape(B, H * H),
        'cvmt_flat': jnp.transpose(p['context_vector_matrix'], (0, 2, 1)).reshape(B, HIDC * H),
        'fint_flat': jnp.transpose(p['final_matrix'], (0, 2, 1)).reshape(B, H * OUT),
        'brt_flat': jnp.transpose(p['bridge_matrix'], (0, 2, 1)).reshape(B, H * H),
        # univariate attention (scrambled-view packing: col = 9*u' + c')
        'ampk': jnp.transpose(p['attention_matrix_uni'], (2, 0, 1, 3)).reshape(HU, B, HU * C),
        'cvpk': jnp.transpose(p['context_vector_matrix_uni'], (2, 0, 1, 3)).reshape(HU, B, HU * C),
        'hmpk': jnp.transpose(p['final_hidden_uni_matrix'], (2, 0, 1, 3)).reshape(HU, B, HU * C),
        'fmt_flat': jnp.transpose(p['final_uni_matrix'], (0, 2, 3, 1)).reshape(B, HU * C * H),
        # highway
        'hww_t': jnp.repeat(p['highway_w'][0], OUT)[None, :],                # (1, HW*OUT)
        'hwb': p['highway_b'].reshape(1, 1),                                 # (1, 1)
        # fixed 0/1 repeat / segment-sum matrices
        'rep8': rep_mat(H, HIDC),          # (16, 128)
        'rep16': rep_mat(HU * C, H),       # (36, 576)
        'rep9': rep_mat(H, OUT),           # (16, 144)
        'sumi8': sum_inner(H, HIDC),       # (128, 8)
        'sumi16': sum_inner(HU * C, H),    # (576, 16)
        'sumi9': sum_inner(H, OUT),        # (144, 9)
        'sumo8': sum_outer(TC, HIDC),      # (48, 6)
    }
    return pp


# ------------------------------------ forward ---------------------------------------
def tpa_forward(x, pp):
    x_mv = jnp.transpose(x, (1, 0, 2))                       # (W, B, C), time-major
    x_uni = jnp.transpose(x, (2, 0, 1)).reshape(CB, W)       # row f*B+b, col t
    args = (x_mv, x_uni,
            pp['wih_t'], pp['bmv'], pp['whh_cat'],
            pp['uwih_row'], pp['ub'], pp['uwhh_cat'],
            pp['wconv'], pp['convb_t'],
            pp['amt_flat'], pp['fsmt_flat'], pp['cvmt_flat'], pp['fint_flat'],
            pp['ampk'], pp['cvpk'], pp['hmpk'], pp['fmt_flat'], pp['brt_flat'],
            pp['hww_t'], pp['hwb'],
            pp['rep8'], pp['rep16'], pp['rep9'],
            pp['sumi8'], pp['sumi16'], pp['sumi9'], pp['sumo8'])
    return pl.pallas_call(
        _tpa_kernel,
        out_shape=jax.ShapeDtypeStruct((B, OUT), F32),
        in_specs=[VSPEC] * len(args),
        out_specs=VSPEC,
    )(*args)


# ------------------------- pure-JAX reference (mirrors the module) ------------------
def reference_forward(x, p):
    def lstm(xseq, w_ih, w_hh, b_ih, b_hh, hid):
        bsz = xseq.shape[1]
        h = jnp.zeros((bsz, hid), F32)
        c = jnp.zeros((bsz, hid), F32)
        outs = []
        for t in range(xseq.shape[0]):
            gates = xseq[t] @ w_ih.T + b_ih + h @ w_hh.T + b_hh
            i = jax.nn.sigmoid(gates[:, 0:hid])
            f = jax.nn.sigmoid(gates[:, hid:2 * hid])
            g = jnp.tanh(gates[:, 2 * hid:3 * hid])
            o = jax.nn.sigmoid(gates[:, 3 * hid:4 * hid])
            c = f * c + i * g
            h = o * jnp.tanh(c)
            outs.append(h)
        return jnp.stack(outs, axis=0), h

    xs = jnp.transpose(x, (1, 0, 2))
    lstm_out, hn = lstm(xs, p['lstm_w_ih'], p['lstm_w_hh'], p['lstm_b_ih'], p['lstm_b_hh'], H)
    out_re = jnp.transpose(lstm_out, (1, 0, 2))                       # (B, W, H)

    conv_rows = []
    for tc in range(TC):
        win = out_re[:, tc:tc + CK, :]
        conv_rows.append(jnp.einsum('bcj,kcj->bk', win, p['conv_w'][:, 0, :, :]) + p['conv_b'][None, :])
    conv_sc = jax.nn.relu(jnp.stack(conv_rows, axis=1))               # (B, TC, HIDC)

    mat1 = jnp.einsum('btk,bkj->btj', conv_sc, p['attention_matrix'])
    scoring = jnp.einsum('btj,bj->bt', mat1, hn)
    alpha = jax.nn.softmax(scoring, axis=1)
    ctxv = jnp.sum(alpha[:, :, None] * conv_sc, axis=1)               # (B, HIDC)
    h_int = (jnp.einsum('bij,bj->bi', p['final_state_matrix'], hn)
             + jnp.einsum('bik,bk->bi', p['context_vector_matrix'], ctxv))

    all_h, last_h = None, None
    for f in range(C):
        xf = jnp.transpose(x[:, :, f:f + 1], (1, 0, 2))               # (W, B, 1)
        uo, uhn = lstm(xf, p['uni_w_ih'], p['uni_w_hh'], p['uni_b_ih'], p['uni_b_hh'], HU)
        uo_b = jnp.transpose(uo, (1, 0, 2))
        uhn_b = uhn[:, None, :]
        all_h = uo_b if all_h is None else jnp.concatenate([all_h, uo_b], axis=1)
        last_h = uhn_b if last_h is None else jnp.concatenate([last_h, uhn_b], axis=1)
    all_h = all_h.reshape(B, W, HU, C)                                # raw .view reinterpretation
    last_h = last_h.reshape(B, 1, HU, C)

    h_output = None
    for f in range(C):
        am = p['attention_matrix_uni'][:, :, :, f]
        cvm = p['context_vector_matrix_uni'][:, :, :, f]
        hm = p['final_hidden_uni_matrix'][:, :, :, f]
        fm = p['final_uni_matrix'][:, :, :, f]
        ah = all_h[:, :, :, f]
        lh = jnp.transpose(last_h[:, :, :, f], (0, 2, 1))             # (B, HU, 1)
        m1 = jnp.einsum('bwu,bua->bwa', ah, am)
        m2 = jnp.einsum('bwa,bao->bwo', m1, lh)
        att = jax.nn.softmax(m2, axis=1)
        ctxi = jnp.sum(att * ah, axis=1)[:, :, None]
        h1 = jnp.einsum('bua,bao->buo', cvm, ctxi) + jnp.einsum('bua,bao->buo', hm, lh)
        contrib = jnp.einsum('biu,buo->bio', fm, h1)
        h_output = contrib if h_output is None else h_output + contrib
    h_int2 = jnp.einsum('bij,bjo->bio', p['bridge_matrix'], h_output)[:, :, 0]
    h_comb = h_int + h_int2
    result = jnp.einsum('boi,bi->bo', p['final_matrix'], h_comb)

    z = x[:, -HW:, :OUT]
    z = jnp.transpose(z, (0, 2, 1)).reshape(-1, HW) @ p['highway_w'].T + p['highway_b']
    return result + z.reshape(B, OUT)


if __name__ == "__main__":
    key = jax.random.PRNGKey(0)
    kx, kp = jax.random.split(key)
    x = jax.random.normal(kx, (B, W, C), dtype=F32)
    raw_params = init_params(kp)
    packed = pack_params(raw_params)            # one-time packing, outside jit

    out = jax.jit(tpa_forward)(x, packed)
    jax.block_until_ready(out)
    assert out.shape == (B, OUT), out.shape
    assert bool(jnp.all(jnp.isfinite(out)))

    ref = jax.jit(reference_forward)(x, raw_params)
    jax.block_until_ready(ref)
    assert bool(jnp.allclose(out, ref, rtol=5e-3, atol=1e-4)), (out, ref)

    print("KERNEL_OK")
</pallas_src>

<mosaic_0001>
module attributes {stable_mosaic.version = 11 : i64} {
  func.func @_tpa_kernel(%arg0: memref<8x2x9xf32, #tpu.memory_space<vmem>>, %arg1: memref<18x8xf32, #tpu.memory_space<vmem>>, %arg2: memref<9x64xf32, #tpu.memory_space<vmem>>, %arg3: memref<1x64xf32, #tpu.memory_space<vmem>>, %arg4: memref<16x64xf32, #tpu.memory_space<vmem>>, %arg5: memref<1x16xf32, #tpu.memory_space<vmem>>, %arg6: memref<1x16xf32, #tpu.memory_space<vmem>>, %arg7: memref<4x16xf32, #tpu.memory_space<vmem>>, %arg8: memref<128x48xf32, #tpu.memory_space<vmem>>, %arg9: memref<1x48xf32, #tpu.memory_space<vmem>>, %arg10: memref<2x128xf32, #tpu.memory_space<vmem>>, %arg11: memref<2x256xf32, #tpu.memory_space<vmem>>, %arg12: memref<2x128xf32, #tpu.memory_space<vmem>>, %arg13: memref<2x144xf32, #tpu.memory_space<vmem>>, %arg14: memref<4x2x36xf32, #tpu.memory_space<vmem>>, %arg15: memref<4x2x36xf32, #tpu.memory_space<vmem>>, %arg16: memref<4x2x36xf32, #tpu.memory_space<vmem>>, %arg17: memref<2x576xf32, #tpu.memory_space<vmem>>, %arg18: memref<2x256xf32, #tpu.memory_space<vmem>>, %arg19: memref<1x36xf32, #tpu.memory_space<vmem>>, %arg20: memref<1x1xf32, #tpu.memory_space<vmem>>, %arg21: memref<16x128xf32, #tpu.memory_space<vmem>>, %arg22: memref<36x576xf32, #tpu.memory_space<vmem>>, %arg23: memref<16x144xf32, #tpu.memory_space<vmem>>, %arg24: memref<128x8xf32, #tpu.memory_space<vmem>>, %arg25: memref<576x16xf32, #tpu.memory_space<vmem>>, %arg26: memref<144x9xf32, #tpu.memory_space<vmem>>, %arg27: memref<48x6xf32, #tpu.memory_space<vmem>>, %arg28: memref<2x9xf32, #tpu.memory_space<vmem>>) attributes {dimension_semantics = [], scalar_prefetch = 0 : i64, scratch_operands = 0 : i64, tpu.core_type = #tpu.core_type<tc>} {
    %c0 = arith.constant 0 : index
    %c0_0 = arith.constant 0 : index
    %0 = vector.load %arg2[%c0, %c0_0] : memref<9x64xf32, #tpu.memory_space<vmem>>, vector<9x64xf32>
    %c0_1 = arith.constant 0 : index
    %c0_2 = arith.constant 0 : index
    %1 = vector.load %arg3[%c0_1, %c0_2] : memref<1x64xf32, #tpu.memory_space<vmem>>, vector<1x64xf32>
    %c0_3 = arith.constant 0 : index
    %c0_4 = arith.constant 0 : index
    %2 = vector.load %arg4[%c0_3, %c0_4] : memref<16x64xf32, #tpu.memory_space<vmem>>, vector<16x64xf32>
    %c0_5 = arith.constant 0 : index
    %c0_6 = arith.constant 0 : index
    %3 = vector.load %arg5[%c0_5, %c0_6] : memref<1x16xf32, #tpu.memory_space<vmem>>, vector<1x16xf32>
    %c0_7 = arith.constant 0 : index
    %c0_8 = arith.constant 0 : index
    %4 = vector.load %arg6[%c0_7, %c0_8] : memref<1x16xf32, #tpu.memory_space<vmem>>, vector<1x16xf32>
    %c0_9 = arith.constant 0 : index
    %c0_10 = arith.constant 0 : index
    %5 = vector.load %arg7[%c0_9, %c0_10] : memref<4x16xf32, #tpu.memory_space<vmem>>, vector<4x16xf32>
    %c0_11 = arith.constant 0 : index
    %c0_12 = arith.constant 0 : index
    %c0_13 = arith.constant 0 : index
    %6 = vector.load %arg0[%c0_11, %c0_12, %c0_13] : memref<8x2x9xf32, #tpu.memory_space<vmem>>, vector<1x2x9xf32>
    %7 = vector.shape_cast %6 : vector<1x2x9xf32> to vector<2x9xf32>
    %cst = arith.constant dense<0.000000e+00> : vector<2x64xf32>
    %8 = tpu.matmul %7, %0, %cst {dimension_numbers = #tpu.dot_dimension_numbers<[1], [0], [0], [1], [0, 0, 1, 1], [], []>} : vector<2x9xf32>, vector<9x64xf32>, vector<2x64xf32> -> vector<2x64xf32>
    %9 = vector.broadcast %1 : vector<1x64xf32> to vector<2x64xf32>
    %10 = arith.addf %8, %9 : vector<2x64xf32>
    %c1 = arith.constant 1 : index
    %c0_14 = arith.constant 0 : index
    %c0_15 = arith.constant 0 : index
    %11 = vector.load %arg0[%c1, %c0_14, %c0_15] : memref<8x2x9xf32, #tpu.memory_space<vmem>>, vector<1x2x9xf32>
    %12 = vector.shape_cast %11 : vector<1x2x9xf32> to vector<2x9xf32>
    %cst_16 = arith.constant dense<0.000000e+00> : vector<2x64xf32>
    %13 = tpu.matmul %12, %0, %cst_16 {dimension_numbers = #tpu.dot_dimension_numbers<[1], [0], [0], [1], [0, 0, 1, 1], [], []>} : vector<2x9xf32>, vector<9x64xf32>, vector<2x64xf32> -> vector<2x64xf32>
    %14 = vector.broadcast %1 : vector<1x64xf32> to vector<2x64xf32>
    %15 = arith.addf %13, %14 : vector<2x64xf32>
    %c2 = arith.constant 2 : index
    %c0_17 = arith.constant 0 : index
    %c0_18 = arith.constant 0 : index
    %16 = vector.load %arg0[%c2, %c0_17, %c0_18] : memref<8x2x9xf32, #tpu.memory_space<vmem>>, vector<1x2x9xf32>
    %17 = vector.shape_cast %16 : vector<1x2x9xf32> to vector<2x9xf32>
    %cst_19 = arith.constant dense<0.000000e+00> : vector<2x64xf32>
    %18 = tpu.matmul %17, %0, %cst_19 {dimension_numbers = #tpu.dot_dimension_numbers<[1], [0], [0], [1], [0, 0, 1, 1], [], []>} : vector<2x9xf32>, vector<9x64xf32>, vector<2x64xf32> -> vector<2x64xf32>
    %19 = vector.broadcast %1 : vector<1x64xf32> to vector<2x64xf32>
    %20 = arith.addf %18, %19 : vector<2x64xf32>
    %c3 = arith.constant 3 : index
    %c0_20 = arith.constant 0 : index
    %c0_21 = arith.constant 0 : index
    %21 = vector.load %arg0[%c3, %c0_20, %c0_21] : memref<8x2x9xf32, #tpu.memory_space<vmem>>, vector<1x2x9xf32>
    %22 = vector.shape_cast %21 : vector<1x2x9xf32> to vector<2x9xf32>
    %cst_22 = arith.constant dense<0.000000e+00> : vector<2x64xf32>
    %23 = tpu.matmul %22, %0, %cst_22 {dimension_numbers = #tpu.dot_dimension_numbers<[1], [0], [0], [1], [0, 0, 1, 1], [], []>} : vector<2x9xf32>, vector<9x64xf32>, vector<2x64xf32> -> vector<2x64xf32>
    %24 = vector.broadcast %1 : vector<1x64xf32> to vector<2x64xf32>
    %25 = arith.addf %23, %24 : vector<2x64xf32>
    %c4 = arith.constant 4 : index
    %c0_23 = arith.constant 0 : index
    %c0_24 = arith.constant 0 : index
    %26 = vector.load %arg0[%c4, %c0_23, %c0_24] : memref<8x2x9xf32, #tpu.memory_space<vmem>>, vector<1x2x9xf32>
    %27 = vector.shape_cast %26 : vector<1x2x9xf32> to vector<2x9xf32>
    %cst_25 = arith.constant dense<0.000000e+00> : vector<2x64xf32>
    %28 = tpu.matmul %27, %0, %cst_25 {dimension_numbers = #tpu.dot_dimension_numbers<[1], [0], [0], [1], [0, 0, 1, 1], [], []>} : vector<2x9xf32>, vector<9x64xf32>, vector<2x64xf32> -> vector<2x64xf32>
    %29 = vector.broadcast %1 : vector<1x64xf32> to vector<2x64xf32>
    %30 = arith.addf %28, %29 : vector<2x64xf32>
    %c5 = arith.constant 5 : index
    %c0_26 = arith.constant 0 : index
    %c0_27 = arith.constant 0 : index
    %31 = vector.load %arg0[%c5, %c0_26, %c0_27] : memref<8x2x9xf32, #tpu.memory_space<vmem>>, vector<1x2x9xf32>
    %32 = vector.shape_cast %31 : vector<1x2x9xf32> to vector<2x9xf32>
    %cst_28 = arith.constant dense<0.000000e+00> : vector<2x64xf32>
    %33 = tpu.matmul %32, %0, %cst_28 {dimension_numbers = #tpu.dot_dimension_numbers<[1], [0], [0], [1], [0, 0, 1, 1], [], []>} : vector<2x9xf32>, vector<9x64xf32>, vector<2x64xf32> -> vector<2x64xf32>
    %34 = vector.broadcast %1 : vector<1x64xf32> to vector<2x64xf32>
    %35 = arith.addf %33, %34 : vector<2x64xf32>
    %c6 = arith.constant 6 : index
    %c0_29 = arith.constant 0 : index
    %c0_30 = arith.constant 0 : index
    %36 = vector.load %arg0[%c6, %c0_29, %c0_30] : memref<8x2x9xf32, #tpu.memory_space<vmem>>, vector<1x2x9xf32>
    %37 = vector.shape_cast %36 : vector<1x2x9xf32> to vector<2x9xf32>
    %cst_31 = arith.constant dense<0.000000e+00> : vector<2x64xf32>
    %38 = tpu.matmul %37, %0, %cst_31 {dimension_numbers = #tpu.dot_dimension_numbers<[1], [0], [0], [1], [0, 0, 1, 1], [], []>} : vector<2x9xf32>, vector<9x64xf32>, vector<2x64xf32> -> vector<2x64xf32>
    %39 = vector.broadcast %1 : vector<1x64xf32> to vector<2x64xf32>
    %40 = arith.addf %38, %39 : vector<2x64xf32>
    %c7 = arith.constant 7 : index
    %c0_32 = arith.constant 0 : index
    %c0_33 = arith.constant 0 : index
    %41 = vector.load %arg0[%c7, %c0_32, %c0_33] : memref<8x2x9xf32, #tpu.memory_space<vmem>>, vector<1x2x9xf32>
    %42 = vector.shape_cast %41 : vector<1x2x9xf32> to vector<2x9xf32>
    %cst_34 = arith.constant dense<0.000000e+00> : vector<2x64xf32>
    %43 = tpu.matmul %42, %0, %cst_34 {dimension_numbers = #tpu.dot_dimension_numbers<[1], [0], [0], [1], [0, 0, 1, 1], [], []>} : vector<2x9xf32>, vector<9x64xf32>, vector<2x64xf32> -> vector<2x64xf32>
    %44 = vector.broadcast %1 : vector<1x64xf32> to vector<2x64xf32>
    %45 = arith.addf %43, %44 : vector<2x64xf32>
    %c0_35 = arith.constant 0 : index
    %c0_36 = arith.constant 0 : index
    %46 = vector.load %arg1[%c0_35, %c0_36] : memref<18x8xf32, #tpu.memory_space<vmem>>, vector<18x8xf32>
    %47 = vector.extract_strided_slice %46 {offsets = [0, 0], sizes = [18, 1], strides = [1, 1]} : vector<18x8xf32> to vector<18x1xf32>
    %48 = vector.broadcast %47 : vector<18x1xf32> to vector<18x16xf32>
    %49 = vector.broadcast %3 : vector<1x16xf32> to vector<18x16xf32>
    %50 = arith.mulf %48, %49 : vector<18x16xf32>
    %51 = vector.broadcast %4 : vector<1x16xf32> to vector<18x16xf32>
    %52 = arith.addf %50, %51 : vector<18x16xf32>
    %53 = vector.extract_strided_slice %46 {offsets = [0, 1], sizes = [18, 1], strides = [1, 1]} : vector<18x8xf32> to vector<18x1xf32>
    %54 = vector.broadcast %53 : vector<18x1xf32> to vector<18x16xf32>
    %55 = vector.broadcast %3 : vector<1x16xf32> to vector<18x16xf32>
    %56 = arith.mulf %54, %55 : vector<18x16xf32>
    %57 = vector.broadcast %4 : vector<1x16xf32> to vector<18x16xf32>
    %58 = arith.addf %56, %57 : vector<18x16xf32>
    %59 = vector.extract_strided_slice %46 {offsets = [0, 2], sizes = [18, 1], strides = [1, 1]} : vector<18x8xf32> to vector<18x1xf32>
    %60 = vector.broadcast %59 : vector<18x1xf32> to vector<18x16xf32>
    %61 = vector.broadcast %3 : vector<1x16xf32> to vector<18x16xf32>
    %62 = arith.mulf %60, %61 : vector<18x16xf32>
    %63 = vector.broadcast %4 : vector<1x16xf32> to vector<18x16xf32>
    %64 = arith.addf %62, %63 : vector<18x16xf32>
    %65 = vector.extract_strided_slice %46 {offsets = [0, 3], sizes = [18, 1], strides = [1, 1]} : vector<18x8xf32> to vector<18x1xf32>
    %66 = vector.broadcast %65 : vector<18x1xf32> to vector<18x16xf32>
    %67 = vector.broadcast %3 : vector<1x16xf32> to vector<18x16xf32>
    %68 = arith.mulf %66, %67 : vector<18x16xf32>
    %69 = vector.broadcast %4 : vector<1x16xf32> to vector<18x16xf32>
    %70 = arith.addf %68, %69 : vector<18x16xf32>
    %71 = vector.extract_strided_slice %46 {offsets = [0, 4], sizes = [18, 1], strides = [1, 1]} : vector<18x8xf32> to vector<18x1xf32>
    %72 = vector.broadcast %71 : vector<18x1xf32> to vector<18x16xf32>
    %73 = vector.broadcast %3 : vector<1x16xf32> to vector<18x16xf32>
    %74 = arith.mulf %72, %73 : vector<18x16xf32>
    %75 = vector.broadcast %4 : vector<1x16xf32> to vector<18x16xf32>
    %76 = arith.addf %74, %75 : vector<18x16xf32>
    %77 = vector.extract_strided_slice %46 {offsets = [0, 5], sizes = [18, 1], strides = [1, 1]} : vector<18x8xf32> to vector<18x1xf32>
    %78 = vector.broadcast %77 : vector<18x1xf32> to vector<18x16xf32>
    %79 = vector.broadcast %3 : vector<1x16xf32> to vector<18x16xf32>
    %80 = arith.mulf %78, %79 : vector<18x16xf32>
    %81 = vector.broadcast %4 : vector<1x16xf32> to vector<18x16xf32>
    %82 = arith.addf %80, %81 : vector<18x16xf32>
    %83 = vector.extract_strided_slice %46 {offsets = [0, 6], sizes = [18, 1], strides = [1, 1]} : vector<18x8xf32> to vector<18x1xf32>
    %84 = vector.broadcast %83 : vector<18x1xf32> to vector<18x16xf32>
    %85 = vector.broadcast %3 : vector<1x16xf32> to vector<18x16xf32>
    %86 = arith.mulf %84, %85 : vector<18x16xf32>
    %87 = vector.broadcast %4 : vector<1x16xf32> to vector<18x16xf32>
    %88 = arith.addf %86, %87 : vector<18x16xf32>
    %89 = vector.extract_strided_slice %46 {offsets = [0, 7], sizes = [18, 1], strides = [1, 1]} : vector<18x8xf32> to vector<18x1xf32>
    %90 = vector.broadcast %89 : vector<18x1xf32> to vector<18x16xf32>
    %91 = vector.broadcast %3 : vector<1x16xf32> to vector<18x16xf32>
    %92 = arith.mulf %90, %91 : vector<18x16xf32>
    %93 = vector.broadcast %4 : vector<1x16xf32> to vector<18x16xf32>
    %94 = arith.addf %92, %93 : vector<18x16xf32>
    %cst_37 = arith.constant 0.000000e+00 : f32
    %95 = vector.broadcast %cst_37 : f32 to vector<2x16xf32>
    %cst_38 = arith.constant 0.000000e+00 : f32
    %96 = vector.broadcast %cst_38 : f32 to vector<2x16xf32>
    %cst_39 = arith.constant 0.000000e+00 : f32
    %97 = vector.broadcast %cst_39 : f32 to vector<18x4xf32>
    %cst_40 = arith.constant 0.000000e+00 : f32
    %98 = vector.broadcast %cst_40 : f32 to vector<18x4xf32>
    %cst_41 = arith.constant dense<0.000000e+00> : vector<2x64xf32>
    %99 = tpu.matmul %95, %2, %cst_41 {dimension_numbers = #tpu.dot_dimension_numbers<[1], [0], [0], [1], [0, 0, 1, 1], [], []>} : vector<2x16xf32>, vector<16x64xf32>, vector<2x64xf32> -> vector<2x64xf32>
    %100 = arith.addf %10, %99 : vector<2x64xf32>
    %cst_42 = arith.constant 5.000000e-01 : f32
    %101 = vector.broadcast %cst_42 : f32 to vector<2x64xf32>
    %102 = arith.mulf %101, %100 : vector<2x64xf32>
    %103 = math.tanh %102 : vector<2x64xf32>
    %cst_43 = arith.constant 5.000000e-01 : f32
    %104 = vector.broadcast %cst_43 : f32 to vector<2x64xf32>
    %105 = arith.mulf %104, %103 : vector<2x64xf32>
    %cst_44 = arith.constant 5.000000e-01 : f32
    %106 = vector.broadcast %cst_44 : f32 to vector<2x64xf32>
    %107 = arith.addf %105, %106 : vector<2x64xf32>
    %108 = math.tanh %100 : vector<2x64xf32>
    %109 = vector.extract_strided_slice %107 {offsets = [0, 16], sizes = [2, 16], strides = [1, 1]} : vector<2x64xf32> to vector<2x16xf32>
    %110 = arith.mulf %109, %96 : vector<2x16xf32>
    %111 = vector.extract_strided_slice %107 {offsets = [0, 0], sizes = [2, 16], strides = [1, 1]} : vector<2x64xf32> to vector<2x16xf32>
    %112 = vector.extract_strided_slice %108 {offsets = [0, 32], sizes = [2, 16], strides = [1, 1]} : vector<2x64xf32> to vector<2x16xf32>
    %113 = arith.mulf %111, %112 : vector<2x16xf32>
    %114 = arith.addf %110, %113 : vector<2x16xf32>
    %115 = vector.extract_strided_slice %107 {offsets = [0, 48], sizes = [2, 16], strides = [1, 1]} : vector<2x64xf32> to vector<2x16xf32>
    %116 = math.tanh %114 : vector<2x16xf32>
    %117 = arith.mulf %115, %116 : vector<2x16xf32>
    %cst_45 = arith.constant dense<0.000000e+00> : vector<18x16xf32>
    %118 = tpu.matmul %97, %5, %cst_45 {dimension_numbers = #tpu.dot_dimension_numbers<[1], [0], [0], [1], [0, 0, 1, 1], [], []>} : vector<18x4xf32>, vector<4x16xf32>, vector<18x16xf32> -> vector<18x16xf32>
    %119 = arith.addf %52, %118 : vector<18x16xf32>
    %cst_46 = arith.constant 5.000000e-01 : f32
    %120 = vector.broadcast %cst_46 : f32 to vector<18x16xf32>
    %121 = arith.mulf %120, %119 : vector<18x16xf32>
    %122 = math.tanh %121 : vector<18x16xf32>
    %cst_47 = arith.constant 5.000000e-01 : f32
    %123 = vector.broadcast %cst_47 : f32 to vector<18x16xf32>
    %124 = arith.mulf %123, %122 : vector<18x16xf32>
    %cst_48 = arith.constant 5.000000e-01 : f32
    %125 = vector.broadcast %cst_48 : f32 to vector<18x16xf32>
    %126 = arith.addf %124, %125 : vector<18x16xf32>
    %127 = math.tanh %119 : vector<18x16xf32>
    %128 = vector.extract_strided_slice %126 {offsets = [0, 4], sizes = [18, 4], strides = [1, 1]} : vector<18x16xf32> to vector<18x4xf32>
    %129 = arith.mulf %128, %98 : vector<18x4xf32>
    %130 = vector.extract_strided_slice %126 {offsets = [0, 0], sizes = [18, 4], strides = [1, 1]} : vector<18x16xf32> to vector<18x4xf32>
    %131 = vector.extract_strided_slice %127 {offsets = [0, 8], sizes = [18, 4], strides = [1, 1]} : vector<18x16xf32> to vector<18x4xf32>
    %132 = arith.mulf %130, %131 : vector<18x4xf32>
    %133 = arith.addf %129, %132 : vector<18x4xf32>
    %134 = vector.extract_strided_slice %126 {offsets = [0, 12], sizes = [18, 4], strides = [1, 1]} : vector<18x16xf32> to vector<18x4xf32>
    %135 = math.tanh %133 : vector<18x4xf32>
    %136 = arith.mulf %134, %135 : vector<18x4xf32>
    %cst_49 = arith.constant dense<0.000000e+00> : vector<2x64xf32>
    %137 = tpu.matmul %117, %2, %cst_49 {dimension_numbers = #tpu.dot_dimension_numbers<[1], [0], [0], [1], [0, 0, 1, 1], [], []>} : vector<2x16xf32>, vector<16x64xf32>, vector<2x64xf32> -> vector<2x64xf32>
    %138 = arith.addf %15, %137 : vector<2x64xf32>
    %cst_50 = arith.constant 5.000000e-01 : f32
    %139 = vector.broadcast %cst_50 : f32 to vector<2x64xf32>
    %140 = arith.mulf %139, %138 : vector<2x64xf32>
    %141 = math.tanh %140 : vector<2x64xf32>
    %cst_51 = arith.constant 5.000000e-01 : f32
    %142 = vector.broadcast %cst_51 : f32 to vector<2x64xf32>
    %143 = arith.mulf %142, %141 : vector<2x64xf32>
    %cst_52 = arith.constant 5.000000e-01 : f32
    %144 = vector.broadcast %cst_52 : f32 to vector<2x64xf32>
    %145 = arith.addf %143, %144 : vector<2x64xf32>
    %146 = math.tanh %138 : vector<2x64xf32>
    %147 = vector.extract_strided_slice %145 {offsets = [0, 16], sizes = [2, 16], strides = [1, 1]} : vector<2x64xf32> to vector<2x16xf32>
    %148 = arith.mulf %147, %114 : vector<2x16xf32>
    %149 = vector.extract_strided_slice %145 {offsets = [0, 0], sizes = [2, 16], strides = [1, 1]} : vector<2x64xf32> to vector<2x16xf32>
    %150 = vector.extract_strided_slice %146 {offsets = [0, 32], sizes = [2, 16], strides = [1, 1]} : vector<2x64xf32> to vector<2x16xf32>
    %151 = arith.mulf %149, %150 : vector<2x16xf32>
    %152 = arith.addf %148, %151 : vector<2x16xf32>
    %153 = vector.extract_strided_slice %145 {offsets = [0, 48], sizes = [2, 16], strides = [1, 1]} : vector<2x64xf32> to vector<2x16xf32>
    %154 = math.tanh %152 : vector<2x16xf32>
    %155 = arith.mulf %153, %154 : vector<2x16xf32>
    %cst_53 = arith.constant dense<0.000000e+00> : vector<18x16xf32>
    %156 = tpu.matmul %136, %5, %cst_53 {dimension_numbers = #tpu.dot_dimension_numbers<[1], [0], [0], [1], [0, 0, 1, 1], [], []>} : vector<18x4xf32>, vector<4x16xf32>, vector<18x16xf32> -> vector<18x16xf32>
    %157 = arith.addf %58, %156 : vector<18x16xf32>
    %cst_54 = arith.constant 5.000000e-01 : f32
    %158 = vector.broadcast %cst_54 : f32 to vector<18x16xf32>
    %159 = arith.mulf %158, %157 : vector<18x16xf32>
    %160 = math.tanh %159 : vector<18x16xf32>
    %cst_55 = arith.constant 5.000000e-01 : f32
    %161 = vector.broadcast %cst_55 : f32 to vector<18x16xf32>
    %162 = arith.mulf %161, %160 : vector<18x16xf32>
    %cst_56 = arith.constant 5.000000e-01 : f32
    %163 = vector.broadcast %cst_56 : f32 to vector<18x16xf32>
    %164 = arith.addf %162, %163 : vector<18x16xf32>
    %165 = math.tanh %157 : vector<18x16xf32>
    %166 = vector.extract_strided_slice %164 {offsets = [0, 4], sizes = [18, 4], strides = [1, 1]} : vector<18x16xf32> to vector<18x4xf32>
    %167 = arith.mulf %166, %133 : vector<18x4xf32>
    %168 = vector.extract_strided_slice %164 {offsets = [0, 0], sizes = [18, 4], strides = [1, 1]} : vector<18x16xf32> to vector<18x4xf32>
    %169 = vector.extract_strided_slice %165 {offsets = [0, 8], sizes = [18, 4], strides = [1, 1]} : vector<18x16xf32> to vector<18x4xf32>
    %170 = arith.mulf %168, %169 : vector<18x4xf32>
    %171 = arith.addf %167, %170 : vector<18x4xf32>
    %172 = vector.extract_strided_slice %164 {offsets = [0, 12], sizes = [18, 4], strides = [1, 1]} : vector<18x16xf32> to vector<18x4xf32>
    %173 = math.tanh %171 : vector<18x4xf32>
    %174 = arith.mulf %172, %173 : vector<18x4xf32>
    %cst_57 = arith.constant dense<0.000000e+00> : vector<2x64xf32>
    %175 = tpu.matmul %155, %2, %cst_57 {dimension_numbers = #tpu.dot_dimension_numbers<[1], [0], [0], [1], [0, 0, 1, 1], [], []>} : vector<2x16xf32>, vector<16x64xf32>, vector<2x64xf32> -> vector<2x64xf32>
    %176 = arith.addf %20, %175 : vector<2x64xf32>
    %cst_58 = arith.constant 5.000000e-01 : f32
    %177 = vector.broadcast %cst_58 : f32 to vector<2x64xf32>
    %178 = arith.mulf %177, %176 : vector<2x64xf32>
    %179 = math.tanh %178 : vector<2x64xf32>
    %cst_59 = arith.constant 5.000000e-01 : f32
    %180 = vector.broadcast %cst_59 : f32 to vector<2x64xf32>
    %181 = arith.mulf %180, %179 : vector<2x64xf32>
    %cst_60 = arith.constant 5.000000e-01 : f32
    %182 = vector.broadcast %cst_60 : f32 to vector<2x64xf32>
    %183 = arith.addf %181, %182 : vector<2x64xf32>
    %184 = math.tanh %176 : vector<2x64xf32>
    %185 = vector.extract_strided_slice %183 {offsets = [0, 16], sizes = [2, 16], strides = [1, 1]} : vector<2x64xf32> to vector<2x16xf32>
    %186 = arith.mulf %185, %152 : vector<2x16xf32>
    %187 = vector.extract_strided_slice %183 {offsets = [0, 0], sizes = [2, 16], strides = [1, 1]} : vector<2x64xf32> to vector<2x16xf32>
    %188 = vector.extract_strided_slice %184 {offsets = [0, 32], sizes = [2, 16], strides = [1, 1]} : vector<2x64xf32> to vector<2x16xf32>
    %189 = arith.mulf %187, %188 : vector<2x16xf32>
    %190 = arith.addf %186, %189 : vector<2x16xf32>
    %191 = vector.extract_strided_slice %183 {offsets = [0, 48], sizes = [2, 16], strides = [1, 1]} : vector<2x64xf32> to vector<2x16xf32>
    %192 = math.tanh %190 : vector<2x16xf32>
    %193 = arith.mulf %191, %192 : vector<2x16xf32>
    %cst_61 = arith.constant dense<0.000000e+00> : vector<18x16xf32>
    %194 = tpu.matmul %174, %5, %cst_61 {dimension_numbers = #tpu.dot_dimension_numbers<[1], [0], [0], [1], [0, 0, 1, 1], [], []>} : vector<18x4xf32>, vector<4x16xf32>, vector<18x16xf32> -> vector<18x16xf32>
    %195 = arith.addf %64, %194 : vector<18x16xf32>
    %cst_62 = arith.constant 5.000000e-01 : f32
    %196 = vector.broadcast %cst_62 : f32 to vector<18x16xf32>
    %197 = arith.mulf %196, %195 : vector<18x16xf32>
    %198 = math.tanh %197 : vector<18x16xf32>
    %cst_63 = arith.constant 5.000000e-01 : f32
    %199 = vector.broadcast %cst_63 : f32 to vector<18x16xf32>
    %200 = arith.mulf %199, %198 : vector<18x16xf32>
    %cst_64 = arith.constant 5.000000e-01 : f32
    %201 = vector.broadcast %cst_64 : f32 to vector<18x16xf32>
    %202 = arith.addf %200, %201 : vector<18x16xf32>
    %203 = math.tanh %195 : vector<18x16xf32>
    %204 = vector.extract_strided_slice %202 {offsets = [0, 4], sizes = [18, 4], strides = [1, 1]} : vector<18x16xf32> to vector<18x4xf32>
    %205 = arith.mulf %204, %171 : vector<18x4xf32>
    %206 = vector.extract_strided_slice %202 {offsets = [0, 0], sizes = [18, 4], strides = [1, 1]} : vector<18x16xf32> to vector<18x4xf32>
    %207 = vector.extract_strided_slice %203 {offsets = [0, 8], sizes = [18, 4], strides = [1, 1]} : vector<18x16xf32> to vector<18x4xf32>
    %208 = arith.mulf %206, %207 : vector<18x4xf32>
    %209 = arith.addf %205, %208 : vector<18x4xf32>
    %210 = vector.extract_strided_slice %202 {offsets = [0, 12], sizes = [18, 4], strides = [1, 1]} : vector<18x16xf32> to vector<18x4xf32>
    %211 = math.tanh %209 : vector<18x4xf32>
    %212 = arith.mulf %210, %211 : vector<18x4xf32>
    %cst_65 = arith.constant dense<0.000000e+00> : vector<2x64xf32>
    %213 = tpu.matmul %193, %2, %cst_65 {dimension_numbers = #tpu.dot_dimension_numbers<[1], [0], [0], [1], [0, 0, 1, 1], [], []>} : vector<2x16xf32>, vector<16x64xf32>, vector<2x64xf32> -> vector<2x64xf32>
    %214 = arith.addf %25, %213 : vector<2x64xf32>
    %cst_66 = arith.constant 5.000000e-01 : f32
    %215 = vector.broadcast %cst_66 : f32 to vector<2x64xf32>
    %216 = arith.mulf %215, %214 : vector<2x64xf32>
    %217 = math.tanh %216 : vector<2x64xf32>
    %cst_67 = arith.constant 5.000000e-01 : f32
    %218 = vector.broadcast %cst_67 : f32 to vector<2x64xf32>
    %219 = arith.mulf %218, %217 : vector<2x64xf32>
    %cst_68 = arith.constant 5.000000e-01 : f32
    %220 = vector.broadcast %cst_68 : f32 to vector<2x64xf32>
    %221 = arith.addf %219, %220 : vector<2x64xf32>
    %222 = math.tanh %214 : vector<2x64xf32>
    %223 = vector.extract_strided_slice %221 {offsets = [0, 16], sizes = [2, 16], strides = [1, 1]} : vector<2x64xf32> to vector<2x16xf32>
    %224 = arith.mulf %223, %190 : vector<2x16xf32>
    %225 = vector.extract_strided_slice %221 {offsets = [0, 0], sizes = [2, 16], strides = [1, 1]} : vector<2x64xf32> to vector<2x16xf32>
    %226 = vector.extract_strided_slice %222 {offsets = [0, 32], sizes = [2, 16], strides = [1, 1]} : vector<2x64xf32> to vector<2x16xf32>
    %227 = arith.mulf %225, %226 : vector<2x16xf32>
    %228 = arith.addf %224, %227 : vector<2x16xf32>
    %229 = vector.extract_strided_slice %221 {offsets = [0, 48], sizes = [2, 16], strides = [1, 1]} : vector<2x64xf32> to vector<2x16xf32>
    %230 = math.tanh %228 : vector<2x16xf32>
    %231 = arith.mulf %229, %230 : vector<2x16xf32>
    %cst_69 = arith.constant dense<0.000000e+00> : vector<18x16xf32>
    %232 = tpu.matmul %212, %5, %cst_69 {dimension_numbers = #tpu.dot_dimension_numbers<[1], [0], [0], [1], [0, 0, 1, 1], [], []>} : vector<18x4xf32>, vector<4x16xf32>, vector<18x16xf32> -> vector<18x16xf32>
    %233 = arith.addf %70, %232 : vector<18x16xf32>
    %cst_70 = arith.constant 5.000000e-01 : f32
    %234 = vector.broadcast %cst_70 : f32 to vector<18x16xf32>
    %235 = arith.mulf %234, %233 : vector<18x16xf32>
    %236 = math.tanh %235 : vector<18x16xf32>
    %cst_71 = arith.constant 5.000000e-01 : f32
    %237 = vector.broadcast %cst_71 : f32 to vector<18x16xf32>
    %238 = arith.mulf %237, %236 : vector<18x16xf32>
    %cst_72 = arith.constant 5.000000e-01 : f32
    %239 = vector.broadcast %cst_72 : f32 to vector<18x16xf32>
    %240 = arith.addf %238, %239 : vector<18x16xf32>
    %241 = math.tanh %233 : vector<18x16xf32>
    %242 = vector.extract_strided_slice %240 {offsets = [0, 4], sizes = [18, 4], strides = [1, 1]} : vector<18x16xf32> to vector<18x4xf32>
    %243 = arith.mulf %242, %209 : vector<18x4xf32>
    %244 = vector.extract_strided_slice %240 {offsets = [0, 0], sizes = [18, 4], strides = [1, 1]} : vector<18x16xf32> to vector<18x4xf32>
    %245 = vector.extract_strided_slice %241 {offsets = [0, 8], sizes = [18, 4], strides = [1, 1]} : vector<18x16xf32> to vector<18x4xf32>
    %246 = arith.mulf %244, %245 : vector<18x4xf32>
    %247 = arith.addf %243, %246 : vector<18x4xf32>
    %248 = vector.extract_strided_slice %240 {offsets = [0, 12], sizes = [18, 4], strides = [1, 1]} : vector<18x16xf32> to vector<18x4xf32>
    %249 = math.tanh %247 : vector<18x4xf32>
    %250 = arith.mulf %248, %249 : vector<18x4xf32>
    %cst_73 = arith.constant dense<0.000000e+00> : vector<2x64xf32>
    %251 = tpu.matmul %231, %2, %cst_73 {dimension_numbers = #tpu.dot_dimension_numbers<[1], [0], [0], [1], [0, 0, 1, 1], [], []>} : vector<2x16xf32>, vector<16x64xf32>, vector<2x64xf32> -> vector<2x64xf32>
    %252 = arith.addf %30, %251 : vector<2x64xf32>
    %cst_74 = arith.constant 5.000000e-01 : f32
    %253 = vector.broadcast %cst_74 : f32 to vector<2x64xf32>
    %254 = arith.mulf %253, %252 : vector<2x64xf32>
    %255 = math.tanh %254 : vector<2x64xf32>
    %cst_75 = arith.constant 5.000000e-01 : f32
    %256 = vector.broadcast %cst_75 : f32 to vector<2x64xf32>
    %257 = arith.mulf %256, %255 : vector<2x64xf32>
    %cst_76 = arith.constant 5.000000e-01 : f32
    %258 = vector.broadcast %cst_76 : f32 to vector<2x64xf32>
    %259 = arith.addf %257, %258 : vector<2x64xf32>
    %260 = math.tanh %252 : vector<2x64xf32>
    %261 = vector.extract_strided_slice %259 {offsets = [0, 16], sizes = [2, 16], strides = [1, 1]} : vector<2x64xf32> to vector<2x16xf32>
    %262 = arith.mulf %261, %228 : vector<2x16xf32>
    %263 = vector.extract_strided_slice %259 {offsets = [0, 0], sizes = [2, 16], strides = [1, 1]} : vector<2x64xf32> to vector<2x16xf32>
    %264 = vector.extract_strided_slice %260 {offsets = [0, 32], sizes = [2, 16], strides = [1, 1]} : vector<2x64xf32> to vector<2x16xf32>
    %265 = arith.mulf %263, %264 : vector<2x16xf32>
    %266 = arith.addf %262, %265 : vector<2x16xf32>
    %267 = vector.extract_strided_slice %259 {offsets = [0, 48], sizes = [2, 16], strides = [1, 1]} : vector<2x64xf32> to vector<2x16xf32>
    %268 = math.tanh %266 : vector<2x16xf32>
    %269 = arith.mulf %267, %268 : vector<2x16xf32>
    %cst_77 = arith.constant dense<0.000000e+00> : vector<18x16xf32>
    %270 = tpu.matmul %250, %5, %cst_77 {dimension_numbers = #tpu.dot_dimension_numbers<[1], [0], [0], [1], [0, 0, 1, 1], [], []>} : vector<18x4xf32>, vector<4x16xf32>, vector<18x16xf32> -> vector<18x16xf32>
    %271 = arith.addf %76, %270 : vector<18x16xf32>
    %cst_78 = arith.constant 5.000000e-01 : f32
    %272 = vector.broadcast %cst_78 : f32 to vector<18x16xf32>
    %273 = arith.mulf %272, %271 : vector<18x16xf32>
    %274 = math.tanh %273 : vector<18x16xf32>
    %cst_79 = arith.constant 5.000000e-01 : f32
    %275 = vector.broadcast %cst_79 : f32 to vector<18x16xf32>
    %276 = arith.mulf %275, %274 : vector<18x16xf32>
    %cst_80 = arith.constant 5.000000e-01 : f32
    %277 = vector.broadcast %cst_80 : f32 to vector<18x16xf32>
    %278 = arith.addf %276, %277 : vector<18x16xf32>
    %279 = math.tanh %271 : vector<18x16xf32>
    %280 = vector.extract_strided_slice %278 {offsets = [0, 4], sizes = [18, 4], strides = [1, 1]} : vector<18x16xf32> to vector<18x4xf32>
    %281 = arith.mulf %280, %247 : vector<18x4xf32>
    %282 = vector.extract_strided_slice %278 {offsets = [0, 0], sizes = [18, 4], strides = [1, 1]} : vector<18x16xf32> to vector<18x4xf32>
    %283 = vector.extract_strided_slice %279 {offsets = [0, 8], sizes = [18, 4], strides = [1, 1]} : vector<18x16xf32> to vector<18x4xf32>
    %284 = arith.mulf %282, %283 : vector<18x4xf32>
    %285 = arith.addf %281, %284 : vector<18x4xf32>
    %286 = vector.extract_strided_slice %278 {offsets = [0, 12], sizes = [18, 4], strides = [1, 1]} : vector<18x16xf32> to vector<18x4xf32>
    %287 = math.tanh %285 : vector<18x4xf32>
    %288 = arith.mulf %286, %287 : vector<18x4xf32>
    %cst_81 = arith.constant dense<0.000000e+00> : vector<2x64xf32>
    %289 = tpu.matmul %269, %2, %cst_81 {dimension_numbers = #tpu.dot_dimension_numbers<[1], [0], [0], [1], [0, 0, 1, 1], [], []>} : vector<2x16xf32>, vector<16x64xf32>, vector<2x64xf32> -> vector<2x64xf32>
    %290 = arith.addf %35, %289 : vector<2x64xf32>
    %cst_82 = arith.constant 5.000000e-01 : f32
    %291 = vector.broadcast %cst_82 : f32 to vector<2x64xf32>
    %292 = arith.mulf %291, %290 : vector<2x64xf32>
    %293 = math.tanh %292 : vector<2x64xf32>
    %cst_83 = arith.constant 5.000000e-01 : f32
    %294 = vector.broadcast %cst_83 : f32 to vector<2x64xf32>
    %295 = arith.mulf %294, %293 : vector<2x64xf32>
    %cst_84 = arith.constant 5.000000e-01 : f32
    %296 = vector.broadcast %cst_84 : f32 to vector<2x64xf32>
    %297 = arith.addf %295, %296 : vector<2x64xf32>
    %298 = math.tanh %290 : vector<2x64xf32>
    %299 = vector.extract_strided_slice %297 {offsets = [0, 16], sizes = [2, 16], strides = [1, 1]} : vector<2x64xf32> to vector<2x16xf32>
    %300 = arith.mulf %299, %266 : vector<2x16xf32>
    %301 = vector.extract_strided_slice %297 {offsets = [0, 0], sizes = [2, 16], strides = [1, 1]} : vector<2x64xf32> to vector<2x16xf32>
    %302 = vector.extract_strided_slice %298 {offsets = [0, 32], sizes = [2, 16], strides = [1, 1]} : vector<2x64xf32> to vector<2x16xf32>
    %303 = arith.mulf %301, %302 : vector<2x16xf32>
    %304 = arith.addf %300, %303 : vector<2x16xf32>
    %305 = vector.extract_strided_slice %297 {offsets = [0, 48], sizes = [2, 16], strides = [1, 1]} : vector<2x64xf32> to vector<2x16xf32>
    %306 = math.tanh %304 : vector<2x16xf32>
    %307 = arith.mulf %305, %306 : vector<2x16xf32>
    %cst_85 = arith.constant dense<0.000000e+00> : vector<18x16xf32>
    %308 = tpu.matmul %288, %5, %cst_85 {dimension_numbers = #tpu.dot_dimension_numbers<[1], [0], [0], [1], [0, 0, 1, 1], [], []>} : vector<18x4xf32>, vector<4x16xf32>, vector<18x16xf32> -> vector<18x16xf32>
    %309 = arith.addf %82, %308 : vector<18x16xf32>
    %cst_86 = arith.constant 5.000000e-01 : f32
    %310 = vector.broadcast %cst_86 : f32 to vector<18x16xf32>
    %311 = arith.mulf %310, %309 : vector<18x16xf32>
    %312 = math.tanh %311 : vector<18x16xf32>
    %cst_87 = arith.constant 5.000000e-01 : f32
    %313 = vector.broadcast %cst_87 : f32 to vector<18x16xf32>
    %314 = arith.mulf %313, %312 : vector<18x16xf32>
    %cst_88 = arith.constant 5.000000e-01 : f32
    %315 = vector.broadcast %cst_88 : f32 to vector<18x16xf32>
    %316 = arith.addf %314, %315 : vector<18x16xf32>
    %317 = math.tanh %309 : vector<18x16xf32>
    %318 = vector.extract_strided_slice %316 {offsets = [0, 4], sizes = [18, 4], strides = [1, 1]} : vector<18x16xf32> to vector<18x4xf32>
    %319 = arith.mulf %318, %285 : vector<18x4xf32>
    %320 = vector.extract_strided_slice %316 {offsets = [0, 0], sizes = [18, 4], strides = [1, 1]} : vector<18x16xf32> to vector<18x4xf32>
    %321 = vector.extract_strided_slice %317 {offsets = [0, 8], sizes = [18, 4], strides = [1, 1]} : vector<18x16xf32> to vector<18x4xf32>
    %322 = arith.mulf %320, %321 : vector<18x4xf32>
    %323 = arith.addf %319, %322 : vector<18x4xf32>
    %324 = vector.extract_strided_slice %316 {offsets = [0, 12], sizes = [18, 4], strides = [1, 1]} : vector<18x16xf32> to vector<18x4xf32>
    %325 = math.tanh %323 : vector<18x4xf32>
    %326 = arith.mulf %324, %325 : vector<18x4xf32>
    %cst_89 = arith.constant dense<0.000000e+00> : vector<2x64xf32>
    %327 = tpu.matmul %307, %2, %cst_89 {dimension_numbers = #tpu.dot_dimension_numbers<[1], [0], [0], [1], [0, 0, 1, 1], [], []>} : vector<2x16xf32>, vector<16x64xf32>, vector<2x64xf32> -> vector<2x64xf32>
    %328 = arith.addf %40, %327 : vector<2x64xf32>
    %cst_90 = arith.constant 5.000000e-01 : f32
    %329 = vector.broadcast %cst_90 : f32 to vector<2x64xf32>
    %330 = arith.mulf %329, %328 : vector<2x64xf32>
    %331 = math.tanh %330 : vector<2x64xf32>
    %cst_91 = arith.constant 5.000000e-01 : f32
    %332 = vector.broadcast %cst_91 : f32 to vector<2x64xf32>
    %333 = arith.mulf %332, %331 : vector<2x64xf32>
    %cst_92 = arith.constant 5.000000e-01 : f32
    %334 = vector.broadcast %cst_92 : f32 to vector<2x64xf32>
    %335 = arith.addf %333, %334 : vector<2x64xf32>
    %336 = math.tanh %328 : vector<2x64xf32>
    %337 = vector.extract_strided_slice %335 {offsets = [0, 16], sizes = [2, 16], strides = [1, 1]} : vector<2x64xf32> to vector<2x16xf32>
    %338 = arith.mulf %337, %304 : vector<2x16xf32>
    %339 = vector.extract_strided_slice %335 {offsets = [0, 0], sizes = [2, 16], strides = [1, 1]} : vector<2x64xf32> to vector<2x16xf32>
    %340 = vector.extract_strided_slice %336 {offsets = [0, 32], sizes = [2, 16], strides = [1, 1]} : vector<2x64xf32> to vector<2x16xf32>
    %341 = arith.mulf %339, %340 : vector<2x16xf32>
    %342 = arith.addf %338, %341 : vector<2x16xf32>
    %343 = vector.extract_strided_slice %335 {offsets = [0, 48], sizes = [2, 16], strides = [1, 1]} : vector<2x64xf32> to vector<2x16xf32>
    %344 = math.tanh %342 : vector<2x16xf32>
    %345 = arith.mulf %343, %344 : vector<2x16xf32>
    %cst_93 = arith.constant dense<0.000000e+00> : vector<18x16xf32>
    %346 = tpu.matmul %326, %5, %cst_93 {dimension_numbers = #tpu.dot_dimension_numbers<[1], [0], [0], [1], [0, 0, 1, 1], [], []>} : vector<18x4xf32>, vector<4x16xf32>, vector<18x16xf32> -> vector<18x16xf32>
    %347 = arith.addf %88, %346 : vector<18x16xf32>
    %cst_94 = arith.constant 5.000000e-01 : f32
    %348 = vector.broadcast %cst_94 : f32 to vector<18x16xf32>
    %349 = arith.mulf %348, %347 : vector<18x16xf32>
    %350 = math.tanh %349 : vector<18x16xf32>
    %cst_95 = arith.constant 5.000000e-01 : f32
    %351 = vector.broadcast %cst_95 : f32 to vector<18x16xf32>
    %352 = arith.mulf %351, %350 : vector<18x16xf32>
    %cst_96 = arith.constant 5.000000e-01 : f32
    %353 = vector.broadcast %cst_96 : f32 to vector<18x16xf32>
    %354 = arith.addf %352, %353 : vector<18x16xf32>
    %355 = math.tanh %347 : vector<18x16xf32>
    %356 = vector.extract_strided_slice %354 {offsets = [0, 4], sizes = [18, 4], strides = [1, 1]} : vector<18x16xf32> to vector<18x4xf32>
    %357 = arith.mulf %356, %323 : vector<18x4xf32>
    %358 = vector.extract_strided_slice %354 {offsets = [0, 0], sizes = [18, 4], strides = [1, 1]} : vector<18x16xf32> to vector<18x4xf32>
    %359 = vector.extract_strided_slice %355 {offsets = [0, 8], sizes = [18, 4], strides = [1, 1]} : vector<18x16xf32> to vector<18x4xf32>
    %360 = arith.mulf %358, %359 : vector<18x4xf32>
    %361 = arith.addf %357, %360 : vector<18x4xf32>
    %362 = vector.extract_strided_slice %354 {offsets = [0, 12], sizes = [18, 4], strides = [1, 1]} : vector<18x16xf32> to vector<18x4xf32>
    %363 = math.tanh %361 : vector<18x4xf32>
    %364 = arith.mulf %362, %363 : vector<18x4xf32>
    %cst_97 = arith.constant dense<0.000000e+00> : vector<2x64xf32>
    %365 = tpu.matmul %345, %2, %cst_97 {dimension_numbers = #tpu.dot_dimension_numbers<[1], [0], [0], [1], [0, 0, 1, 1], [], []>} : vector<2x16xf32>, vector<16x64xf32>, vector<2x64xf32> -> vector<2x64xf32>
    %366 = arith.addf %45, %365 : vector<2x64xf32>
    %cst_98 = arith.constant 5.000000e-01 : f32
    %367 = vector.broadcast %cst_98 : f32 to vector<2x64xf32>
    %368 = arith.mulf %367, %366 : vector<2x64xf32>
    %369 = math.tanh %368 : vector<2x64xf32>
    %cst_99 = arith.constant 5.000000e-01 : f32
    %370 = vector.broadcast %cst_99 : f32 to vector<2x64xf32>
    %371 = arith.mulf %370, %369 : vector<2x64xf32>
    %cst_100 = arith.constant 5.000000e-01 : f32
    %372 = vector.broadcast %cst_100 : f32 to vector<2x64xf32>
    %373 = arith.addf %371, %372 : vector<2x64xf32>
    %374 = math.tanh %366 : vector<2x64xf32>
    %375 = vector.extract_strided_slice %373 {offsets = [0, 16], sizes = [2, 16], strides = [1, 1]} : vector<2x64xf32> to vector<2x16xf32>
    %376 = arith.mulf %375, %342 : vector<2x16xf32>
    %377 = vector.extract_strided_slice %373 {offsets = [0, 0], sizes = [2, 16], strides = [1, 1]} : vector<2x64xf32> to vector<2x16xf32>
    %378 = vector.extract_strided_slice %374 {offsets = [0, 32], sizes = [2, 16], strides = [1, 1]} : vector<2x64xf32> to vector<2x16xf32>
    %379 = arith.mulf %377, %378 : vector<2x16xf32>
    %380 = arith.addf %376, %379 : vector<2x16xf32>
    %381 = vector.extract_strided_slice %373 {offsets = [0, 48], sizes = [2, 16], strides = [1, 1]} : vector<2x64xf32> to vector<2x16xf32>
    %382 = math.tanh %380 : vector<2x16xf32>
    %383 = arith.mulf %381, %382 : vector<2x16xf32>
    %cst_101 = arith.constant dense<0.000000e+00> : vector<18x16xf32>
    %384 = tpu.matmul %364, %5, %cst_101 {dimension_numbers = #tpu.dot_dimension_numbers<[1], [0], [0], [1], [0, 0, 1, 1], [], []>} : vector<18x4xf32>, vector<4x16xf32>, vector<18x16xf32> -> vector<18x16xf32>
    %385 = arith.addf %94, %384 : vector<18x16xf32>
    %cst_102 = arith.constant 5.000000e-01 : f32
    %386 = vector.broadcast %cst_102 : f32 to vector<18x16xf32>
    %387 = arith.mulf %386, %385 : vector<18x16xf32>
    %388 = math.tanh %387 : vector<18x16xf32>
    %cst_103 = arith.constant 5.000000e-01 : f32
    %389 = vector.broadcast %cst_103 : f32 to vector<18x16xf32>
    %390 = arith.mulf %389, %388 : vector<18x16xf32>
    %cst_104 = arith.constant 5.000000e-01 : f32
    %391 = vector.broadcast %cst_104 : f32 to vector<18x16xf32>
    %392 = arith.addf %390, %391 : vector<18x16xf32>
    %393 = math.tanh %385 : vector<18x16xf32>
    %394 = vector.extract_strided_slice %392 {offsets = [0, 4], sizes = [18, 4], strides = [1, 1]} : vector<18x16xf32> to vector<18x4xf32>
    %395 = arith.mulf %394, %361 : vector<18x4xf32>
    %396 = vector.extract_strided_slice %392 {offsets = [0, 0], sizes = [18, 4], strides = [1, 1]} : vector<18x16xf32> to vector<18x4xf32>
    %397 = vector.extract_strided_slice %393 {offsets = [0, 8], sizes = [18, 4], strides = [1, 1]} : vector<18x16xf32> to vector<18x4xf32>
    %398 = arith.mulf %396, %397 : vector<18x4xf32>
    %399 = arith.addf %395, %398 : vector<18x4xf32>
    %400 = vector.extract_strided_slice %392 {offsets = [0, 12], sizes = [18, 4], strides = [1, 1]} : vector<18x16xf32> to vector<18x4xf32>
    %401 = math.tanh %399 : vector<18x4xf32>
    %402 = arith.mulf %400, %401 : vector<18x4xf32>
    %403 = tpu.concatenate %117, %155, %193, %231, %269, %307, %345, %383 in 1 : vector<2x16xf32>, vector<2x16xf32>, vector<2x16xf32>, vector<2x16xf32>, vector<2x16xf32>, vector<2x16xf32>, vector<2x16xf32>, vector<2x16xf32> -> vector<2x128xf32>
    %404 = tpu.concatenate %136, %174, %212, %250, %288, %326, %364, %402 in 1 : vector<18x4xf32>, vector<18x4xf32>, vector<18x4xf32>, vector<18x4xf32>, vector<18x4xf32>, vector<18x4xf32>, vector<18x4xf32>, vector<18x4xf32> -> vector<18x32xf32>
    %405 = vector.extract_strided_slice %404 {offsets = [0, 0], sizes = [2, 32], strides = [1, 1]} : vector<18x32xf32> to vector<2x32xf32>
    %406 = vector.extract_strided_slice %404 {offsets = [2, 0], sizes = [2, 32], strides = [1, 1]} : vector<18x32xf32> to vector<2x32xf32>
    %407 = vector.extract_strided_slice %404 {offsets = [4, 0], sizes = [2, 32], strides = [1, 1]} : vector<18x32xf32> to vector<2x32xf32>
    %408 = vector.extract_strided_slice %404 {offsets = [6, 0], sizes = [2, 32], strides = [1, 1]} : vector<18x32xf32> to vector<2x32xf32>
    %409 = vector.extract_strided_slice %404 {offsets = [8, 0], sizes = [2, 32], strides = [1, 1]} : vector<18x32xf32> to vector<2x32xf32>
    %410 = vector.extract_strided_slice %404 {offsets = [10, 0], sizes = [2, 32], strides = [1, 1]} : vector<18x32xf32> to vector<2x32xf32>
    %411 = vector.extract_strided_slice %404 {offsets = [12, 0], sizes = [2, 32], strides = [1, 1]} : vector<18x32xf32> to vector<2x32xf32>
    %412 = vector.extract_strided_slice %404 {offsets = [14, 0], sizes = [2, 32], strides = [1, 1]} : vector<18x32xf32> to vector<2x32xf32>
    %413 = vector.extract_strided_slice %404 {offsets = [16, 0], sizes = [2, 32], strides = [1, 1]} : vector<18x32xf32> to vector<2x32xf32>
    %414 = tpu.concatenate %405, %406, %407, %408, %409, %410, %411, %412, %413 in 1 : vector<2x32xf32>, vector<2x32xf32>, vector<2x32xf32>, vector<2x32xf32>, vector<2x32xf32>, vector<2x32xf32>, vector<2x32xf32>, vector<2x32xf32>, vector<2x32xf32> -> vector<2x288xf32>
    %415 = vector.extract_strided_slice %402 {offsets = [0, 0], sizes = [2, 4], strides = [1, 1]} : vector<18x4xf32> to vector<2x4xf32>
    %416 = vector.extract_strided_slice %402 {offsets = [2, 0], sizes = [2, 4], strides = [1, 1]} : vector<18x4xf32> to vector<2x4xf32>
    %417 = vector.extract_strided_slice %402 {offsets = [4, 0], sizes = [2, 4], strides = [1, 1]} : vector<18x4xf32> to vector<2x4xf32>
    %418 = vector.extract_strided_slice %402 {offsets = [6, 0], sizes = [2, 4], strides = [1, 1]} : vector<18x4xf32> to vector<2x4xf32>
    %419 = vector.extract_strided_slice %402 {offsets = [8, 0], sizes = [2, 4], strides = [1, 1]} : vector<18x4xf32> to vector<2x4xf32>
    %420 = vector.extract_strided_slice %402 {offsets = [10, 0], sizes = [2, 4], strides = [1, 1]} : vector<18x4xf32> to vector<2x4xf32>
    %421 = vector.extract_strided_slice %402 {offsets = [12, 0], sizes = [2, 4], strides = [1, 1]} : vector<18x4xf32> to vector<2x4xf32>
    %422 = vector.extract_strided_slice %402 {offsets = [14, 0], sizes = [2, 4], strides = [1, 1]} : vector<18x4xf32> to vector<2x4xf32>
    %423 = vector.extract_strided_slice %402 {offsets = [16, 0], sizes = [2, 4], strides = [1, 1]} : vector<18x4xf32> to vector<2x4xf32>
    %424 = tpu.concatenate %415, %416, %417, %418, %419, %420, %421, %422, %423 in 1 : vector<2x4xf32>, vector<2x4xf32>, vector<2x4xf32>, vector<2x4xf32>, vector<2x4xf32>, vector<2x4xf32>, vector<2x4xf32>, vector<2x4xf32>, vector<2x4xf32> -> vector<2x36xf32>
    %c0_105 = arith.constant 0 : index
    %c0_106 = arith.constant 0 : index
    %425 = vector.load %arg21[%c0_105, %c0_106] : memref<16x128xf32, #tpu.memory_space<vmem>>, vector<16x128xf32>
    %c0_107 = arith.constant 0 : index
    %c0_108 = arith.constant 0 : index
    %426 = vector.load %arg22[%c0_107, %c0_108] : memref<36x576xf32, #tpu.memory_space<vmem>>, vector<36x576xf32>
    %c0_109 = arith.constant 0 : index
    %c0_110 = arith.constant 0 : index
    %427 = vector.load %arg23[%c0_109, %c0_110] : memref<16x144xf32, #tpu.memory_space<vmem>>, vector<16x144xf32>
    %c0_111 = arith.constant 0 : index
    %c0_112 = arith.constant 0 : index
    %428 = vector.load %arg24[%c0_111, %c0_112] : memref<128x8xf32, #tpu.memory_space<vmem>>, vector<128x8xf32>
    %c0_113 = arith.constant 0 : index
    %c0_114 = arith.constant 0 : index
    %429 = vector.load %arg25[%c0_113, %c0_114] : memref<576x16xf32, #tpu.memory_space<vmem>>, vector<576x16xf32>
    %c0_115 = arith.constant 0 : index
    %c0_116 = arith.constant 0 : index
    %430 = vector.load %arg26[%c0_115, %c0_116] : memref<144x9xf32, #tpu.memory_space<vmem>>, vector<144x9xf32>
    %c0_117 = arith.constant 0 : index
    %c0_118 = arith.constant 0 : index
    %431 = vector.load %arg27[%c0_117, %c0_118] : memref<48x6xf32, #tpu.memory_space<vmem>>, vector<48x6xf32>
    %c0_119 = arith.constant 0 : index
    %c0_120 = arith.constant 0 : index
    %432 = vector.load %arg8[%c0_119, %c0_120] : memref<128x48xf32, #tpu.memory_space<vmem>>, vector<128x48xf32>
    %cst_121 = arith.constant dense<0.000000e+00> : vector<2x48xf32>
    %433 = tpu.matmul %403, %432, %cst_121 {dimension_numbers = #tpu.dot_dimension_numbers<[1], [0], [0], [1], [0, 0, 1, 1], [], []>} : vector<2x128xf32>, vector<128x48xf32>, vector<2x48xf32> -> vector<2x48xf32>
    %c0_122 = arith.constant 0 : index
    %c0_123 = arith.constant 0 : index
    %434 = vector.load %arg9[%c0_122, %c0_123] : memref<1x48xf32, #tpu.memory_space<vmem>>, vector<1x48xf32>
    %435 = vector.broadcast %434 : vector<1x48xf32> to vector<2x48xf32>
    %436 = arith.addf %433, %435 : vector<2x48xf32>
    %cst_124 = arith.constant 0.000000e+00 : f32
    %437 = vector.broadcast %cst_124 : f32 to vector<2x48xf32>
    %438 = arith.maximumf %436, %437 : vector<2x48xf32>
    %cst_125 = arith.constant dense<0.000000e+00> : vector<2x128xf32>
    %439 = tpu.matmul %383, %425, %cst_125 {dimension_numbers = #tpu.dot_dimension_numbers<[1], [0], [0], [1], [0, 0, 1, 1], [], []>} : vector<2x16xf32>, vector<16x128xf32>, vector<2x128xf32> -> vector<2x128xf32>
    %c0_126 = arith.constant 0 : index
    %c0_127 = arith.constant 0 : index
    %440 = vector.load %arg10[%c0_126, %c0_127] : memref<2x128xf32, #tpu.memory_space<vmem>>, vector<2x128xf32>
    %441 = arith.mulf %439, %440 : vector<2x128xf32>
    %cst_128 = arith.constant dense<0.000000e+00> : vector<2x8xf32>
    %442 = tpu.matmul %441, %428, %cst_128 {dimension_numbers = #tpu.dot_dimension_numbers<[1], [0], [0], [1], [0, 0, 1, 1], [], []>} : vector<2x128xf32>, vector<128x8xf32>, vector<2x8xf32> -> vector<2x8xf32>
    %443 = tpu.concatenate %442, %442, %442, %442, %442, %442 in 1 : vector<2x8xf32>, vector<2x8xf32>, vector<2x8xf32>, vector<2x8xf32>, vector<2x8xf32>, vector<2x8xf32> -> vector<2x48xf32>
    %444 = arith.mulf %438, %443 : vector<2x48xf32>
    %cst_129 = arith.constant dense<0.000000e+00> : vector<2x6xf32>
    %445 = tpu.matmul %444, %431, %cst_129 {dimension_numbers = #tpu.dot_dimension_numbers<[1], [0], [0], [1], [0, 0, 1, 1], [], []>} : vector<2x48xf32>, vector<48x6xf32>, vector<2x6xf32> -> vector<2x6xf32>
    %cst_130 = arith.constant dense<0xFF800000> : vector<2xf32>
    %446 = vector.multi_reduction <maximumf>, %445, %cst_130 [1] : vector<2x6xf32> to vector<2xf32>
    %447 = vector.shape_cast %446 : vector<2xf32> to vector<2x1xf32>
    %448 = vector.broadcast %447 : vector<2x1xf32> to vector<2x6xf32>
    %449 = arith.subf %445, %448 : vector<2x6xf32>
    %450 = math.exp %449 : vector<2x6xf32>
    %cst_131 = arith.constant dense<0.000000e+00> : vector<2xf32>
    %451 = vector.multi_reduction <add>, %450, %cst_131 [1] : vector<2x6xf32> to vector<2xf32>
    %452 = vector.shape_cast %451 : vector<2xf32> to vector<2x1xf32>
    %453 = vector.broadcast %452 : vector<2x1xf32> to vector<2x6xf32>
    %454 = arith.divf %450, %453 : vector<2x6xf32>
    %455 = vector.extract_strided_slice %425 {offsets = [0, 0], sizes = [6, 48], strides = [1, 1]} : vector<16x128xf32> to vector<6x48xf32>
    %cst_132 = arith.constant dense<0.000000e+00> : vector<2x48xf32>
    %456 = tpu.matmul %454, %455, %cst_132 {dimension_numbers = #tpu.dot_dimension_numbers<[1], [0], [0], [1], [0, 0, 1, 1], [], []>} : vector<2x6xf32>, vector<6x48xf32>, vector<2x48xf32> -> vector<2x48xf32>
    %457 = arith.mulf %456, %438 : vector<2x48xf32>
    %458 = vector.extract_strided_slice %428 {offsets = [0, 0], sizes = [48, 8], strides = [1, 1]} : vector<128x8xf32> to vector<48x8xf32>
    %cst_133 = arith.constant dense<0.000000e+00> : vector<2x8xf32>
    %459 = tpu.matmul %457, %458, %cst_133 {dimension_numbers = #tpu.dot_dimension_numbers<[1], [0], [0], [1], [0, 0, 1, 1], [], []>} : vector<2x48xf32>, vector<48x8xf32>, vector<2x8xf32> -> vector<2x8xf32>
    %460 = vector.extract_strided_slice %426 {offsets = [0, 0], sizes = [16, 256], strides = [1, 1]} : vector<36x576xf32> to vector<16x256xf32>
    %cst_134 = arith.constant dense<0.000000e+00> : vector<2x256xf32>
    %461 = tpu.matmul %383, %460, %cst_134 {dimension_numbers = #tpu.dot_dimension_numbers<[1], [0], [0], [1], [0, 0, 1, 1], [], []>} : vector<2x16xf32>, vector<16x256xf32>, vector<2x256xf32> -> vector<2x256xf32>
    %c0_135 = arith.constant 0 : index
    %c0_136 = arith.constant 0 : index
    %462 = vector.load %arg11[%c0_135, %c0_136] : memref<2x256xf32, #tpu.memory_space<vmem>>, vector<2x256xf32>
    %463 = arith.mulf %461, %462 : vector<2x256xf32>
    %464 = vector.extract_strided_slice %429 {offsets = [0, 0], sizes = [256, 16], strides = [1, 1]} : vector<576x16xf32> to vector<256x16xf32>
    %cst_137 = arith.constant dense<0.000000e+00> : vector<2x16xf32>
    %465 = tpu.matmul %463, %464, %cst_137 {dimension_numbers = #tpu.dot_dimension_numbers<[1], [0], [0], [1], [0, 0, 1, 1], [], []>} : vector<2x256xf32>, vector<256x16xf32>, vector<2x16xf32> -> vector<2x16xf32>
    %466 = vector.extract_strided_slice %426 {offsets = [0, 0], sizes = [8, 128], strides = [1, 1]} : vector<36x576xf32> to vector<8x128xf32>
    %cst_138 = arith.constant dense<0.000000e+00> : vector<2x128xf32>
    %467 = tpu.matmul %459, %466, %cst_138 {dimension_numbers = #tpu.dot_dimension_numbers<[1], [0], [0], [1], [0, 0, 1, 1], [], []>} : vector<2x8xf32>, vector<8x128xf32>, vector<2x128xf32> -> vector<2x128xf32>
    %c0_139 = arith.constant 0 : index
    %c0_140 = arith.constant 0 : index
    %468 = vector.load %arg12[%c0_139, %c0_140] : memref<2x128xf32, #tpu.memory_space<vmem>>, vector<2x128xf32>
    %469 = arith.mulf %467, %468 : vector<2x128xf32>
    %470 = vector.extract_strided_slice %429 {offsets = [0, 0], sizes = [128, 16], strides = [1, 1]} : vector<576x16xf32> to vector<128x16xf32>
    %cst_141 = arith.constant dense<0.000000e+00> : vector<2x16xf32>
    %471 = tpu.matmul %469, %470, %cst_141 {dimension_numbers = #tpu.dot_dimension_numbers<[1], [0], [0], [1], [0, 0, 1, 1], [], []>} : vector<2x128xf32>, vector<128x16xf32>, vector<2x16xf32> -> vector<2x16xf32>
    %472 = arith.addf %465, %471 : vector<2x16xf32>
    %473 = vector.extract_strided_slice %424 {offsets = [0, 0], sizes = [2, 9], strides = [1, 1]} : vector<2x36xf32> to vector<2x9xf32>
    %474 = tpu.concatenate %473, %473, %473, %473 in 1 : vector<2x9xf32>, vector<2x9xf32>, vector<2x9xf32>, vector<2x9xf32> -> vector<2x36xf32>
    %475 = vector.extract_strided_slice %424 {offsets = [0, 9], sizes = [2, 9], strides = [1, 1]} : vector<2x36xf32> to vector<2x9xf32>
    %476 = tpu.concatenate %475, %475, %475, %475 in 1 : vector<2x9xf32>, vector<2x9xf32>, vector<2x9xf32>, vector<2x9xf32> -> vector<2x36xf32>
    %477 = vector.extract_strided_slice %424 {offsets = [0, 18], sizes = [2, 9], strides = [1, 1]} : vector<2x36xf32> to vector<2x9xf32>
    %478 = tpu.concatenate %477, %477, %477, %477 in 1 : vector<2x9xf32>, vector<2x9xf32>, vector<2x9xf32>, vector<2x9xf32> -> vector<2x36xf32>
    %479 = vector.extract_strided_slice %424 {offsets = [0, 27], sizes = [2, 9], strides = [1, 1]} : vector<2x36xf32> to vector<2x9xf32>
    %480 = tpu.concatenate %479, %479, %479, %479 in 1 : vector<2x9xf32>, vector<2x9xf32>, vector<2x9xf32>, vector<2x9xf32> -> vector<2x36xf32>
    %c0_142 = arith.constant 0 : index
    %c0_143 = arith.constant 0 : index
    %c0_144 = arith.constant 0 : index
    %481 = vector.load %arg14[%c0_142, %c0_143, %c0_144] : memref<4x2x36xf32, #tpu.memory_space<vmem>>, vector<1x2x36xf32>
    %482 = vector.shape_cast %481 : vector<1x2x36xf32> to vector<2x36xf32>
    %483 = arith.mulf %482, %474 : vector<2x36xf32>
    %c1_145 = arith.constant 1 : index
    %c0_146 = arith.constant 0 : index
    %c0_147 = arith.constant 0 : index
    %484 = vector.load %arg14[%c1_145, %c0_146, %c0_147] : memref<4x2x36xf32, #tpu.memory_space<vmem>>, vector<1x2x36xf32>
    %485 = vector.shape_cast %484 : vector<1x2x36xf32> to vector<2x36xf32>
    %486 = arith.mulf %485, %476 : vector<2x36xf32>
    %487 = arith.addf %483, %486 : vector<2x36xf32>
    %c2_148 = arith.constant 2 : index
    %c0_149 = arith.constant 0 : index
    %c0_150 = arith.constant 0 : index
    %488 = vector.load %arg14[%c2_148, %c0_149, %c0_150] : memref<4x2x36xf32, #tpu.memory_space<vmem>>, vector<1x2x36xf32>
    %489 = vector.shape_cast %488 : vector<1x2x36xf32> to vector<2x36xf32>
    %490 = arith.mulf %489, %478 : vector<2x36xf32>
    %491 = arith.addf %487, %490 : vector<2x36xf32>
    %c3_151 = arith.constant 3 : index
    %c0_152 = arith.constant 0 : index
    %c0_153 = arith.constant 0 : index
    %492 = vector.load %arg14[%c3_151, %c0_152, %c0_153] : memref<4x2x36xf32, #tpu.memory_space<vmem>>, vector<1x2x36xf32>
    %493 = vector.shape_cast %492 : vector<1x2x36xf32> to vector<2x36xf32>
    %494 = arith.mulf %493, %480 : vector<2x36xf32>
    %495 = arith.addf %491, %494 : vector<2x36xf32>
    %496 = vector.extract_strided_slice %414 {offsets = [0, 0], sizes = [2, 36], strides = [1, 1]} : vector<2x288xf32> to vector<2x36xf32>
    %497 = vector.extract_strided_slice %414 {offsets = [0, 36], sizes = [2, 36], strides = [1, 1]} : vector<2x288xf32> to vector<2x36xf32>
    %498 = vector.extract_strided_slice %414 {offsets = [0, 72], sizes = [2, 36], strides = [1, 1]} : vector<2x288xf32> to vector<2x36xf32>
    %499 = vector.extract_strided_slice %414 {offsets = [0, 108], sizes = [2, 36], strides = [1, 1]} : vector<2x288xf32> to vector<2x36xf32>
    %500 = vector.extract_strided_slice %414 {offsets = [0, 144], sizes = [2, 36], strides = [1, 1]} : vector<2x288xf32> to vector<2x36xf32>
    %501 = vector.extract_strided_slice %414 {offsets = [0, 180], sizes = [2, 36], strides = [1, 1]} : vector<2x288xf32> to vector<2x36xf32>
    %502 = vector.extract_strided_slice %414 {offsets = [0, 216], sizes = [2, 36], strides = [1, 1]} : vector<2x288xf32> to vector<2x36xf32>
    %503 = vector.extract_strided_slice %414 {offsets = [0, 252], sizes = [2, 36], strides = [1, 1]} : vector<2x288xf32> to vector<2x36xf32>
    %504 = arith.mulf %496, %495 : vector<2x36xf32>
    %505 = vector.extract_strided_slice %504 {offsets = [0, 0], sizes = [2, 9], strides = [1, 1]} : vector<2x36xf32> to vector<2x9xf32>
    %506 = vector.extract_strided_slice %504 {offsets = [0, 9], sizes = [2, 9], strides = [1, 1]} : vector<2x36xf32> to vector<2x9xf32>
    %507 = arith.addf %505, %506 : vector<2x9xf32>
    %508 = vector.extract_strided_slice %504 {offsets = [0, 18], sizes = [2, 9], strides = [1, 1]} : vector<2x36xf32> to vector<2x9xf32>
    %509 = arith.addf %507, %508 : vector<2x9xf32>
    %510 = vector.extract_strided_slice %504 {offsets = [0, 27], sizes = [2, 9], strides = [1, 1]} : vector<2x36xf32> to vector<2x9xf32>
    %511 = arith.addf %509, %510 : vector<2x9xf32>
    %512 = arith.mulf %497, %495 : vector<2x36xf32>
    %513 = vector.extract_strided_slice %512 {offsets = [0, 0], sizes = [2, 9], strides = [1, 1]} : vector<2x36xf32> to vector<2x9xf32>
    %514 = vector.extract_strided_slice %512 {offsets = [0, 9], sizes = [2, 9], strides = [1, 1]} : vector<2x36xf32> to vector<2x9xf32>
    %515 = arith.addf %513, %514 : vector<2x9xf32>
    %516 = vector.extract_strided_slice %512 {offsets = [0, 18], sizes = [2, 9], strides = [1, 1]} : vector<2x36xf32> to vector<2x9xf32>
    %517 = arith.addf %515, %516 : vector<2x9xf32>
    %518 = vector.extract_strided_slice %512 {offsets = [0, 27], sizes = [2, 9], strides = [1, 1]} : vector<2x36xf32> to vector<2x9xf32>
    %519 = arith.addf %517, %518 : vector<2x9xf32>
    %520 = arith.mulf %498, %495 : vector<2x36xf32>
    %521 = vector.extract_strided_slice %520 {offsets = [0, 0], sizes = [2, 9], strides = [1, 1]} : vector<2x36xf32> to vector<2x9xf32>
    %522 = vector.extract_strided_slice %520 {offsets = [0, 9], sizes = [2, 9], strides = [1, 1]} : vector<2x36xf32> to vector<2x9xf32>
    %523 = arith.addf %521, %522 : vector<2x9xf32>
    %524 = vector.extract_strided_slice %520 {offsets = [0, 18], sizes = [2, 9], strides = [1, 1]} : vector<2x36xf32> to vector<2x9xf32>
    %525 = arith.addf %523, %524 : vector<2x9xf32>
    %526 = vector.extract_strided_slice %520 {offsets = [0, 27], sizes = [2, 9], strides = [1, 1]} : vector<2x36xf32> to vector<2x9xf32>
    %527 = arith.addf %525, %526 : vector<2x9xf32>
    %528 = arith.mulf %499, %495 : vector<2x36xf32>
    %529 = vector.extract_strided_slice %528 {offsets = [0, 0], sizes = [2, 9], strides = [1, 1]} : vector<2x36xf32> to vector<2x9xf32>
    %530 = vector.extract_strided_slice %528 {offsets = [0, 9], sizes = [2, 9], strides = [1, 1]} : vector<2x36xf32> to vector<2x9xf32>
    %531 = arith.addf %529, %530 : vector<2x9xf32>
    %532 = vector.extract_strided_slice %528 {offsets = [0, 18], sizes = [2, 9], strides = [1, 1]} : vector<2x36xf32> to vector<2x9xf32>
    %533 = arith.addf %531, %532 : vector<2x9xf32>
    %534 = vector.extract_strided_slice %528 {offsets = [0, 27], sizes = [2, 9], strides = [1, 1]} : vector<2x36xf32> to vector<2x9xf32>
    %535 = arith.addf %533, %534 : vector<2x9xf32>
    %536 = arith.mulf %500, %495 : vector<2x36xf32>
    %537 = vector.extract_strided_slice %536 {offsets = [0, 0], sizes = [2, 9], strides = [1, 1]} : vector<2x36xf32> to vector<2x9xf32>
    %538 = vector.extract_strided_slice %536 {offsets = [0, 9], sizes = [2, 9], strides = [1, 1]} : vector<2x36xf32> to vector<2x9xf32>
    %539 = arith.addf %537, %538 : vector<2x9xf32>
    %540 = vector.extract_strided_slice %536 {offsets = [0, 18], sizes = [2, 9], strides = [1, 1]} : vector<2x36xf32> to vector<2x9xf32>
    %541 = arith.addf %539, %540 : vector<2x9xf32>
    %542 = vector.extract_strided_slice %536 {offsets = [0, 27], sizes = [2, 9], strides = [1, 1]} : vector<2x36xf32> to vector<2x9xf32>
    %543 = arith.addf %541, %542 : vector<2x9xf32>
    %544 = arith.mulf %501, %495 : vector<2x36xf32>
    %545 = vector.extract_strided_slice %544 {offsets = [0, 0], sizes = [2, 9], strides = [1, 1]} : vector<2x36xf32> to vector<2x9xf32>
    %546 = vector.extract_strided_slice %544 {offsets = [0, 9], sizes = [2, 9], strides = [1, 1]} : vector<2x36xf32> to vector<2x9xf32>
    %547 = arith.addf %545, %546 : vector<2x9xf32>
    %548 = vector.extract_strided_slice %544 {offsets = [0, 18], sizes = [2, 9], strides = [1, 1]} : vector<2x36xf32> to vector<2x9xf32>
    %549 = arith.addf %547, %548 : vector<2x9xf32>
    %550 = vector.extract_strided_slice %544 {offsets = [0, 27], sizes = [2, 9], strides = [1, 1]} : vector<2x36xf32> to vector<2x9xf32>
    %551 = arith.addf %549, %550 : vector<2x9xf32>
    %552 = arith.mulf %502, %495 : vector<2x36xf32>
    %553 = vector.extract_strided_slice %552 {offsets = [0, 0], sizes = [2, 9], strides = [1, 1]} : vector<2x36xf32> to vector<2x9xf32>
    %554 = vector.extract_strided_slice %552 {offsets = [0, 9], sizes = [2, 9], strides = [1, 1]} : vector<2x36xf32> to vector<2x9xf32>
    %555 = arith.addf %553, %554 : vector<2x9xf32>
    %556 = vector.extract_strided_slice %552 {offsets = [0, 18], sizes = [2, 9], strides = [1, 1]} : vector<2x36xf32> to vector<2x9xf32>
    %557 = arith.addf %555, %556 : vector<2x9xf32>
    %558 = vector.extract_strided_slice %552 {offsets = [0, 27], sizes = [2, 9], strides = [1, 1]} : vector<2x36xf32> to vector<2x9xf32>
    %559 = arith.addf %557, %558 : vector<2x9xf32>
    %560 = arith.mulf %503, %495 : vector<2x36xf32>
    %561 = vector.extract_strided_slice %560 {offsets = [0, 0], sizes = [2, 9], strides = [1, 1]} : vector<2x36xf32> to vector<2x9xf32>
    %562 = vector.extract_strided_slice %560 {offsets = [0, 9], sizes = [2, 9], strides = [1, 1]} : vector<2x36xf32> to vector<2x9xf32>
    %563 = arith.addf %561, %562 : vector<2x9xf32>
    %564 = vector.extract_strided_slice %560 {offsets = [0, 18], sizes = [2, 9], strides = [1, 1]} : vector<2x36xf32> to vector<2x9xf32>
    %565 = arith.addf %563, %564 : vector<2x9xf32>
    %566 = vector.extract_strided_slice %560 {offsets = [0, 27], sizes = [2, 9], strides = [1, 1]} : vector<2x36xf32> to vector<2x9xf32>
    %567 = arith.addf %565, %566 : vector<2x9xf32>
    %568 = arith.maximumf %511, %519 : vector<2x9xf32>
    %569 = arith.maximumf %568, %527 : vector<2x9xf32>
    %570 = arith.maximumf %569, %535 : vector<2x9xf32>
    %571 = arith.maximumf %570, %543 : vector<2x9xf32>
    %572 = arith.maximumf %571, %551 : vector<2x9xf32>
    %573 = arith.maximumf %572, %559 : vector<2x9xf32>
    %574 = arith.maximumf %573, %567 : vector<2x9xf32>
    %575 = arith.subf %511, %574 : vector<2x9xf32>
    %576 = math.exp %575 : vector<2x9xf32>
    %577 = arith.subf %519, %574 : vector<2x9xf32>
    %578 = math.exp %577 : vector<2x9xf32>
    %579 = arith.subf %527, %574 : vector<2x9xf32>
    %580 = math.exp %579 : vector<2x9xf32>
    %581 = arith.subf %535, %574 : vector<2x9xf32>
    %582 = math.exp %581 : vector<2x9xf32>
    %583 = arith.subf %543, %574 : vector<2x9xf32>
    %584 = math.exp %583 : vector<2x9xf32>
    %585 = arith.subf %551, %574 : vector<2x9xf32>
    %586 = math.exp %585 : vector<2x9xf32>
    %587 = arith.subf %559, %574 : vector<2x9xf32>
    %588 = math.exp %587 : vector<2x9xf32>
    %589 = arith.subf %567, %574 : vector<2x9xf32>
    %590 = math.exp %589 : vector<2x9xf32>
    %591 = arith.addf %576, %578 : vector<2x9xf32>
    %592 = arith.addf %591, %580 : vector<2x9xf32>
    %593 = arith.addf %592, %582 : vector<2x9xf32>
    %594 = arith.addf %593, %584 : vector<2x9xf32>
    %595 = arith.addf %594, %586 : vector<2x9xf32>
    %596 = arith.addf %595, %588 : vector<2x9xf32>
    %597 = arith.addf %596, %590 : vector<2x9xf32>
    %cst_154 = arith.constant 1.000000e+00 : f32
    %598 = vector.broadcast %cst_154 : f32 to vector<2x9xf32>
    %599 = arith.divf %598, %597 : vector<2x9xf32>
    %600 = arith.mulf %576, %599 : vector<2x9xf32>
    %601 = arith.mulf %578, %599 : vector<2x9xf32>
    %602 = arith.mulf %580, %599 : vector<2x9xf32>
    %603 = arith.mulf %582, %599 : vector<2x9xf32>
    %604 = arith.mulf %584, %599 : vector<2x9xf32>
    %605 = arith.mulf %586, %599 : vector<2x9xf32>
    %606 = arith.mulf %588, %599 : vector<2x9xf32>
    %607 = arith.mulf %590, %599 : vector<2x9xf32>
    %608 = tpu.concatenate %600, %600, %600, %600 in 1 : vector<2x9xf32>, vector<2x9xf32>, vector<2x9xf32>, vector<2x9xf32> -> vector<2x36xf32>
    %609 = arith.mulf %608, %496 : vector<2x36xf32>
    %610 = tpu.concatenate %601, %601, %601, %601 in 1 : vector<2x9xf32>, vector<2x9xf32>, vector<2x9xf32>, vector<2x9xf32> -> vector<2x36xf32>
    %611 = arith.mulf %610, %497 : vector<2x36xf32>
    %612 = arith.addf %609, %611 : vector<2x36xf32>
    %613 = tpu.concatenate %602, %602, %602, %602 in 1 : vector<2x9xf32>, vector<2x9xf32>, vector<2x9xf32>, vector<2x9xf32> -> vector<2x36xf32>
    %614 = arith.mulf %613, %498 : vector<2x36xf32>
    %615 = arith.addf %612, %614 : vector<2x36xf32>
    %616 = tpu.concatenate %603, %603, %603, %603 in 1 : vector<2x9xf32>, vector<2x9xf32>, vector<2x9xf32>, vector<2x9xf32> -> vector<2x36xf32>
    %617 = arith.mulf %616, %499 : vector<2x36xf32>
    %618 = arith.addf %615, %617 : vector<2x36xf32>
    %619 = tpu.concatenate %604, %604, %604, %604 in 1 : vector<2x9xf32>, vector<2x9xf32>, vector<2x9xf32>, vector<2x9xf32> -> vector<2x36xf32>
    %620 = arith.mulf %619, %500 : vector<2x36xf32>
    %621 = arith.addf %618, %620 : vector<2x36xf32>
    %622 = tpu.concatenate %605, %605, %605, %605 in 1 : vector<2x9xf32>, vector<2x9xf32>, vector<2x9xf32>, vector<2x9xf32> -> vector<2x36xf32>
    %623 = arith.mulf %622, %501 : vector<2x36xf32>
    %624 = arith.addf %621, %623 : vector<2x36xf32>
    %625 = tpu.concatenate %606, %606, %606, %606 in 1 : vector<2x9xf32>, vector<2x9xf32>, vector<2x9xf32>, vector<2x9xf32> -> vector<2x36xf32>
    %626 = arith.mulf %625, %502 : vector<2x36xf32>
    %627 = arith.addf %624, %626 : vector<2x36xf32>
    %628 = tpu.concatenate %607, %607, %607, %607 in 1 : vector<2x9xf32>, vector<2x9xf32>, vector<2x9xf32>, vector<2x9xf32> -> vector<2x36xf32>
    %629 = arith.mulf %628, %503 : vector<2x36xf32>
    %630 = arith.addf %627, %629 : vector<2x36xf32>
    %631 = vector.extract_strided_slice %630 {offsets = [0, 0], sizes = [2, 9], strides = [1, 1]} : vector<2x36xf32> to vector<2x9xf32>
    %632 = tpu.concatenate %631, %631, %631, %631 in 1 : vector<2x9xf32>, vector<2x9xf32>, vector<2x9xf32>, vector<2x9xf32> -> vector<2x36xf32>
    %633 = vector.extract_strided_slice %630 {offsets = [0, 9], sizes = [2, 9], strides = [1, 1]} : vector<2x36xf32> to vector<2x9xf32>
    %634 = tpu.concatenate %633, %633, %633, %633 in 1 : vector<2x9xf32>, vector<2x9xf32>, vector<2x9xf32>, vector<2x9xf32> -> vector<2x36xf32>
    %635 = vector.extract_strided_slice %630 {offsets = [0, 18], sizes = [2, 9], strides = [1, 1]} : vector<2x36xf32> to vector<2x9xf32>
    %636 = tpu.concatenate %635, %635, %635, %635 in 1 : vector<2x9xf32>, vector<2x9xf32>, vector<2x9xf32>, vector<2x9xf32> -> vector<2x36xf32>
    %637 = vector.extract_strided_slice %630 {offsets = [0, 27], sizes = [2, 9], strides = [1, 1]} : vector<2x36xf32> to vector<2x9xf32>
    %638 = tpu.concatenate %637, %637, %637, %637 in 1 : vector<2x9xf32>, vector<2x9xf32>, vector<2x9xf32>, vector<2x9xf32> -> vector<2x36xf32>
    %c0_155 = arith.constant 0 : index
    %c0_156 = arith.constant 0 : index
    %c0_157 = arith.constant 0 : index
    %639 = vector.load %arg15[%c0_155, %c0_156, %c0_157] : memref<4x2x36xf32, #tpu.memory_space<vmem>>, vector<1x2x36xf32>
    %640 = vector.shape_cast %639 : vector<1x2x36xf32> to vector<2x36xf32>
    %641 = arith.mulf %640, %632 : vector<2x36xf32>
    %c0_158 = arith.constant 0 : index
    %c0_159 = arith.constant 0 : index
    %c0_160 = arith.constant 0 : index
    %642 = vector.load %arg16[%c0_158, %c0_159, %c0_160] : memref<4x2x36xf32, #tpu.memory_space<vmem>>, vector<1x2x36xf32>
    %643 = vector.shape_cast %642 : vector<1x2x36xf32> to vector<2x36xf32>
    %644 = arith.mulf %643, %474 : vector<2x36xf32>
    %645 = arith.addf %641, %644 : vector<2x36xf32>
    %c1_161 = arith.constant 1 : index
    %c0_162 = arith.constant 0 : index
    %c0_163 = arith.constant 0 : index
    %646 = vector.load %arg15[%c1_161, %c0_162, %c0_163] : memref<4x2x36xf32, #tpu.memory_space<vmem>>, vector<1x2x36xf32>
    %647 = vector.shape_cast %646 : vector<1x2x36xf32> to vector<2x36xf32>
    %648 = arith.mulf %647, %634 : vector<2x36xf32>
    %649 = arith.addf %645, %648 : vector<2x36xf32>
    %c1_164 = arith.constant 1 : index
    %c0_165 = arith.constant 0 : index
    %c0_166 = arith.constant 0 : index
    %650 = vector.load %arg16[%c1_164, %c0_165, %c0_166] : memref<4x2x36xf32, #tpu.memory_space<vmem>>, vector<1x2x36xf32>
    %651 = vector.shape_cast %650 : vector<1x2x36xf32> to vector<2x36xf32>
    %652 = arith.mulf %651, %476 : vector<2x36xf32>
    %653 = arith.addf %649, %652 : vector<2x36xf32>
    %c2_167 = arith.constant 2 : index
    %c0_168 = arith.constant 0 : index
    %c0_169 = arith.constant 0 : index
    %654 = vector.load %arg15[%c2_167, %c0_168, %c0_169] : memref<4x2x36xf32, #tpu.memory_space<vmem>>, vector<1x2x36xf32>
    %655 = vector.shape_cast %654 : vector<1x2x36xf32> to vector<2x36xf32>
    %656 = arith.mulf %655, %636 : vector<2x36xf32>
    %657 = arith.addf %653, %656 : vector<2x36xf32>
    %c2_170 = arith.constant 2 : index
    %c0_171 = arith.constant 0 : index
    %c0_172 = arith.constant 0 : index
    %658 = vector.load %arg16[%c2_170, %c0_171, %c0_172] : memref<4x2x36xf32, #tpu.memory_space<vmem>>, vector<1x2x36xf32>
    %659 = vector.shape_cast %658 : vector<1x2x36xf32> to vector<2x36xf32>
    %660 = arith.mulf %659, %478 : vector<2x36xf32>
    %661 = arith.addf %657, %660 : vector<2x36xf32>
    %c3_173 = arith.constant 3 : index
    %c0_174 = arith.constant 0 : index
    %c0_175 = arith.constant 0 : index
    %662 = vector.load %arg15[%c3_173, %c0_174, %c0_175] : memref<4x2x36xf32, #tpu.memory_space<vmem>>, vector<1x2x36xf32>
    %663 = vector.shape_cast %662 : vector<1x2x36xf32> to vector<2x36xf32>
    %664 = arith.mulf %663, %638 : vector<2x36xf32>
    %665 = arith.addf %661, %664 : vector<2x36xf32>
    %c3_176 = arith.constant 3 : index
    %c0_177 = arith.constant 0 : index
    %c0_178 = arith.constant 0 : index
    %666 = vector.load %arg16[%c3_176, %c0_177, %c0_178] : memref<4x2x36xf32, #tpu.memory_space<vmem>>, vector<1x2x36xf32>
    %667 = vector.shape_cast %666 : vector<1x2x36xf32> to vector<2x36xf32>
    %668 = arith.mulf %667, %480 : vector<2x36xf32>
    %669 = arith.addf %665, %668 : vector<2x36xf32>
    %cst_179 = arith.constant dense<0.000000e+00> : vector<2x576xf32>
    %670 = tpu.matmul %669, %426, %cst_179 {dimension_numbers = #tpu.dot_dimension_numbers<[1], [0], [0], [1], [0, 0, 1, 1], [], []>} : vector<2x36xf32>, vector<36x576xf32>, vector<2x576xf32> -> vector<2x576xf32>
    %c0_180 = arith.constant 0 : index
    %c0_181 = arith.constant 0 : index
    %671 = vector.load %arg17[%c0_180, %c0_181] : memref<2x576xf32, #tpu.memory_space<vmem>>, vector<2x576xf32>
    %672 = arith.mulf %670, %671 : vector<2x576xf32>
    %cst_182 = arith.constant dense<0.000000e+00> : vector<2x16xf32>
    %673 = tpu.matmul %672, %429, %cst_182 {dimension_numbers = #tpu.dot_dimension_numbers<[1], [0], [0], [1], [0, 0, 1, 1], [], []>} : vector<2x576xf32>, vector<576x16xf32>, vector<2x16xf32> -> vector<2x16xf32>
    %674 = vector.extract_strided_slice %426 {offsets = [0, 0], sizes = [16, 256], strides = [1, 1]} : vector<36x576xf32> to vector<16x256xf32>
    %cst_183 = arith.constant dense<0.000000e+00> : vector<2x256xf32>
    %675 = tpu.matmul %673, %674, %cst_183 {dimension_numbers = #tpu.dot_dimension_numbers<[1], [0], [0], [1], [0, 0, 1, 1], [], []>} : vector<2x16xf32>, vector<16x256xf32>, vector<2x256xf32> -> vector<2x256xf32>
    %c0_184 = arith.constant 0 : index
    %c0_185 = arith.constant 0 : index
    %676 = vector.load %arg18[%c0_184, %c0_185] : memref<2x256xf32, #tpu.memory_space<vmem>>, vector<2x256xf32>
    %677 = arith.mulf %675, %676 : vector<2x256xf32>
    %678 = vector.extract_strided_slice %429 {offsets = [0, 0], sizes = [256, 16], strides = [1, 1]} : vector<576x16xf32> to vector<256x16xf32>
    %cst_186 = arith.constant dense<0.000000e+00> : vector<2x16xf32>
    %679 = tpu.matmul %677, %678, %cst_186 {dimension_numbers = #tpu.dot_dimension_numbers<[1], [0], [0], [1], [0, 0, 1, 1], [], []>} : vector<2x256xf32>, vector<256x16xf32>, vector<2x16xf32> -> vector<2x16xf32>
    %680 = arith.addf %472, %679 : vector<2x16xf32>
    %cst_187 = arith.constant dense<0.000000e+00> : vector<2x144xf32>
    %681 = tpu.matmul %680, %427, %cst_187 {dimension_numbers = #tpu.dot_dimension_numbers<[1], [0], [0], [1], [0, 0, 1, 1], [], []>} : vector<2x16xf32>, vector<16x144xf32>, vector<2x144xf32> -> vector<2x144xf32>
    %c0_188 = arith.constant 0 : index
    %c0_189 = arith.constant 0 : index
    %682 = vector.load %arg13[%c0_188, %c0_189] : memref<2x144xf32, #tpu.memory_space<vmem>>, vector<2x144xf32>
    %683 = arith.mulf %681, %682 : vector<2x144xf32>
    %cst_190 = arith.constant dense<0.000000e+00> : vector<2x9xf32>
    %684 = tpu.matmul %683, %430, %cst_190 {dimension_numbers = #tpu.dot_dimension_numbers<[1], [0], [0], [1], [0, 0, 1, 1], [], []>} : vector<2x144xf32>, vector<144x9xf32>, vector<2x9xf32> -> vector<2x9xf32>
    %c4_191 = arith.constant 4 : index
    %c0_192 = arith.constant 0 : index
    %c0_193 = arith.constant 0 : index
    %685 = vector.load %arg0[%c4_191, %c0_192, %c0_193] : memref<8x2x9xf32, #tpu.memory_space<vmem>>, vector<1x2x9xf32>
    %686 = vector.shape_cast %685 : vector<1x2x9xf32> to vector<2x9xf32>
    %c5_194 = arith.constant 5 : index
    %c0_195 = arith.constant 0 : index
    %c0_196 = arith.constant 0 : index
    %687 = vector.load %arg0[%c5_194, %c0_195, %c0_196] : memref<8x2x9xf32, #tpu.memory_space<vmem>>, vector<1x2x9xf32>
    %688 = vector.shape_cast %687 : vector<1x2x9xf32> to vector<2x9xf32>
    %c6_197 = arith.constant 6 : index
    %c0_198 = arith.constant 0 : index
    %c0_199 = arith.constant 0 : index
    %689 = vector.load %arg0[%c6_197, %c0_198, %c0_199] : memref<8x2x9xf32, #tpu.memory_space<vmem>>, vector<1x2x9xf32>
    %690 = vector.shape_cast %689 : vector<1x2x9xf32> to vector<2x9xf32>
    %c7_200 = arith.constant 7 : index
    %c0_201 = arith.constant 0 : index
    %c0_202 = arith.constant 0 : index
    %691 = vector.load %arg0[%c7_200, %c0_201, %c0_202] : memref<8x2x9xf32, #tpu.memory_space<vmem>>, vector<1x2x9xf32>
    %692 = vector.shape_cast %691 : vector<1x2x9xf32> to vector<2x9xf32>
    %693 = tpu.concatenate %686, %688, %690, %692 in 1 : vector<2x9xf32>, vector<2x9xf32>, vector<2x9xf32>, vector<2x9xf32> -> vector<2x36xf32>
    %c0_203 = arith.constant 0 : index
    %c0_204 = arith.constant 0 : index
    %694 = vector.load %arg19[%c0_203, %c0_204] : memref<1x36xf32, #tpu.memory_space<vmem>>, vector<1x36xf32>
    %695 = vector.broadcast %694 : vector<1x36xf32> to vector<2x36xf32>
    %696 = arith.mulf %693, %695 : vector<2x36xf32>
    %697 = vector.extract_strided_slice %430 {offsets = [0, 0], sizes = [36, 9], strides = [1, 1]} : vector<144x9xf32> to vector<36x9xf32>
    %cst_205 = arith.constant dense<0.000000e+00> : vector<2x9xf32>
    %698 = tpu.matmul %696, %697, %cst_205 {dimension_numbers = #tpu.dot_dimension_numbers<[1], [0], [0], [1], [0, 0, 1, 1], [], []>} : vector<2x36xf32>, vector<36x9xf32>, vector<2x9xf32> -> vector<2x9xf32>
    %c0_206 = arith.constant 0 : index
    %c0_207 = arith.constant 0 : index
    %699 = vector.load %arg20[%c0_206, %c0_207] : memref<1x1xf32, #tpu.memory_space<vmem>>, vector<1x1xf32>
    %700 = vector.broadcast %699 : vector<1x1xf32> to vector<2x9xf32>
    %701 = arith.addf %698, %700 : vector<2x9xf32>
    %702 = arith.addf %684, %701 : vector<2x9xf32>
    %c0_208 = arith.constant 0 : index
    %c0_209 = arith.constant 0 : index
    %703 = vector.load %arg28[%c0_208, %c0_209] : memref<2x9xf32, #tpu.memory_space<vmem>>, vector<2x9xf32>
    tpu.vector_store %arg28[%c0_208, %c0_209], %702 {strides = array<i32>} : memref<2x9xf32, #tpu.memory_space<vmem>>, vector<2x9xf32>,
    return
  }
}

</mosaic_0001>

<bundles_post_ra>
// kernel: tpa_forward.1
= control target key start
LH: loop header
LB: loop body
LE: loop exit
PB: predicated region body
PF: predicated region fallthrough
CT: control target
= control target key end

     0   :  { %s9319_s0 = inlined_call_operand.vmem [shape: f32[8,2,9], index: 0, kind: input, shape index: {}]   ;;  %s9320_s1 = inlined_call_operand.vmem [shape: f32[18,8], index: 1, kind: input, shape index: {}]   ;;  %s9321_s2 = inlined_call_operand.vmem [shape: f32[9,64], index: 2, kind: input, shape index: {}]   ;;  %s9322_s3 = inlined_call_operand.vmem [shape: f32[1,64], index: 3, kind: input, shape index: {}]   ;;  %s9323_s4 = inlined_call_operand.vmem [shape: f32[16,64], index: 4, kind: input, shape index: {}]   ;;  %s9324_s5 = inlined_call_operand.vmem [shape: f32[1,16], index: 5, kind: input, shape index: {}]   ;;  %s9325_s6 = inlined_call_operand.vmem [shape: f32[1,16], index: 6, kind: input, shape index: {}]   ;;  %s9326_s7 = inlined_call_operand.vmem [shape: f32[4,16], index: 7, kind: input, shape index: {}]   ;;  %s9327_s8 = inlined_call_operand.vmem [shape: f32[128,48], index: 8, kind: input, shape index: {}]   ;;  %s9328_s9 = inlined_call_operand.vmem [shape: f32[1,48], index: 9, kind: input, shape index: {}]   ;;  %s9329_s10 = inlined_call_operand.vmem [shape: f32[2,128], index: 10, kind: input, shape index: {}]   ;;  %s9330_s11 = inlined_call_operand.vmem [shape: f32[2,256], index: 11, kind: input, shape index: {}]   ;;  %s9331_s12 = inlined_call_operand.vmem [shape: f32[2,128], index: 12, kind: input, shape index: {}]   ;;  %s9332_s13 = inlined_call_operand.vmem [shape: f32[2,144], index: 13, kind: input, shape index: {}]   ;;  %s9333_s14 = inlined_call_operand.vmem [shape: f32[4,2,36], index: 14, kind: input, shape index: {}]   ;;  %s9334_s15 = inlined_call_operand.vmem [shape: f32[4,2,36], index: 15, kind: input, shape index: {}]   ;;  %s9335_s16 = inlined_call_operand.vmem [shape: f32[4,2,36], index: 16, kind: input, shape index: {}]   ;;  %s9336_s17 = inlined_call_operand.vmem [shape: f32[2,576], index: 17, kind: input, shape index: {}]   ;;  %s9337_s18 = inlined_call_operand.vmem [shape: f32[2,256], index: 18, kind: input, shape index: {}]   ;;  %s9338_s19 = inlined_call_operand.vmem [shape: f32[1,36], index: 19, kind: input, shape index: {}]   ;;  %s9339_s20 = inlined_call_operand.<no memory space> [shape: f32[1,1], index: 20, kind: input, shape index: {}]   ;;  %s9340_s21 = inlined_call_operand.vmem [shape: f32[16,128], index: 21, kind: input, shape index: {}]   ;;  %s9341_s22 = inlined_call_operand.vmem [shape: f32[36,576], index: 22, kind: input, shape index: {}]   ;;  %s9342_s23 = inlined_call_operand.vmem [shape: f32[16,144], index: 23, kind: input, shape index: {}]   ;;  %s9343_s24 = inlined_call_operand.vmem [shape: f32[128,8], index: 24, kind: input, shape index: {}]   ;;  %s9344_s25 = inlined_call_operand.vmem [shape: f32[576,16], index: 25, kind: input, shape index: {}]   ;;  %s9345_s26 = inlined_call_operand.vmem [shape: f32[144,9], index: 26, kind: input, shape index: {}]   ;;  %s9346_s27 = inlined_call_operand.vmem [shape: f32[48,6], index: 27, kind: input, shape index: {}]   ;;  %s9347_s28 = inlined_call_operand.hbm [shape: f32[2,9], index: 28, kind: output, shape index: {}]  }
   0x1   :  { %9391 = sst [smem:[#allocation7_spill]] %s9319_s0  ;;  %v33_v0 = vstv %s9339_s20 }
   0x2   :  { %9392 = sst [smem:[#allocation8_spill]] %s9320_s1  ;;  %34 = vst [vmem:[#allocation2] sm:$0x1] %v33_v0 }
   0x3   :  { %9393 = sst [smem:[#allocation9_spill]] %s9321_s2 }
   0x4   :  { %9394 = sst [smem:[#allocation10_spill]] %s9322_s3 }
   0x5   :  { %9395 = sst [smem:[#allocation11_spill]] %s9323_s4 }
   0x6   :  { %9396 = sst [smem:[#allocation12_spill]] %s9324_s5 }
   0x7   :  { %9397 = sst [smem:[#allocation13_spill]] %s9325_s6 }
   0x8   :  { %9398 = sst [smem:[#allocation14_spill]] %s9326_s7 }
   0x9   :  { %9399 = sst [smem:[#allocation15_spill]] %s9327_s8 }
   0xa   :  { %9400 = sst [smem:[#allocation16_spill]] %s9328_s9 }
   0xb   :  { %9401 = sst [smem:[#allocation17_spill]] %s9329_s10 }
   0xc   :  { %9402 = sst [smem:[#allocation18_spill]] %s9330_s11 }
   0xd   :  { %9403 = sst [smem:[#allocation19_spill]] %s9331_s12 }
   0xe   :  { %s9404_s3 = sld [smem:[#allocation9_spill]]  ;;  %vm111_vm0 = vcmask 1040384   ;;  %v9387_v3 = vmov 0.0|0.0   ;;  %vm7140_vm1 = vmmov 1   ;;  %vm7141_vm3 = vmmov 0   ;;  %s9407_s11 = sld [smem:[#allocation7_spill]] }
   0xf   :  { %6422 = vmatprep.subr.bf16.mxu0 %v9387_v3  ;;  %vm7356_vm2 = vmpackc.low %vm111_vm0, %vm7140_vm1  ;;  %6426 = vmatprep.subr.bf16.mxu1 %v9387_v3  ;;  %v9389_v6 = vmov 0.0   ;;  %vm107_vm4 = vcmask 72704  }
  0x10   :  { %6029 = vmatprep.mubr.msk.f32.mxu0 %vm7141_vm3, %v9389_v6  ;;  %6036 = vmatprep.mubr.msk.f32.mxu1 %vm7141_vm3, %v9389_v6 }
  0x14   :  { %v92_v1 = vld [vmem:[%s9404_s3] sm:$0xff]  ;;  %v93_v2 = vld [vmem:[%s9404_s3 + $0x8] sm:$0x1] }
  0x15   :  { %v6423_v4 = vpack.c.bf16 %v93_v2, %v92_v1  ;;  %v100_v7 = vld [vmem:[%s9407_s11] sm:$0x3] }
  0x17   :  { %6425 = vmatpush3.bf16.msk.msra.mxu0 %vm7356_vm2, %v6423_v4  ;;  %6429 = vmatpush3.bf16.msk.msra.mxu1 %vm7356_vm2, %v6423_v4 }
  0x18   :  { %35 = vsyncpa [#allocation4], 0  ;;  %6430 = vmatprep.subr.bf16.mxu0 %v9387_v3  ;;  %6434 = vmatprep.subr.bf16.mxu1 %v9387_v3  ;;  %v5619_v8 = vld [vmem:[%s9407_s11 + $0x4] sm:$0x3]  ;;  %v5625_v9 = vld [vmem:[%s9407_s11 + $0x8] sm:$0x3] }
  0x19   :  { %s9408_s8 = sld [smem:[#allocation11_spill]]  ;;  %v5631_v12 = vld [vmem:[%s9407_s11 + $0xc] sm:$0x3]  ;;  %s9409_s20 = sld [smem:[#allocation10_spill]]  ;;  %v5616_v18 = vld [vmem:[%s9407_s11 + $0x2] sm:$0x3] }
  0x1a   :  { %6030 = vmatmul.mubr.msk.f32.vlgmr.msra.gmra.mrb[0].mxu0 %vm107_vm4, %v100_v7  ;;  %6037 = vmatmul.mubr.msk.f32.vlgmr.msra.gmra.mrb[0].mxu1 %vm107_vm4, %v5616_v18  ;;  %v5622_v19 = vld [vmem:[%s9407_s11 + $0x6] sm:$0x3]  ;;  %s9410_s4 = sld [smem:[#allocation14_spill]]  ;;  %vm972_vm5 = vcmask 1043456   ;;  %v5628_v21 = vld [vmem:[%s9407_s11 + $0xa] sm:$0x3] }
  0x1b   :  { %6433 = vmatpush3.bf16.msk.msra.mxu0 %vm7356_vm2, %v6423_v4  ;;  %6043 = vmatprep.mubr.msk.f32.mxu0 %vm7141_vm3, %v9389_v6  ;;  %v5634_v23 = vld [vmem:[%s9407_s11 + $0xe] sm:$0x3]  ;;  %s9363_s3 = smov 96   ;;  %s9381_s6 = smov 16   ;;  %v7145_v30 = vmov 0   ;;  %vm872_vm6 = vcmask 130048  }
  0x1c   :  { %6438 = vmatprep.subr.bf16.mxu0 %v9387_v3  ;;  %6437 = vmatpush3.bf16.msk.msra.mxu1 %vm7356_vm2, %v6423_v4  ;;  %s9411_s29 = sld [smem:[#allocation8_spill]]  ;;  %s9359_s2 = smov 32   ;;  %vm969_vm7 = vcmask 31744   ;;  %vm2980_vm8 = vcmask 261120   ;;  %vm2982_vm9 = vcmask 392192   ;;  %vm2984_vm10 = vcmask 523264  }
  0x1d   :  { %6050 = vmatprep.mubr.msk.f32.mxu1 %vm7141_vm3, %v9389_v6  ;;  %6442 = vmatprep.subr.bf16.mxu1 %v9387_v3  ;;  %s9412_s1 = sld [smem:[#allocation12_spill]]  ;;  %s9413_s9 = sld [smem:[#allocation13_spill]]  ;;  %vm2986_vm11 = vcmask 654336   ;;  %vm2988_vm12 = vcmask 785408   ;;  %vm2990_vm13 = vcmask 916480   ;;  %vm3055_vm14 = vcmask 64512  }
  0x1e   :  { %6044 = vmatmul.mubr.msk.f32.vlgmr.msra.gmra.mrb[2].mxu0 %vm107_vm4, %v5619_v8  ;;  %6867 = vset.pattern.permute.xlu0 %v7145_v30  ;;  %s7147_s30 = smov 120   ;;  %s9357_s10 = smov 80   ;;  %vm3070_vm15 = vcmask 195584   ;;  %vm3552_vm0 = vcmask 326656   ;;  %vm3628_vm1 = vcmask 41984  }
  0x1f   :  { %6441 = vmatpush3.bf16.msk.msra.mxu0 %vm7356_vm2, %v6423_v4  ;;  %6057 = vmatprep.mubr.msk.f32.mxu0 %vm7141_vm3, %v9389_v6  ;;  %v95_v10 = vld [vmem:[%s9408_s8] sm:$0xff]  ;;  %v96_v11 = vld [vmem:[%s9408_s8 + $0x8] sm:$0xff]  ;;  %s9361_s5 = smov 4   ;;  %s7150_s0 = smov 8  }
  0x20   :  { %6446 = vmatprep.subr.bf16.mxu0 %v9387_v3  ;;  %v7406_v13 = vpack.c.bf16 %v96_v11, %v95_v10  ;;  %v7420_v14 = vld [vmem:[%s9409_s20] ss:$0 sm:$0xff]  ;;  %6051 = vmatmul.mubr.msk.f32.vlgmr.msra.gmra.mrb[2].mxu1 %vm107_vm4, %v5622_v19  ;;  %s7151_s7 = smov 116   ;;  %s9415_s12 = smov 80  }
  0x21   :  { %v7437_v20 = vld [vmem:[%s9410_s4] sm:$0xf]  ;;  %6445 = vmatpush3.bf16.msk.msra.mxu1 %vm7356_vm2, %v6423_v4  ;;  %6064 = vmatprep.mubr.msk.f32.mxu1 %vm7141_vm3, %v9389_v6  ;;  %s7172_s8 = smov 101  }
  0x22   :  { %6058 = vmatmul.mubr.msk.f32.vlgmr.msra.gmra.mrb[4].mxu0 %vm107_vm4, %v5625_v9  ;;  %6450 = vmatprep.subr.bf16.mxu1 %v9387_v3  ;;  %v7484_v31 = vld [vmem:[%s9411_s29] sm:$0xff]  ;;  %v7509_v47 = vld [vmem:[%s9411_s29 + $0x8] sm:$0xff]  ;;  %v7515_v48 = vld [vmem:[%s9411_s29 + $0x10] sm:$0x3] }
  0x23   :  { %6449 = vmatpush3.bf16.msk.msra.mxu0 %vm7356_vm2, %v6423_v4  ;;  %6071 = vmatprep.mubr.msk.f32.mxu0 %vm7141_vm3, %v9389_v6  ;;  %v7495_v38 = vld [vmem:[%s9412_s1] ss:$0 sm:$0xff] }
  0x24   :  { %6454 = vmatprep.subr.bf16.mxu0 %v9387_v3  ;;  %6065 = vmatmul.mubr.msk.f32.vlgmr.msra.gmra.mrb[4].mxu1 %vm107_vm4, %v5628_v21  ;;  %v7500_v40 = vld [vmem:[%s9413_s9] ss:$0 sm:$0xff] }
  0x25   :  { %6453 = vmatpush3.bf16.msk.msra.mxu1 %vm7356_vm2, %v6423_v4  ;;  %6078 = vmatprep.mubr.msk.f32.mxu1 %vm7141_vm3, %v9389_v6  ;;  %vm3644_vm2 = vcmask 1045504  }
  0x26   :  { %6072 = vmatmul.mubr.msk.f32.vlgmr.msra.gmra.mrb[6].mxu0 %vm107_vm4, %v5631_v12  ;;  %6088 = vmatprep.subr.mxu1 %v9389_v6 }
  0x27   :  { %6456 = vmatpush3.bf16.msra.mxu0 %v7406_v13  ;;  %6085 = vmatprep.mubr.msk.f32.mxu0 %vm7141_vm3, %v9389_v6 }
  0x28   :  { %6106 = vmatprep.subr.mxu0 %v9389_v6  ;;  %6079 = vmatmul.mubr.msk.f32.vlgmr.msra.gmra.mrb[6].mxu1 %vm107_vm4, %v5634_v23 }
  0x29   :  { %6089 = vmatpush3.msk.msra.mxu1 %vm972_vm5, %v7437_v20  ;;  %6090 = vmatprep.mubr.msk.f32.mxu1 %vm7141_vm3, %v9389_v6 }
  0x2a   :  { %6086 = vmatmul.mubr.f32.vlgmr.msra.gmra.mrb[0].mxu0 %v9389_v6  ;;  %6457 = vmatprep.subr.bf16.mxu1 %v9387_v3 }
  0x2b   :  { %6108 = vmatprep.mubr.msk.f32.mxu0 %vm7141_vm3, %v9389_v6  ;;  %6107 = vmatpush3.msk.msra.mxu0 %vm972_vm5, %v7437_v20 }
  0x2c   :  { %6460 = vmatprep.subr.bf16.mxu0 %v9387_v3  ;;  %6091 = vmatmul.mubr.f32.vlgmr.msra.gmra.mrb[8].mxu1 %v9389_v6 }
  0x2d   :  { %6093 = vmatprep.mubr.msk.f32.mxu1 %vm7141_vm3, %v9389_v6  ;;  %6459 = vmatpush3.bf16.msra.mxu1 %v7406_v13 }
  0x2e   :  { %6124 = vmatprep.subr.mxu1 %v9389_v6  ;;  %6868 = vset.pattern.permute.xlu1 %v7145_v30 }
  0x30   :  { %6094 = vmatmul.mubr.f32.gmra.mrb[10].mxu1 %v9389_v6 }
  0x31   :  { %6096 = vmatprep.mubr.msk.f32.mxu1 %vm7141_vm3, %v9389_v6 }
  0x34   :  { %6097 = vmatmul.mubr.f32.gmra.mrb[12].mxu1 %v9389_v6 }
  0x35   :  { %6103 = vmatprep.mubr.msk.f32.mxu1 %vm7141_vm3, %v9389_v6 }
  0xfd   :  { %v942_v15 = vpop.f32.mrb[0].mxu0 }
  0xfe   :  { %v6778_v16 = vadd.f32 %v7420_v14, %v942_v15  ;;  %v6087_v17 = vpop.f32.mrb[1].mxu0 }
  0xff   :  { %v1042_v35 = vpop.f32.mrb[8].mxu1 }
 0x100   :  { %6886 = vtanh.f32 %v6778_v16  ;;  %v947_v24 = vmul.f32 0.5, %v6778_v16  ;;  %v6092_v36 = vpop.f32.mrb[9].mxu1 }
 0x102   :  { %6888 = vtanh.f32 %v947_v24 }
 0x103   :  { %v1047_v49 = vpop.f32.mrb[10].mxu1 }
 0x104   :  { %v6095_v50 = vpop.f32.mrb[11].mxu1 }
 0x107   :  { %v1052_v51 = vpop.f32.mrb[12].mxu1 }
 0x108   :  { %v6098_v52 = vpop.f32.mrb[13].mxu1 }
 0x10a   :  { %v6887_v22 = vpop.eup %6886 }
 0x10b   :  { %954 = vrot.lane.b32.xlu0 %v6887_v22, %s9363_s3 }
 0x10c   :  { %v6889_v25 = vpop.eup %6888 }
 0x10d   :  { %v949_v26 = vmul.f32 0.5, %v6889_v25 }
 0x10f   :  { %v950_v27 = vadd.f32 0.5, %v949_v26 }
 0x111   :  { %v952_v32 = vmul.f32 0.0, %v950_v27 }
 0x17d   :  { %v955_v28 = vpop.permute.xlu0 %954 }
 0x17e   :  { %v957_v29 = vmul.f32 %v955_v28, %v950_v27 }
 0x180   :  { %959 = vrot.lane.b32.xlu0 %v957_v29, %s9381_s6 }
 0x184   :  { %715 = vperm.xlu0 %6867, %v7484_v31  }
 0x1f2   :  { %v960_v33 = vpop.permute.xlu0 %959 }
 0x1f3   :  { %v7488_v34 = vadd.f32 %v960_v33, %v952_v32 }
 0x1f5   :  { %6890 = vtanh.f32 %v7488_v34 }
 0x1ff   :  { %v6891_v37 = vpop.eup %6890 }
 0x200   :  { %965 = vrot.lane.b32.xlu1 %v6891_v37, %s9359_s2 }
 0x203   :  { %v716_v39 = vpop.permute.xlu0 %715 }
 0x204   :  { %v734_v41 = vmul.f32 %v7495_v38, %v716_v39 }
 0x206   :  { %v743_v42 = vadd.f32 %v7500_v40, %v734_v41 }
 0x208   :  { %v1056_v43 = vadd.f32 %v1042_v35, %v743_v42 }
 0x20a   :  { %6892 = vtanh.f32 %v1056_v43  ;;  %v1059_v54 = vmul.f32 0.5, %v1056_v43 }
 0x20c   :  { %6894 = vtanh.f32 %v1059_v54  ;;  %v7152_v54 = vmov 1  }
 0x20d   :  { %6869 = vset.pattern.permute.xlu0 %v7152_v54 }
 0x214   :  { %v6893_v44 = vpop.eup %6892 }
 0x215   :  { %1080 = vrot.lane.b32.xlu0 %v6893_v44, %s7147_s30 }
 0x216   :  { %v6895_v63 = vpop.eup %6894 }
 0x217   :  { %v1065_v0 = vmul.f32 0.5, %v6895_v63 }
 0x219   :  { %v1068_v2 = vadd.f32 0.5, %v1065_v0 }
 0x21b   :  { %v1074_v16 = vmul.f32 0.0, %v1068_v2 }
 0x272   :  { %v966_v45 = vpop.permute.xlu1 %965 }
 0x273   :  { %v968_v46 = vmul.f32 %v966_v45, %v950_v27 }
 0x275   :  { %1126 = vrot.lane.b32.xlu1 %v968_v46, %s9357_s10 }
 0x279   :  { %720 = vperm.xlu1 %6868, %v7509_v47  }
 0x27d   :  { %725 = vperm.xlu1 %6868, %v7515_v48  }
 0x281   :  { %6870 = vset.pattern.permute.xlu1 %v7152_v54 }
 0x287   :  { %v1081_v4 = vpop.permute.xlu0 %1080 }
 0x288   :  { %v1089_v7 = vmul.f32 %v1081_v4, %v1068_v2 }
 0x2e7   :  { %v7518_v53 = vpop.permute.xlu1 %1126 }
 0x2e8   :  { %6104 = vmatmul.mubr.msk.f32.vlgmr.msra.gmra.mrb[0].mxu1 %vm872_vm6, %v7518_v53 }
 0x2e9   :  { %6125 = vmatpush3.msk.msra.mxu1 %vm972_vm5, %v7437_v20  ;;  %6126 = vmatprep.mubr.msk.f32.mxu1 %vm7141_vm3, %v9389_v6 }
 0x2ea   :  { %6463 = vmatprep.subr.bf16.mxu1 %v9387_v3 }
 0x2f8   :  { %v721_v55 = vpop.permute.xlu1 %720 }
 0x2f9   :  { %v735_v56 = vmul.f32 %v7495_v38, %v721_v55 }
 0x2fb   :  { %v744_v57 = vadd.f32 %v7500_v40, %v735_v56 }
 0x2fc   :  { %v726_v58 = vpop.permute.xlu1 %725 }
 0x2fd   :  { %v736_v59 = vmul.f32 %v7495_v38, %v726_v58  ;;  %v1057_v60 = vadd.f32 %v1047_v49, %v744_v57 }
 0x2ff   :  { %6896 = vtanh.f32 %v1057_v60  ;;  %v745_v61 = vadd.f32 %v7500_v40, %v736_v59  ;;  %v1060_v21 = vmul.f32 0.5, %v1057_v60 }
 0x301   :  { %v1058_v62 = vadd.f32 %v1052_v51, %v745_v61 }
 0x303   :  { %6898 = vtanh.f32 %v1058_v62  ;;  %v1061_v8 = vmul.f32 0.5, %v1058_v62 }
 0x305   :  { %6900 = vtanh.f32 %v1061_v8 }
 0x309   :  { %v6897_v1 = vpop.eup %6896 }
 0x30a   :  { %1082 = vrot.lane.b32.xlu1 %v6897_v1, %s7147_s30 }
 0x30d   :  { %v6899_v5 = vpop.eup %6898 }
 0x30e   :  { %1084 = vrot.lane.b32.xlu0 %v6899_v5, %s7147_s30 }
 0x30f   :  { %v6901_v9 = vpop.eup %6900 }
 0x310   :  { %v1067_v10 = vmul.f32 0.5, %v6901_v9 }
 0x312   :  { %1095 = vrot.lane.b32.xlu0 %v1089_v7, %s9361_s5  ;;  %v1070_v11 = vadd.f32 0.5, %v1067_v10 }
 0x314   :  { %v1076_v33 = vmul.f32 0.0, %v1070_v11 }
 0x37c   :  { %v1083_v29 = vpop.permute.xlu1 %1082 }
 0x380   :  { %v1085_v12 = vpop.permute.xlu0 %1084 }
 0x381   :  { %v1091_v15 = vmul.f32 %v1085_v12, %v1070_v11 }
 0x383   :  { %1099 = vrot.lane.b32.xlu0 %v1091_v15, %s9361_s5 }
 0x384   :  { %v1096_v17 = vpop.permute.xlu0 %1095 }
 0x385   :  { %v7535_v18 = vadd.f32 %v1096_v17, %v1074_v16 }
 0x387   :  { %6902 = vtanh.f32 %v7535_v18 }
 0x388   :  { %6904 = vtanh.f32 %v1060_v21 }
 0x391   :  { %v6903_v19 = vpop.eup %6902 }
 0x392   :  { %1113 = vrot.lane.b32.xlu0 %v6903_v19, %s7150_s0  ;;  %v6905_v25 = vpop.eup %6904 }
 0x393   :  { %v1066_v26 = vmul.f32 0.5, %v6905_v25 }
 0x395   :  { %v1069_v27 = vadd.f32 0.5, %v1066_v26 }
 0x397   :  { %v1090_v32 = vmul.f32 %v1083_v29, %v1069_v27  ;;  %v1075_v50 = vmul.f32 0.0, %v1069_v27 }
 0x3bb   :  { %v1196_v22 = vpop.f32.mrb[0].mxu1 }
 0x3bc   :  { %v6779_v23 = vadd.f32 %v7420_v14, %v1196_v22  ;;  %v6105_v24 = vpop.f32.mrb[1].mxu1 }
 0x3be   :  { %6906 = vtanh.f32 %v6779_v23  ;;  %v1201_v42 = vmul.f32 0.5, %v6779_v23 }
 0x3c8   :  { %v6907_v28 = vpop.eup %6906 }
 0x3c9   :  { %1208 = vrot.lane.b32.xlu1 %v6907_v28, %s9363_s3 }
 0x3cd   :  { %1097 = vrot.lane.b32.xlu1 %v1090_v32, %s9361_s5 }
 0x3f5   :  { %v1100_v35 = vpop.permute.xlu0 %1099 }
 0x3f6   :  { %v7542_v36 = vadd.f32 %v1100_v35, %v1076_v33 }
 0x3f8   :  { %6908 = vtanh.f32 %v7542_v36 }
 0x3f9   :  { %6910 = vtanh.f32 %v1201_v42 }
 0x402   :  { %v6909_v37 = vpop.eup %6908 }
 0x403   :  { %1117 = vrot.lane.b32.xlu0 %v6909_v37, %s7150_s0  ;;  %v6911_v43 = vpop.eup %6910 }
 0x404   :  { %v1114_v39 = vpop.permute.xlu0 %1113  ;;  %v1203_v44 = vmul.f32 0.5, %v6911_v43 }
 0x405   :  { %v1122_v41 = vmul.f32 %v1114_v39, %v1068_v2 }
 0x406   :  { %v1204_v45 = vadd.f32 0.5, %v1203_v44 }
 0x407   :  { %1226 = vrot.lane.b32.xlu0 %v1122_v41, %s7151_s7 }
 0x408   :  { %v1206_v59 = vmul.f32 %v1204_v45, %v7488_v34 }
 0x43b   :  { %v1209_v46 = vpop.permute.xlu1 %1208 }
 0x43c   :  { %v1211_v49 = vmul.f32 %v1209_v46, %v1204_v45 }
 0x43e   :  { %1213 = vrot.lane.b32.xlu1 %v1211_v49, %s9381_s6 }
 0x43f   :  { %v1098_v51 = vpop.permute.xlu1 %1097 }
 0x440   :  { %v7548_v52 = vadd.f32 %v1098_v51, %v1075_v50 }
 0x442   :  { %6912 = vtanh.f32 %v7548_v52 }
 0x44c   :  { %v6913_v55 = vpop.eup %6912 }
 0x44d   :  { %1115 = vrot.lane.b32.xlu1 %v6913_v55, %s7150_s0 }
 0x475   :  { %v1118_v56 = vpop.permute.xlu0 %1117 }
 0x476   :  { %v1124_v57 = vmul.f32 %v1118_v56, %v1070_v11 }
 0x478   :  { %1230 = vrot.lane.b32.xlu0 %v1124_v57, %s7151_s7 }
 0x479   :  { %v7553_v58 = vpop.permute.xlu0 %1226 }
 0x47a   :  { %6109 = vmatmul.mubr.msk.f32.vlgmr.msra.gmra.mrb[8].mxu0 %vm969_vm7, %v7553_v58 }
 0x47b   :  { %6111 = vmatprep.mubr.msk.f32.mxu0 %vm7141_vm3, %v9389_v6  ;;  %6462 = vmatpush3.bf16.msra.mxu0 %v7406_v13 }
 0x47c   :  { %747 = vperm.xlu0 %6869, %v7484_v31   ;;  %6142 = vmatprep.subr.mxu0 %v9389_v6 }
 0x4b0   :  { %v1214_v60 = vpop.permute.xlu1 %1213 }
 0x4b1   :  { %v7563_v61 = vadd.f32 %v1214_v60, %v1206_v59 }
 0x4b3   :  { %6914 = vtanh.f32 %v7563_v61 }
 0x4bd   :  { %v6915_v62 = vpop.eup %6914 }
 0x4be   :  { %1219 = vrot.lane.b32.xlu1 %v6915_v62, %s9359_s2 }
 0x4bf   :  { %v1116_v63 = vpop.permute.xlu1 %1115 }
 0x4c0   :  { %v1123_v0 = vmul.f32 %v1116_v63, %v1069_v27 }
 0x4c2   :  { %1228 = vrot.lane.b32.xlu1 %v1123_v0, %s7151_s7 }
 0x4ea   :  { %v7579_v34 = vpop.permute.xlu0 %1230 }
 0x4fb   :  { %v748_v5 = vpop.permute.xlu0 %747 }
 0x4fc   :  { %v758_v7 = vmul.f32 %v7495_v38, %v748_v5 }
 0x4fe   :  { %v761_v8 = vadd.f32 %v7500_v40, %v758_v7 }
 0x530   :  { %v1220_v1 = vpop.permute.xlu1 %1219 }
 0x531   :  { %v7568_v2 = vmul.f32 %v1220_v1, %v1204_v45 }
 0x533   :  { %1388 = vrot.lane.b32.xlu1 %v7568_v2, %s9357_s10 }
 0x534   :  { %v7572_v4 = vpop.permute.xlu1 %1228 }
 0x535   :  { %6112 = vmatmul.mubr.msk.f32.gmra.mrb[10].mxu0 %vm969_vm7, %v7572_v4 }
 0x536   :  { %6114 = vmatprep.mubr.msk.f32.mxu0 %vm7141_vm3, %v9389_v6 }
 0x537   :  { %751 = vperm.xlu1 %6870, %v7509_v47  }
 0x539   :  { %6115 = vmatmul.mubr.msk.f32.gmra.mrb[12].mxu0 %vm969_vm7, %v7579_v34 }
 0x53a   :  { %6121 = vmatprep.mubr.msk.f32.mxu0 %vm7141_vm3, %v9389_v6 }
 0x53b   :  { %755 = vperm.xlu1 %6870, %v7515_v48  }
 0x54d   :  { %v1304_v9 = vpop.f32.mrb[8].mxu0 }
 0x54e   :  { %v1318_v10 = vadd.f32 %v1304_v9, %v761_v8  ;;  %v6110_v11 = vpop.f32.mrb[9].mxu0 }
 0x550   :  { %6916 = vtanh.f32 %v1318_v10  ;;  %v1321_v21 = vmul.f32 0.5, %v1318_v10 }
 0x552   :  { %6918 = vtanh.f32 %v1321_v21 }
 0x55a   :  { %v6917_v12 = vpop.eup %6916 }
 0x55b   :  { %1342 = vrot.lane.b32.xlu0 %v6917_v12, %s7147_s30 }
 0x55c   :  { %v6919_v33 = vpop.eup %6918 }
 0x55d   :  { %v1327_v37 = vmul.f32 0.5, %v6919_v33 }
 0x55f   :  { %v1330_v42 = vadd.f32 0.5, %v1327_v37 }
 0x561   :  { %v1336_v5 = vmul.f32 %v1330_v42, %v7535_v18 }
 0x5a5   :  { %v1389_v15 = vpop.permute.xlu1 %1388 }
 0x5a6   :  { %6122 = vmatmul.mubr.msk.f32.vlgmr.msra.gmra.mrb[2].mxu0 %vm872_vm6, %v1389_v15 }
 0x5a7   :  { %6143 = vmatpush3.msk.msra.mxu0 %vm972_vm5, %v7437_v20  ;;  %6144 = vmatprep.mubr.msk.f32.mxu0 %vm7141_vm3, %v9389_v6 }
 0x5a8   :  { %6466 = vmatprep.subr.bf16.mxu0 %v9387_v3 }
 0x5b6   :  { %v752_v16 = vpop.permute.xlu1 %751 }
 0x5b7   :  { %v759_v17 = vmul.f32 %v7495_v38, %v752_v16 }
 0x5b9   :  { %v762_v23 = vadd.f32 %v7500_v40, %v759_v17 }
 0x5ba   :  { %v756_v19 = vpop.permute.xlu1 %755 }
 0x5bb   :  { %v760_v22 = vmul.f32 %v7495_v38, %v756_v19 }
 0x5bd   :  { %v763_v27 = vadd.f32 %v7500_v40, %v760_v22 }
 0x5cd   :  { %v1343_v41 = vpop.permute.xlu0 %1342 }
 0x5ce   :  { %v1351_v43 = vmul.f32 %v1343_v41, %v1330_v42 }
 0x608   :  { %v1309_v24 = vpop.f32.mrb[10].mxu0 }
 0x609   :  { %v1319_v25 = vadd.f32 %v1309_v24, %v762_v23  ;;  %v6113_v26 = vpop.f32.mrb[11].mxu0 }
 0x60b   :  { %6920 = vtanh.f32 %v1319_v25  ;;  %v1322_v44 = vmul.f32 0.5, %v1319_v25  ;;  %v7153_v25 = vmov 2  }
 0x60c   :  { %v1314_v28 = vpop.f32.mrb[12].mxu0  ;;  %6871 = vset.pattern.permute.xlu0 %v7153_v25  ;;  %6872 = vset.pattern.permute.xlu1 %v7153_v25 }
 0x60d   :  { %v1320_v29 = vadd.f32 %v1314_v28, %v763_v27  ;;  %v6116_v32 = vpop.f32.mrb[13].mxu0 }
 0x60f   :  { %6922 = vtanh.f32 %v1320_v29  ;;  %v1323_v45 = vmul.f32 0.5, %v1320_v29 }
 0x610   :  { %6924 = vtanh.f32 %v1322_v44 }
 0x611   :  { %6926 = vtanh.f32 %v1323_v45 }
 0x615   :  { %v6921_v35 = vpop.eup %6920 }
 0x616   :  { %1344 = vrot.lane.b32.xlu1 %v6921_v35, %s7147_s30 }
 0x619   :  { %v6923_v39 = vpop.eup %6922 }
 0x61a   :  { %1346 = vrot.lane.b32.xlu0 %v6923_v39, %s7147_s30  ;;  %v6925_v51 = vpop.eup %6924 }
 0x61b   :  { %v1328_v54 = vmul.f32 0.5, %v6925_v51  ;;  %v6927_v55 = vpop.eup %6926 }
 0x61c   :  { %v1329_v57 = vmul.f32 0.5, %v6927_v55 }
 0x61d   :  { %v1331_v59 = vadd.f32 0.5, %v1328_v54 }
 0x61e   :  { %1357 = vrot.lane.b32.xlu0 %v1351_v43, %s9361_s5  ;;  %v1332_v63 = vadd.f32 0.5, %v1329_v57 }
 0x61f   :  { %v1337_v19 = vmul.f32 %v1331_v59, %v7548_v52 }
 0x620   :  { %v1338_v22 = vmul.f32 %v1332_v63, %v7542_v36 }
 0x679   :  { %v1458_v46 = vpop.f32.mrb[2].mxu0 }
 0x67a   :  { %v6780_v49 = vadd.f32 %v7420_v14, %v1458_v46  ;;  %v6123_v50 = vpop.f32.mrb[3].mxu0 }
 0x67c   :  { %6928 = vtanh.f32 %v6780_v49  ;;  %v1463_v10 = vmul.f32 0.5, %v6780_v49 }
 0x686   :  { %v6929_v56 = vpop.eup %6928 }
 0x687   :  { %1470 = vrot.lane.b32.xlu1 %v6929_v56, %s9363_s3 }
 0x688   :  { %v1345_v60 = vpop.permute.xlu1 %1344 }
 0x689   :  { %v1352_v62 = vmul.f32 %v1345_v60, %v1331_v59 }
 0x68b   :  { %1359 = vrot.lane.b32.xlu1 %v1352_v62, %s9361_s5 }
 0x68c   :  { %v1347_v0 = vpop.permute.xlu0 %1346 }
 0x68d   :  { %v1353_v1 = vmul.f32 %v1347_v0, %v1332_v63 }
 0x68f   :  { %1361 = vrot.lane.b32.xlu0 %v1353_v1, %s9361_s5 }
 0x690   :  { %v1358_v7 = vpop.permute.xlu0 %1357 }
 0x691   :  { %v7607_v8 = vadd.f32 %v1358_v7, %v1336_v5 }
 0x693   :  { %6930 = vtanh.f32 %v7607_v8 }
 0x694   :  { %6932 = vtanh.f32 %v1463_v10 }
 0x69d   :  { %v6931_v9 = vpop.eup %6930 }
 0x69e   :  { %1375 = vrot.lane.b32.xlu0 %v6931_v9, %s7150_s0  ;;  %v6933_v11 = vpop.eup %6932 }
 0x69f   :  { %v1465_v12 = vmul.f32 0.5, %v6933_v11 }
 0x6a1   :  { %v1466_v15 = vadd.f32 0.5, %v1465_v12 }
 0x6a3   :  { %v1468_v36 = vmul.f32 %v1466_v15, %v7563_v61 }
 0x6f9   :  { %v1471_v16 = vpop.permute.xlu1 %1470 }
 0x6fa   :  { %v1473_v17 = vmul.f32 %v1471_v16, %v1466_v15 }
 0x6fc   :  { %1475 = vrot.lane.b32.xlu1 %v1473_v17, %s9381_s6 }
 0x6fd   :  { %v1360_v18 = vpop.permute.xlu1 %1359 }
 0x6fe   :  { %v7613_v21 = vadd.f32 %v1360_v18, %v1337_v19 }
 0x700   :  { %6934 = vtanh.f32 %v7613_v21 }
 0x701   :  { %v1362_v23 = vpop.permute.xlu0 %1361 }
 0x702   :  { %v7617_v24 = vadd.f32 %v1362_v23, %v1338_v22 }
 0x704   :  { %6936 = vtanh.f32 %v7617_v24 }
 0x70a   :  { %v6935_v26 = vpop.eup %6934 }
 0x70b   :  { %1377 = vrot.lane.b32.xlu1 %v6935_v26, %s7150_s0 }
 0x70e   :  { %v6937_v27 = vpop.eup %6936 }
 0x70f   :  { %1379 = vrot.lane.b32.xlu0 %v6937_v27, %s7150_s0 }
 0x710   :  { %v1376_v52 = vpop.permute.xlu0 %1375 }
 0x711   :  { %v7622_v28 = vmul.f32 %v1376_v52, %v1330_v42 }
 0x713   :  { %1488 = vrot.lane.b32.xlu0 %v7622_v28, %s7151_s7 }
 0x76e   :  { %v1476_v29 = vpop.permute.xlu1 %1475 }
 0x76f   :  { %v7627_v32 = vadd.f32 %v1476_v29, %v1468_v36 }
 0x771   :  { %6938 = vtanh.f32 %v7627_v32 }
 0x77b   :  { %v6939_v33 = vpop.eup %6938 }
 0x77c   :  { %1481 = vrot.lane.b32.xlu1 %v6939_v33, %s9359_s2 }
 0x77d   :  { %v1378_v35 = vpop.permute.xlu1 %1377 }
 0x77e   :  { %v7631_v37 = vmul.f32 %v1378_v35, %v1331_v59 }
 0x780   :  { %1490 = vrot.lane.b32.xlu1 %v7631_v37, %s7151_s7 }
 0x781   :  { %v1380_v39 = vpop.permute.xlu0 %1379 }
 0x782   :  { %v7635_v41 = vmul.f32 %v1380_v39, %v1332_v63 }
 0x784   :  { %1492 = vrot.lane.b32.xlu0 %v7635_v41, %s7151_s7 }
 0x785   :  { %v1489_v61 = vpop.permute.xlu0 %1488 }
 0x786   :  { %6127 = vmatmul.mubr.msk.f32.vlgmr.msra.gmra.mrb[14].mxu1 %vm969_vm7, %v1489_v61 }
 0x787   :  { %6129 = vmatprep.mubr.msk.f32.mxu1 %vm7141_vm3, %v9389_v6  ;;  %6465 = vmatpush3.bf16.msra.mxu1 %v7406_v13 }
 0x788   :  { %765 = vperm.xlu0 %6871, %v7484_v31   ;;  %6160 = vmatprep.subr.mxu1 %v9389_v6 }
 0x7ee   :  { %v1482_v42 = vpop.permute.xlu1 %1481 }
 0x7ef   :  { %v7645_v43 = vmul.f32 %v1482_v42, %v1466_v15 }
 0x7f1   :  { %1650 = vrot.lane.b32.xlu1 %v7645_v43, %s9357_s10 }
 0x7f2   :  { %v1491_v44 = vpop.permute.xlu1 %1490 }
 0x7f3   :  { %6130 = vmatmul.mubr.msk.f32.gmra.mrb[16].mxu1 %vm969_vm7, %v1491_v44 }
 0x7f4   :  { %6132 = vmatprep.mubr.msk.f32.mxu1 %vm7141_vm3, %v9389_v6 }
 0x7f5   :  { %769 = vperm.xlu1 %6872, %v7509_v47  }
 0x7f6   :  { %v1493_v45 = vpop.permute.xlu0 %1492 }
 0x7f7   :  { %6133 = vmatmul.mubr.msk.f32.gmra.mrb[18].mxu1 %vm969_vm7, %v1493_v45 }
 0x7f8   :  { %6139 = vmatprep.mubr.msk.f32.mxu1 %vm7141_vm3, %v9389_v6 }
 0x7f9   :  { %773 = vperm.xlu1 %6872, %v7515_v48  }
 0x807   :  { %v766_v46 = vpop.permute.xlu0 %765 }
 0x808   :  { %v776_v49 = vmul.f32 %v7495_v38, %v766_v46 }
 0x80a   :  { %v779_v50 = vadd.f32 %v7500_v40, %v776_v49 }
 0x859   :  { %v1566_v51 = vpop.f32.mrb[14].mxu1 }
 0x85a   :  { %v1580_v54 = vadd.f32 %v1566_v51, %v779_v50  ;;  %v6128_v55 = vpop.f32.mrb[15].mxu1 }
 0x85c   :  { %6940 = vtanh.f32 %v1580_v54  ;;  %v1583_v63 = vmul.f32 0.5, %v1580_v54 }
 0x85e   :  { %6942 = vtanh.f32 %v1583_v63 }
 0x863   :  { %v1651_v56 = vpop.permute.xlu1 %1650 }
 0x864   :  { %6140 = vmatmul.mubr.msk.f32.vlgmr.msra.gmra.mrb[2].mxu1 %vm872_vm6, %v1651_v56 }
 0x865   :  { %6161 = vmatpush3.msk.msra.mxu1 %vm972_vm5, %v7437_v20  ;;  %6162 = vmatprep.mubr.msk.f32.mxu1 %vm7141_vm3, %v9389_v6 }
 0x866   :  { %v6941_v57 = vpop.eup %6940  ;;  %6469 = vmatprep.subr.bf16.mxu1 %v9387_v3 }
 0x867   :  { %1604 = vrot.lane.b32.xlu0 %v6941_v57, %s7147_s30 }
 0x868   :  { %v6943_v16 = vpop.eup %6942 }
 0x869   :  { %v1589_v19 = vmul.f32 0.5, %v6943_v16 }
 0x86b   :  { %v1592_v22 = vadd.f32 0.5, %v1589_v19 }
 0x86d   :  { %v1598_v54 = vmul.f32 %v1592_v22, %v7607_v8 }
 0x874   :  { %v770_v59 = vpop.permute.xlu1 %769 }
 0x875   :  { %v777_v60 = vmul.f32 %v7495_v38, %v770_v59 }
 0x877   :  { %v780_v0 = vadd.f32 %v7500_v40, %v777_v60 }
 0x878   :  { %v774_v62 = vpop.permute.xlu1 %773 }
 0x879   :  { %v778_v1 = vmul.f32 %v7495_v38, %v774_v62 }
 0x87b   :  { %v781_v10 = vadd.f32 %v7500_v40, %v778_v1 }
 0x8c6   :  { %v1571_v5 = vpop.f32.mrb[16].mxu1 }
 0x8c7   :  { %v1581_v7 = vadd.f32 %v1571_v5, %v780_v0  ;;  %v6131_v9 = vpop.f32.mrb[17].mxu1 }
 0x8c9   :  { %6944 = vtanh.f32 %v1581_v7  ;;  %v1584_v26 = vmul.f32 0.5, %v1581_v7 }
 0x8ca   :  { %v1576_v11 = vpop.f32.mrb[18].mxu1 }
 0x8cb   :  { %v1582_v12 = vadd.f32 %v1576_v11, %v781_v10  ;;  %v6134_v15 = vpop.f32.mrb[19].mxu1 }
 0x8cd   :  { %6946 = vtanh.f32 %v1582_v12  ;;  %v1585_v27 = vmul.f32 0.5, %v1582_v12  ;;  %v7154_v12 = vmov 3  }
 0x8ce   :  { %6948 = vtanh.f32 %v1584_v26  ;;  %6873 = vset.pattern.permute.xlu0 %v7154_v12  ;;  %6874 = vset.pattern.permute.xlu1 %v7154_v12 }
 0x8cf   :  { %6950 = vtanh.f32 %v1585_v27 }
 0x8d3   :  { %v6945_v17 = vpop.eup %6944 }
 0x8d4   :  { %1606 = vrot.lane.b32.xlu1 %v6945_v17, %s7147_s30 }
 0x8d7   :  { %v6947_v18 = vpop.eup %6946 }
 0x8d8   :  { %1608 = vrot.lane.b32.xlu0 %v6947_v18, %s7147_s30  ;;  %v6949_v33 = vpop.eup %6948 }
 0x8d9   :  { %v1605_v23 = vpop.permute.xlu0 %1604  ;;  %v1590_v35 = vmul.f32 0.5, %v6949_v33  ;;  %v6951_v39 = vpop.eup %6950 }
 0x8da   :  { %v1613_v25 = vmul.f32 %v1605_v23, %v1592_v22  ;;  %v1591_v42 = vmul.f32 0.5, %v6951_v39 }
 0x8db   :  { %v1593_v44 = vadd.f32 0.5, %v1590_v35 }
 0x8dc   :  { %1619 = vrot.lane.b32.xlu0 %v1613_v25, %s9361_s5  ;;  %v1594_v49 = vadd.f32 0.5, %v1591_v42 }
 0x8dd   :  { %v1599_v5 = vmul.f32 %v1593_v44, %v7613_v21 }
 0x8de   :  { %v1600_v9 = vmul.f32 %v1594_v49, %v7617_v24 }
 0x937   :  { %v1720_v52 = vpop.f32.mrb[2].mxu1 }
 0x938   :  { %v6781_v36 = vadd.f32 %v7420_v14, %v1720_v52  ;;  %v6141_v29 = vpop.f32.mrb[3].mxu1 }
 0x93a   :  { %6952 = vtanh.f32 %v6781_v36  ;;  %v1725_v59 = vmul.f32 0.5, %v6781_v36 }
 0x944   :  { %v6953_v61 = vpop.eup %6952 }
 0x945   :  { %1732 = vrot.lane.b32.xlu1 %v6953_v61, %s9363_s3 }
 0x946   :  { %v1607_v45 = vpop.permute.xlu1 %1606 }
 0x947   :  { %v1614_v46 = vmul.f32 %v1607_v45, %v1593_v44 }
 0x949   :  { %1621 = vrot.lane.b32.xlu1 %v1614_v46, %s9361_s5 }
 0x94a   :  { %v1609_v50 = vpop.permute.xlu0 %1608 }
 0x94b   :  { %v1615_v51 = vmul.f32 %v1609_v50, %v1594_v49 }
 0x94d   :  { %1623 = vrot.lane.b32.xlu0 %v1615_v51, %s9361_s5 }
 0x94e   :  { %v1620_v55 = vpop.permute.xlu0 %1619 }
 0x94f   :  { %v7678_v56 = vadd.f32 %v1620_v55, %v1598_v54 }
 0x951   :  { %6954 = vtanh.f32 %v7678_v56 }
 0x952   :  { %6956 = vtanh.f32 %v1725_v59 }
 0x95b   :  { %v6955_v57 = vpop.eup %6954 }
 0x95c   :  { %1637 = vrot.lane.b32.xlu0 %v6955_v57, %s7150_s0  ;;  %v6957_v60 = vpop.eup %6956 }
 0x95d   :  { %v1727_v62 = vmul.f32 0.5, %v6957_v60 }
 0x95f   :  { %v1728_v63 = vadd.f32 0.5, %v1727_v62 }
 0x961   :  { %v1730_v24 = vmul.f32 %v1728_v63, %v7627_v32 }
 0x9b7   :  { %v1733_v0 = vpop.permute.xlu1 %1732 }
 0x9b8   :  { %v1735_v1 = vmul.f32 %v1733_v0, %v1728_v63 }
 0x9ba   :  { %1737 = vrot.lane.b32.xlu1 %v1735_v1, %s9381_s6 }
 0x9bb   :  { %v1622_v8 = vpop.permute.xlu1 %1621 }
 0x9bc   :  { %v7684_v7 = vadd.f32 %v1622_v8, %v1599_v5 }
 0x9be   :  { %6958 = vtanh.f32 %v7684_v7 }
 0x9bf   :  { %v1624_v10 = vpop.permute.xlu0 %1623 }
 0x9c0   :  { %v7688_v11 = vadd.f32 %v1624_v10, %v1600_v9 }
 0x9c2   :  { %6960 = vtanh.f32 %v7688_v11 }
 0x9c8   :  { %v6959_v15 = vpop.eup %6958 }
 0x9c9   :  { %1639 = vrot.lane.b32.xlu1 %v6959_v15, %s7150_s0 }
 0x9cc   :  { %v6961_v16 = vpop.eup %6960 }
 0x9cd   :  { %1641 = vrot.lane.b32.xlu0 %v6961_v16, %s7150_s0 }
 0x9ce   :  { %v1638_v21 = vpop.permute.xlu0 %1637 }
 0x9cf   :  { %v7693_v17 = vmul.f32 %v1638_v21, %v1592_v22 }
 0x9d1   :  { %1750 = vrot.lane.b32.xlu0 %v7693_v17, %s7151_s7 }
 0xa2c   :  { %v1738_v19 = vpop.permute.xlu1 %1737 }
 0xa2d   :  { %v7698_v18 = vadd.f32 %v1738_v19, %v1730_v24 }
 0xa2f   :  { %6962 = vtanh.f32 %v7698_v18 }
 0xa39   :  { %v6963_v23 = vpop.eup %6962 }
 0xa3a   :  { %1743 = vrot.lane.b32.xlu1 %v6963_v23, %s9359_s2 }
 0xa3b   :  { %v1640_v25 = vpop.permute.xlu1 %1639 }
 0xa3c   :  { %v7702_v26 = vmul.f32 %v1640_v25, %v1593_v44 }
 0xa3e   :  { %1752 = vrot.lane.b32.xlu1 %v7702_v26, %s7151_s7 }
 0xa3f   :  { %v1642_v22 = vpop.permute.xlu0 %1641 }
 0xa40   :  { %v7706_v27 = vmul.f32 %v1642_v22, %v1594_v49 }
 0xa42   :  { %1754 = vrot.lane.b32.xlu0 %v7706_v27, %s7151_s7 }
 0xa43   :  { %v1751_v32 = vpop.permute.xlu0 %1750 }
 0xa44   :  { %6145 = vmatmul.mubr.msk.f32.vlgmr.msra.gmra.mrb[14].mxu0 %vm969_vm7, %v1751_v32 }
 0xa45   :  { %6147 = vmatprep.mubr.msk.f32.mxu0 %vm7141_vm3, %v9389_v6  ;;  %6468 = vmatpush3.bf16.msra.mxu0 %v7406_v13 }
 0xa46   :  { %783 = vperm.xlu0 %6873, %v7484_v31   ;;  %6178 = vmatprep.subr.mxu0 %v9389_v6 }
 0xaac   :  { %v1744_v52 = vpop.permute.xlu1 %1743 }
 0xaad   :  { %v7716_v36 = vmul.f32 %v1744_v52, %v1728_v63 }
 0xaaf   :  { %1912 = vrot.lane.b32.xlu1 %v7716_v36, %s9357_s10 }
 0xab0   :  { %v1753_v29 = vpop.permute.xlu1 %1752 }
 0xab1   :  { %6148 = vmatmul.mubr.msk.f32.gmra.mrb[16].mxu0 %vm969_vm7, %v1753_v29 }
 0xab2   :  { %6150 = vmatprep.mubr.msk.f32.mxu0 %vm7141_vm3, %v9389_v6 }
 0xab3   :  { %787 = vperm.xlu1 %6874, %v7509_v47  }
 0xab4   :  { %v1755_v33 = vpop.permute.xlu0 %1754 }
 0xab5   :  { %6151 = vmatmul.mubr.msk.f32.gmra.mrb[18].mxu0 %vm969_vm7, %v1755_v33 }
 0xab6   :  { %6157 = vmatprep.mubr.msk.f32.mxu0 %vm7141_vm3, %v9389_v6 }
 0xab7   :  { %791 = vperm.xlu1 %6874, %v7515_v48  }
 0xac5   :  { %v784_v35 = vpop.permute.xlu0 %783 }
 0xac6   :  { %v794_v39 = vmul.f32 %v7495_v38, %v784_v35 }
 0xac8   :  { %v797_v61 = vadd.f32 %v7500_v40, %v794_v39 }
 0xb17   :  { %v1828_v42 = vpop.f32.mrb[14].mxu0 }
 0xb18   :  { %v1842_v44 = vadd.f32 %v1828_v42, %v797_v61  ;;  %v6146_v45 = vpop.f32.mrb[15].mxu0 }
 0xb1a   :  { %6964 = vtanh.f32 %v1842_v44  ;;  %v1845_v55 = vmul.f32 0.5, %v1842_v44 }
 0xb1c   :  { %6966 = vtanh.f32 %v1845_v55 }
 0xb21   :  { %v1913_v46 = vpop.permute.xlu1 %1912 }
 0xb22   :  { %6158 = vmatmul.mubr.msk.f32.vlgmr.msra.gmra.mrb[4].mxu0 %vm872_vm6, %v1913_v46 }
 0xb23   :  { %6179 = vmatpush3.msk.msra.mxu0 %vm972_vm5, %v7437_v20  ;;  %6180 = vmatprep.mubr.msk.f32.mxu0 %vm7141_vm3, %v9389_v6 }
 0xb24   :  { %v6965_v49 = vpop.eup %6964  ;;  %6472 = vmatprep.subr.bf16.mxu0 %v9387_v3 }
 0xb25   :  { %1866 = vrot.lane.b32.xlu0 %v6965_v49, %s7147_s30 }
 0xb26   :  { %v6967_v8 = vpop.eup %6966 }
 0xb27   :  { %v1851_v10 = vmul.f32 0.5, %v6967_v8  ;;  %v7155_v8 = vmov 4  }
 0xb28   :  { %6875 = vset.pattern.permute.xlu0 %v7155_v8  ;;  %6876 = vset.pattern.permute.xlu1 %v7155_v8 }
 0xb29   :  { %v1854_v15 = vadd.f32 0.5, %v1851_v10 }
 0xb32   :  { %v788_v50 = vpop.permute.xlu1 %787 }
 0xb33   :  { %v795_v51 = vmul.f32 %v7495_v38, %v788_v50 }
 0xb35   :  { %v798_v59 = vadd.f32 %v7500_v40, %v795_v51 }
 0xb36   :  { %v792_v54 = vpop.permute.xlu1 %791 }
 0xb37   :  { %v796_v57 = vmul.f32 %v7495_v38, %v792_v54 }
 0xb39   :  { %v799_v63 = vadd.f32 %v7500_v40, %v796_v57 }
 0xb84   :  { %v1833_v60 = vpop.f32.mrb[16].mxu0 }
 0xb85   :  { %v1843_v20 = vadd.f32 %v1833_v60, %v798_v59  ;;  %v6149_v62 = vpop.f32.mrb[17].mxu0 }
 0xb87   :  { %6968 = vtanh.f32 %v1843_v20  ;;  %v1846_v24 = vmul.f32 0.5, %v1843_v20 }
 0xb88   :  { %v1838_v0 = vpop.f32.mrb[18].mxu0 }
 0xb89   :  { %v1844_v1 = vadd.f32 %v1838_v0, %v799_v63  ;;  %v6152_v5 = vpop.f32.mrb[19].mxu0 }
 0xb8b   :  { %6970 = vtanh.f32 %v1844_v1  ;;  %v1847_v19 = vmul.f32 0.5, %v1844_v1 }
 0xb8c   :  { %6972 = vtanh.f32 %v1846_v24 }
 0xb8d   :  { %6974 = vtanh.f32 %v1847_v19 }
 0xb91   :  { %v6969_v9 = vpop.eup %6968 }
 0xb92   :  { %1868 = vrot.lane.b32.xlu1 %v6969_v9, %s7147_s30 }
 0xb95   :  { %v6971_v12 = vpop.eup %6970 }
 0xb96   :  { %1870 = vrot.lane.b32.xlu0 %v6971_v12, %s7147_s30  ;;  %v6973_v32 = vpop.eup %6972 }
 0xb97   :  { %v1867_v16 = vpop.permute.xlu0 %1866  ;;  %v1852_v52 = vmul.f32 0.5, %v6973_v32  ;;  %v6975_v29 = vpop.eup %6974 }
 0xb98   :  { %v1875_v21 = vmul.f32 %v1867_v16, %v1854_v15  ;;  %v1853_v35 = vmul.f32 0.5, %v6975_v29 }
 0xb99   :  { %v1855_v39 = vadd.f32 0.5, %v1852_v52 }
 0xb9a   :  { %1881 = vrot.lane.b32.xlu0 %v1875_v21, %s9361_s5  ;;  %v1856_v44 = vadd.f32 0.5, %v1853_v35 }
 0xb9b   :  { %v1861_v62 = vmul.f32 %v1855_v39, %v7684_v7 }
 0xb9c   :  { %v1862_v0 = vmul.f32 %v1856_v44, %v7688_v11 }
 0xbf5   :  { %v1982_v23 = vpop.f32.mrb[4].mxu0 }
 0xbf6   :  { %v6782_v25 = vadd.f32 %v7420_v14, %v1982_v23  ;;  %v6159_v22 = vpop.f32.mrb[5].mxu0  ;;  %v1860_v14 = vmul.f32 %v1854_v15, %v7678_v56 }
 0xbf8   :  { %6976 = vtanh.f32 %v6782_v25  ;;  %v1987_v54 = vmul.f32 0.5, %v6782_v25 }
 0xc02   :  { %v6977_v33 = vpop.eup %6976 }
 0xc03   :  { %1994 = vrot.lane.b32.xlu1 %v6977_v33, %s9363_s3 }
 0xc04   :  { %v1869_v61 = vpop.permute.xlu1 %1868 }
 0xc05   :  { %v1876_v42 = vmul.f32 %v1869_v61, %v1855_v39 }
 0xc07   :  { %1883 = vrot.lane.b32.xlu1 %v1876_v42, %s9361_s5 }
 0xc08   :  { %v1871_v45 = vpop.permute.xlu0 %1870 }
 0xc09   :  { %v1877_v46 = vmul.f32 %v1871_v45, %v1856_v44 }
 0xc0b   :  { %1885 = vrot.lane.b32.xlu0 %v1877_v46, %s9361_s5 }
 0xc0c   :  { %v1882_v49 = vpop.permute.xlu0 %1881 }
 0xc0d   :  { %v7749_v50 = vadd.f32 %v1882_v49, %v1860_v14  ;;  %v7822_v49 = vld [vmem:[%s9413_s9] ss:$0 sm:$0xff] }
 0xc0f   :  { %6978 = vtanh.f32 %v7749_v50 }
 0xc10   :  { %6980 = vtanh.f32 %v1987_v54 }
 0xc19   :  { %v6979_v51 = vpop.eup %6978 }
 0xc1a   :  { %1899 = vrot.lane.b32.xlu0 %v6979_v51, %s7150_s0  ;;  %v6981_v55 = vpop.eup %6980 }
 0xc1b   :  { %v1989_v57 = vmul.f32 0.5, %v6981_v55 }
 0xc1d   :  { %v1990_v59 = vadd.f32 0.5, %v1989_v57 }
 0xc1f   :  { %v1992_v11 = vmul.f32 %v1990_v59, %v7698_v18 }
 0xc75   :  { %v1995_v60 = vpop.permute.xlu1 %1994 }
 0xc76   :  { %v1997_v20 = vmul.f32 %v1995_v60, %v1990_v59 }
 0xc78   :  { %1999 = vrot.lane.b32.xlu1 %v1997_v20, %s9381_s6 }
 0xc79   :  { %v1884_v56 = vpop.permute.xlu1 %1883 }
 0xc7a   :  { %v7755_v63 = vadd.f32 %v1884_v56, %v1861_v62 }
 0xc7c   :  { %6982 = vtanh.f32 %v7755_v63 }
 0xc7d   :  { %v1886_v1 = vpop.permute.xlu0 %1885 }
 0xc7e   :  { %v7759_v5 = vadd.f32 %v1886_v1, %v1862_v0 }
 0xc80   :  { %6984 = vtanh.f32 %v7759_v5 }
 0xc86   :  { %v6983_v9 = vpop.eup %6982 }
 0xc87   :  { %1901 = vrot.lane.b32.xlu1 %v6983_v9, %s7150_s0 }
 0xc8a   :  { %v6985_v10 = vpop.eup %6984 }
 0xc8b   :  { %1903 = vrot.lane.b32.xlu0 %v6985_v10, %s7150_s0 }
 0xc8c   :  { %v1900_v7 = vpop.permute.xlu0 %1899 }
 0xc8d   :  { %v7764_v12 = vmul.f32 %v1900_v7, %v1854_v15 }
 0xc8f   :  { %2012 = vrot.lane.b32.xlu0 %v7764_v12, %s7151_s7 }
 0xcea   :  { %v2000_v16 = vpop.permute.xlu1 %1999 }
 0xceb   :  { %v7769_v21 = vadd.f32 %v2000_v16, %v1992_v11 }
 0xced   :  { %6986 = vtanh.f32 %v7769_v21 }
 0xcf7   :  { %v6987_v24 = vpop.eup %6986 }
 0xcf8   :  { %2005 = vrot.lane.b32.xlu1 %v6987_v24, %s9359_s2  ;;  %s7160_s2 = smov 48  }
 0xcf9   :  { %v1902_v19 = vpop.permute.xlu1 %1901 }
 0xcfa   :  { %v7773_v23 = vmul.f32 %v1902_v19, %v1855_v39 }
 0xcfc   :  { %2014 = vrot.lane.b32.xlu1 %v7773_v23, %s7151_s7 }
 0xcfd   :  { %v1904_v15 = vpop.permute.xlu0 %1903 }
 0xcfe   :  { %v7777_v25 = vmul.f32 %v1904_v15, %v1856_v44  ;;  %v7833_v15 = vld [vmem:[%s9409_s20] ss:$0 sm:$0xff]  ;;  %s9414_s20 = smov 32  }
 0xd00   :  { %2016 = vrot.lane.b32.xlu0 %v7777_v25, %s7151_s7 }
 0xd01   :  { %v2013_v18 = vpop.permute.xlu0 %2012 }
 0xd02   :  { %6163 = vmatmul.mubr.msk.f32.vlgmr.msra.gmra.mrb[20].mxu1 %vm969_vm7, %v2013_v18 }
 0xd03   :  { %6165 = vmatprep.mubr.msk.f32.mxu1 %vm7141_vm3, %v9389_v6  ;;  %6471 = vmatpush3.bf16.msra.mxu1 %v7406_v13 }
 0xd04   :  { %801 = vperm.xlu0 %6875, %v7484_v31   ;;  %6196 = vmatprep.subr.mxu1 %v9389_v6 }
 0xd6a   :  { %v2006_v22 = vpop.permute.xlu1 %2005 }
 0xd6b   :  { %v7787_v32 = vmul.f32 %v2006_v22, %v1990_v59 }
 0xd6d   :  { %2174 = vrot.lane.b32.xlu1 %v7787_v32, %s9357_s10  ;;  %s9417_s10 = sld [smem:[#allocation15_spill]] }
 0xd6e   :  { %v2015_v52 = vpop.permute.xlu1 %2014 }
 0xd6f   :  { %6166 = vmatmul.mubr.msk.f32.gmra.mrb[22].mxu1 %vm969_vm7, %v2015_v52 }
 0xd70   :  { %6168 = vmatprep.mubr.msk.f32.mxu1 %vm7141_vm3, %v9389_v6 }
 0xd71   :  { %805 = vperm.xlu1 %6876, %v7509_v47   ;;  %v7805_v47 = vld [vmem:[%s9410_s4] sm:$0xf]  ;;  %s9416_s4 = sld [smem:[#allocation17_spill]] }
 0xd72   :  { %v2017_v29 = vpop.permute.xlu0 %2016 }
 0xd73   :  { %6169 = vmatmul.mubr.msk.f32.gmra.mrb[24].mxu1 %vm969_vm7, %v2017_v29 }
 0xd74   :  { %6175 = vmatprep.mubr.msk.f32.mxu1 %vm7141_vm3, %v9389_v6 }
 0xd75   :  { %809 = vperm.xlu1 %6876, %v7515_v48   ;;  %v7816_v48 = vld [vmem:[%s9412_s1] ss:$0 sm:$0xff] }
 0xd83   :  { %v802_v31 = vpop.permute.xlu0 %801 }
 0xd84   :  { %v812_v33 = vmul.f32 %v7495_v38, %v802_v31 }
 0xd86   :  { %v815_v35 = vadd.f32 %v7500_v40, %v812_v33 }
 0xdd5   :  { %v2090_v39 = vpop.f32.mrb[20].mxu1 }
 0xdd6   :  { %v2104_v61 = vadd.f32 %v2090_v39, %v815_v35  ;;  %v6164_v42 = vpop.f32.mrb[21].mxu1 }
 0xdd8   :  { %6988 = vtanh.f32 %v2104_v61  ;;  %v2107_v14 = vmul.f32 0.5, %v2104_v61 }
 0xdda   :  { %6990 = vtanh.f32 %v2107_v14 }
 0xddf   :  { %v2175_v44 = vpop.permute.xlu1 %2174 }
 0xde0   :  { %6176 = vmatmul.mubr.msk.f32.vlgmr.msra.gmra.mrb[4].mxu1 %vm872_vm6, %v2175_v44 }
 0xde1   :  { %6197 = vmatpush3.msk.msra.mxu1 %vm972_vm5, %v7805_v47  ;;  %6198 = vmatprep.mubr.msk.f32.mxu1 %vm7141_vm3, %v9389_v6 }
 0xde2   :  { %v6989_v38 = vpop.eup %6988  ;;  %6475 = vmatprep.subr.bf16.mxu1 %v9387_v3 }
 0xde3   :  { %2128 = vrot.lane.b32.xlu0 %v6989_v38, %s7147_s30 }
 0xde4   :  { %v6991_v0 = vpop.eup %6990 }
 0xde5   :  { %v2113_v8 = vmul.f32 0.5, %v6991_v0 }
 0xde7   :  { %v2116_v10 = vadd.f32 0.5, %v2113_v8 }
 0xdf0   :  { %v806_v40 = vpop.permute.xlu1 %805 }
 0xdf1   :  { %v813_v45 = vmul.f32 %v7816_v48, %v806_v40 }
 0xdf3   :  { %v816_v51 = vadd.f32 %v7822_v49, %v813_v45  ;;  %v2122_v45 = vmul.f32 %v2116_v10, %v7749_v50 }
 0xdf4   :  { %v810_v46 = vpop.permute.xlu1 %809 }
 0xdf5   :  { %v814_v54 = vmul.f32 %v7816_v48, %v810_v46 }
 0xdf7   :  { %v817_v60 = vadd.f32 %v7822_v49, %v814_v54 }
 0xe42   :  { %v2095_v55 = vpop.f32.mrb[22].mxu1 }
 0xe43   :  { %v2105_v57 = vadd.f32 %v2095_v55, %v816_v51  ;;  %v6167_v59 = vpop.f32.mrb[23].mxu1 }
 0xe45   :  { %6992 = vtanh.f32 %v2105_v57  ;;  %v2108_v16 = vmul.f32 0.5, %v2105_v57 }
 0xe46   :  { %v2100_v20 = vpop.f32.mrb[24].mxu1 }
 0xe47   :  { %v2106_v62 = vadd.f32 %v2100_v20, %v817_v60  ;;  %v6170_v56 = vpop.f32.mrb[25].mxu1 }
 0xe49   :  { %6994 = vtanh.f32 %v2106_v62  ;;  %v2109_v24 = vmul.f32 0.5, %v2106_v62 }
 0xe4a   :  { %6996 = vtanh.f32 %v2108_v16 }
 0xe4b   :  { %6998 = vtanh.f32 %v2109_v24 }
 0xe4f   :  { %v6993_v1 = vpop.eup %6992 }
 0xe50   :  { %2130 = vrot.lane.b32.xlu1 %v6993_v1, %s7147_s30 }
 0xe53   :  { %v6995_v9 = vpop.eup %6994 }
 0xe54   :  { %2132 = vrot.lane.b32.xlu0 %v6995_v9, %s7147_s30  ;;  %v6997_v52 = vpop.eup %6996  ;;  %v7156_v9 = vmov 5  }
 0xe55   :  { %v2129_v7 = vpop.permute.xlu0 %2128  ;;  %v2114_v29 = vmul.f32 0.5, %v6997_v52  ;;  %v6999_v31 = vpop.eup %6998  ;;  %6877 = vset.pattern.permute.xlu0 %v7156_v9  ;;  %6878 = vset.pattern.permute.xlu1 %v7156_v9 }
 0xe56   :  { %v2137_v11 = vmul.f32 %v2129_v7, %v2116_v10  ;;  %v2115_v35 = vmul.f32 0.5, %v6999_v31  ;;  %v7879_v31 = vld [vmem:[%s9411_s29] sm:$0xff] }
 0xe57   :  { %v2117_v39 = vadd.f32 0.5, %v2114_v29 }
 0xe58   :  { %2143 = vrot.lane.b32.xlu0 %v2137_v11, %s9361_s5  ;;  %v2118_v44 = vadd.f32 0.5, %v2115_v35 }
 0xe59   :  { %v2123_v62 = vmul.f32 %v2117_v39, %v7755_v63 }
 0xe5a   :  { %v2124_v0 = vmul.f32 %v2118_v44, %v7759_v5 }
 0xeb3   :  { %v2244_v19 = vpop.f32.mrb[4].mxu1 }
 0xeb4   :  { %v6783_v18 = vadd.f32 %v7833_v15, %v2244_v19  ;;  %v6177_v22 = vpop.f32.mrb[5].mxu1 }
 0xeb6   :  { %7000 = vtanh.f32 %v6783_v18  ;;  %v2249_v54 = vmul.f32 0.5, %v6783_v18 }
 0xec0   :  { %v7001_v33 = vpop.eup %7000 }
 0xec1   :  { %2256 = vrot.lane.b32.xlu1 %v7001_v33, %s9363_s3 }
 0xec2   :  { %v2131_v61 = vpop.permute.xlu1 %2130 }
 0xec3   :  { %v2138_v42 = vmul.f32 %v2131_v61, %v2117_v39  ;;  %v7893_v61 = vld [vmem:[%s9411_s29 + $0x8] sm:$0xff] }
 0xec5   :  { %2145 = vrot.lane.b32.xlu1 %v2138_v42, %s9361_s5 }
 0xec6   :  { %v2133_v38 = vpop.permute.xlu0 %2132 }
 0xec7   :  { %v2139_v40 = vmul.f32 %v2133_v38, %v2118_v44 }
 0xec9   :  { %2147 = vrot.lane.b32.xlu0 %v2139_v40, %s9361_s5 }
 0xeca   :  { %v2144_v46 = vpop.permute.xlu0 %2143 }
 0xecb   :  { %v7840_v14 = vadd.f32 %v2144_v46, %v2122_v45 }
 0xecd   :  { %7002 = vtanh.f32 %v7840_v14 }
 0xece   :  { %7004 = vtanh.f32 %v2249_v54 }
 0xed7   :  { %v7003_v51 = vpop.eup %7002 }
 0xed8   :  { %2161 = vrot.lane.b32.xlu0 %v7003_v51, %s7150_s0  ;;  %v7005_v55 = vpop.eup %7004 }
 0xed9   :  { %v2251_v57 = vmul.f32 0.5, %v7005_v55 }
 0xedb   :  { %v2252_v59 = vadd.f32 0.5, %v2251_v57 }
 0xedd   :  { %v2254_v5 = vmul.f32 %v2252_v59, %v7769_v21 }
 0xf33   :  { %v2257_v60 = vpop.permute.xlu1 %2256 }
 0xf34   :  { %v2259_v20 = vmul.f32 %v2257_v60, %v2252_v59 }
 0xf36   :  { %2261 = vrot.lane.b32.xlu1 %v2259_v20, %s9381_s6 }
 0xf37   :  { %v2146_v50 = vpop.permute.xlu1 %2145 }
 0xf38   :  { %v7846_v56 = vadd.f32 %v2146_v50, %v2123_v62 }
 0xf3a   :  { %7006 = vtanh.f32 %v7846_v56 }
 0xf3b   :  { %v2148_v1 = vpop.permute.xlu0 %2147 }
 0xf3c   :  { %v7850_v8 = vadd.f32 %v2148_v1, %v2124_v0 }
 0xf3e   :  { %7008 = vtanh.f32 %v7850_v8 }
 0xf44   :  { %v7007_v7 = vpop.eup %7006 }
 0xf45   :  { %2163 = vrot.lane.b32.xlu1 %v7007_v7, %s7150_s0 }
 0xf48   :  { %v7009_v11 = vpop.eup %7008 }
 0xf49   :  { %2165 = vrot.lane.b32.xlu0 %v7009_v11, %s7150_s0 }
 0xf4a   :  { %v2162_v63 = vpop.permute.xlu0 %2161 }
 0xf4b   :  { %v7855_v16 = vmul.f32 %v2162_v63, %v2116_v10 }
 0xf4d   :  { %2274 = vrot.lane.b32.xlu0 %v7855_v16, %s7151_s7 }
 0xfa8   :  { %v2262_v24 = vpop.permute.xlu1 %2261 }
 0xfa9   :  { %v7860_v19 = vadd.f32 %v2262_v24, %v2254_v5 }
 0xfab   :  { %7010 = vtanh.f32 %v7860_v19 }
 0xfb5   :  { %v7011_v18 = vpop.eup %7010 }
 0xfb6   :  { %2267 = vrot.lane.b32.xlu1 %v7011_v18, %s9414_s20 }
 0xfb7   :  { %v2164_v22 = vpop.permute.xlu1 %2163 }
 0xfb8   :  { %v7864_v52 = vmul.f32 %v2164_v22, %v2117_v39 }
 0xfba   :  { %2276 = vrot.lane.b32.xlu1 %v7864_v52, %s7151_s7 }
 0xfbb   :  { %v2166_v10 = vpop.permute.xlu0 %2165 }
 0xfbc   :  { %v7868_v29 = vmul.f32 %v2166_v10, %v2118_v44  ;;  %v7902_v44 = vld [vmem:[%s9411_s29 + $0x10] sm:$0x3]  ;;  %s9365_s29 = smov 112  }
 0xfbe   :  { %2278 = vrot.lane.b32.xlu0 %v7868_v29, %s7151_s7 }
 0xfbf   :  { %v2275_v21 = vpop.permute.xlu0 %2274 }
 0xfc0   :  { %6181 = vmatmul.mubr.msk.f32.vlgmr.msra.gmra.mrb[20].mxu0 %vm969_vm7, %v2275_v21 }
 0xfc1   :  { %6183 = vmatprep.mubr.msk.f32.mxu0 %vm7141_vm3, %v9389_v6  ;;  %6474 = vmatpush3.bf16.msra.mxu0 %v7406_v13 }
 0xfc2   :  { %819 = vperm.xlu0 %6877, %v7879_v31   ;;  %6214 = vmatprep.subr.mxu0 %v9389_v6 }
0x1028   :  { %v2268_v33 = vpop.permute.xlu1 %2267 }
0x1029   :  { %v7883_v35 = vmul.f32 %v2268_v33, %v2252_v59 }
0x102b   :  { %2436 = vrot.lane.b32.xlu1 %v7883_v35, %s9415_s12 }
0x102c   :  { %v2277_v39 = vpop.permute.xlu1 %2276 }
0x102d   :  { %6184 = vmatmul.mubr.msk.f32.gmra.mrb[22].mxu0 %vm969_vm7, %v2277_v39 }
0x102e   :  { %6186 = vmatprep.mubr.msk.f32.mxu0 %vm7141_vm3, %v9389_v6 }
0x102f   :  { %823 = vperm.xlu1 %6878, %v7893_v61  }
0x1030   :  { %v2279_v42 = vpop.permute.xlu0 %2278 }
0x1031   :  { %6187 = vmatmul.mubr.msk.f32.gmra.mrb[24].mxu0 %vm969_vm7, %v2279_v42 }
0x1032   :  { %6193 = vmatprep.mubr.msk.f32.mxu0 %vm7141_vm3, %v9389_v6 }
0x1033   :  { %827 = vperm.xlu1 %6878, %v7902_v44  }
0x1041   :  { %v820_v38 = vpop.permute.xlu0 %819 }
0x1042   :  { %v830_v40 = vmul.f32 %v7816_v48, %v820_v38 }
0x1044   :  { %v833_v45 = vadd.f32 %v7822_v49, %v830_v40 }
0x1093   :  { %v2352_v46 = vpop.f32.mrb[20].mxu0 }
0x1094   :  { %v2366_v51 = vadd.f32 %v2352_v46, %v833_v45  ;;  %v6182_v54 = vpop.f32.mrb[21].mxu0 }
0x1096   :  { %7012 = vtanh.f32 %v2366_v51  ;;  %v2369_v62 = vmul.f32 0.5, %v2366_v51 }
0x1098   :  { %7014 = vtanh.f32 %v2369_v62 }
0x109d   :  { %v2437_v55 = vpop.permute.xlu1 %2436 }
0x109e   :  { %6194 = vmatmul.mubr.msk.f32.vlgmr.msra.gmra.mrb[6].mxu0 %vm872_vm6, %v2437_v55 }
0x109f   :  { %6215 = vmatpush3.msk.msra.mxu0 %vm972_vm5, %v7805_v47  ;;  %6216 = vmatprep.mubr.msk.f32.mxu0 %vm7141_vm3, %v9389_v6 }
0x10a0   :  { %v7013_v57 = vpop.eup %7012  ;;  %6478 = vmatprep.subr.bf16.mxu0 %v9387_v3 }
0x10a1   :  { %2390 = vrot.lane.b32.xlu0 %v7013_v57, %s7147_s30 }
0x10a2   :  { %v7015_v24 = vpop.eup %7014 }
0x10a3   :  { %v2375_v22 = vmul.f32 0.5, %v7015_v24 }
0x10a5   :  { %v2378_v21 = vadd.f32 0.5, %v2375_v22 }
0x10ae   :  { %v824_v59 = vpop.permute.xlu1 %823 }
0x10af   :  { %v831_v60 = vmul.f32 %v7816_v48, %v824_v59 }
0x10b1   :  { %v834_v0 = vadd.f32 %v7822_v49, %v831_v60 }
0x10b2   :  { %v828_v20 = vpop.permute.xlu1 %827 }
0x10b3   :  { %v832_v50 = vmul.f32 %v7816_v48, %v828_v20 }
0x10b5   :  { %v835_v7 = vadd.f32 %v7822_v49, %v832_v50 }
0x1100   :  { %v2357_v1 = vpop.f32.mrb[22].mxu0 }
0x1101   :  { %v2367_v47 = vadd.f32 %v2357_v1, %v834_v0  ;;  %v6185_v9 = vpop.f32.mrb[23].mxu0 }
0x1103   :  { %7016 = vtanh.f32 %v2367_v47  ;;  %v2370_v42 = vmul.f32 0.5, %v2367_v47  ;;  %v2384_v47 = vmul.f32 %v2378_v21, %v7840_v14 }
0x1104   :  { %v2362_v11 = vpop.f32.mrb[24].mxu0 }
0x1105   :  { %v2368_v63 = vadd.f32 %v2362_v11, %v835_v7  ;;  %v6188_v5 = vpop.f32.mrb[25].mxu0 }
0x1107   :  { %7018 = vtanh.f32 %v2368_v63  ;;  %v2371_v38 = vmul.f32 0.5, %v2368_v63 }
0x1108   :  { %7020 = vtanh.f32 %v2370_v42 }
0x1109   :  { %7022 = vtanh.f32 %v2371_v38 }
0x110d   :  { %v7017_v18 = vpop.eup %7016 }
0x110e   :  { %2392 = vrot.lane.b32.xlu1 %v7017_v18, %s7147_s30 }
0x1111   :  { %v7019_v10 = vpop.eup %7018 }
0x1112   :  { %2394 = vrot.lane.b32.xlu0 %v7019_v10, %s7147_s30  ;;  %v7021_v51 = vpop.eup %7020 }
0x1113   :  { %v2391_v33 = vpop.permute.xlu0 %2390  ;;  %v2376_v54 = vmul.f32 0.5, %v7021_v51  ;;  %v7023_v55 = vpop.eup %7022 }
0x1114   :  { %v2399_v39 = vmul.f32 %v2391_v33, %v2378_v21  ;;  %v2377_v59 = vmul.f32 0.5, %v7023_v55 }
0x1115   :  { %v2379_v60 = vadd.f32 0.5, %v2376_v54 }
0x1116   :  { %2405 = vrot.lane.b32.xlu0 %v2399_v39, %s9361_s5  ;;  %v2380_v50 = vadd.f32 0.5, %v2377_v59 }
0x1117   :  { %v2385_v33 = vmul.f32 %v2379_v60, %v7846_v56 }
0x1118   :  { %v2386_v42 = vmul.f32 %v2380_v50, %v7850_v8 }
0x1171   :  { %v2506_v40 = vpop.f32.mrb[6].mxu0 }
0x1172   :  { %v6784_v45 = vadd.f32 %v7833_v15, %v2506_v40  ;;  %v6195_v46 = vpop.f32.mrb[7].mxu0 }
0x1174   :  { %7024 = vtanh.f32 %v6784_v45  ;;  %v2511_v63 = vmul.f32 0.5, %v6784_v45 }
0x117e   :  { %v7025_v57 = vpop.eup %7024 }
0x117f   :  { %2518 = vrot.lane.b32.xlu1 %v7025_v57, %s9363_s3 }
0x1180   :  { %v2393_v20 = vpop.permute.xlu1 %2392 }
0x1181   :  { %v2400_v62 = vmul.f32 %v2393_v20, %v2379_v60 }
0x1183   :  { %2407 = vrot.lane.b32.xlu1 %v2400_v62, %s9361_s5 }
0x1184   :  { %v2395_v0 = vpop.permute.xlu0 %2394 }
0x1185   :  { %v2401_v1 = vmul.f32 %v2395_v0, %v2380_v50 }
0x1187   :  { %2409 = vrot.lane.b32.xlu0 %v2401_v1, %s9361_s5 }
0x1188   :  { %v2406_v9 = vpop.permute.xlu0 %2405 }
0x1189   :  { %v7926_v7 = vadd.f32 %v2406_v9, %v2384_v47 }
0x118b   :  { %7026 = vtanh.f32 %v7926_v7 }
0x118c   :  { %7028 = vtanh.f32 %v2511_v63 }
0x1195   :  { %v7027_v11 = vpop.eup %7026 }
0x1196   :  { %2423 = vrot.lane.b32.xlu0 %v7027_v11, %s7150_s0  ;;  %v7029_v5 = vpop.eup %7028 }
0x1197   :  { %v2513_v24 = vmul.f32 0.5, %v7029_v5 }
0x1199   :  { %v2514_v18 = vadd.f32 0.5, %v2513_v24 }
0x119b   :  { %v2516_v54 = vmul.f32 %v2514_v18, %v7860_v19 }
0x11f1   :  { %v2519_v22 = vpop.permute.xlu1 %2518 }
0x11f2   :  { %v2521_v10 = vmul.f32 %v2519_v22, %v2514_v18 }
0x11f4   :  { %2523 = vrot.lane.b32.xlu1 %v2521_v10, %s9381_s6 }
0x11f5   :  { %v2408_v14 = vpop.permute.xlu1 %2407 }
0x11f6   :  { %v7932_v39 = vadd.f32 %v2408_v14, %v2385_v33  ;;  %v7157_v33 = vmov 6  }
0x11f7   :  { %6879 = vset.pattern.permute.xlu1 %v7157_v33  ;;  %6880 = vset.pattern.permute.xlu0 %v7157_v33 }
0x11f8   :  { %7030 = vtanh.f32 %v7932_v39 }
0x11f9   :  { %v2410_v38 = vpop.permute.xlu0 %2409 }
0x11fa   :  { %v7936_v40 = vadd.f32 %v2410_v38, %v2386_v42 }
0x11fc   :  { %7032 = vtanh.f32 %v7936_v40 }
0x1202   :  { %v7031_v45 = vpop.eup %7030 }
0x1203   :  { %2425 = vrot.lane.b32.xlu1 %v7031_v45, %s7150_s0 }
0x1206   :  { %v7033_v46 = vpop.eup %7032 }
0x1207   :  { %2427 = vrot.lane.b32.xlu0 %v7033_v46, %s7150_s0 }
0x1208   :  { %v2424_v51 = vpop.permute.xlu0 %2423 }
0x1209   :  { %v7941_v56 = vmul.f32 %v2424_v51, %v2378_v21 }
0x120b   :  { %2536 = vrot.lane.b32.xlu0 %v7941_v56, %s7151_s7 }
0x1266   :  { %v2524_v8 = vpop.permute.xlu1 %2523 }
0x1267   :  { %v2526_v55 = vadd.f32 %v2524_v8, %v2516_v54 }
0x1269   :  { %7034 = vtanh.f32 %v2526_v55 }
0x1273   :  { %v7035_v57 = vpop.eup %7034 }
0x1274   :  { %2529 = vrot.lane.b32.xlu1 %v7035_v57, %s9414_s20 }
0x1275   :  { %v2426_v59 = vpop.permute.xlu1 %2425 }
0x1276   :  { %v7947_v20 = vmul.f32 %v2426_v59, %v2379_v60 }
0x1278   :  { %2538 = vrot.lane.b32.xlu1 %v7947_v20, %s7151_s7 }
0x1279   :  { %v2428_v62 = vpop.permute.xlu0 %2427 }
0x127a   :  { %v7951_v21 = vmul.f32 %v2428_v62, %v2380_v50 }
0x127c   :  { %2540 = vrot.lane.b32.xlu0 %v7951_v21, %s7151_s7 }
0x127d   :  { %v2537_v0 = vpop.permute.xlu0 %2536 }
0x127e   :  { %6199 = vmatmul.mubr.msk.f32.vlgmr.msra.gmra.mrb[26].mxu1 %vm969_vm7, %v2537_v0 }
0x127f   :  { %6201 = vmatprep.mubr.msk.f32.mxu1 %vm7141_vm3, %v9389_v6  ;;  %6477 = vmatpush3.bf16.msra.mxu1 %v7406_v13 }
0x1280   :  { %6502 = vmatprep.subr.bf16.mxu1 %v9387_v3 }
0x12e6   :  { %v2530_v19 = vpop.permute.xlu1 %2529 }
0x12e7   :  { %v7960_v60 = vmul.f32 %v2530_v19, %v2514_v18 }
0x12e9   :  { %2698 = vrot.lane.b32.xlu1 %v7960_v60, %s9415_s12 }
0x12ea   :  { %v2539_v50 = vpop.permute.xlu1 %2538 }
0x12eb   :  { %6202 = vmatmul.mubr.msk.f32.gmra.mrb[28].mxu1 %vm969_vm7, %v2539_v50 }
0x12ec   :  { %6204 = vmatprep.mubr.msk.f32.mxu1 %vm7141_vm3, %v9389_v6 }
0x12ee   :  { %v2541_v1 = vpop.permute.xlu0 %2540 }
0x12ef   :  { %6205 = vmatmul.mubr.msk.f32.gmra.mrb[30].mxu1 %vm969_vm7, %v2541_v1 }
0x12f0   :  { %6211 = vmatprep.mubr.msk.f32.mxu1 %vm7141_vm3, %v9389_v6 }
0x1351   :  { %v2614_v13 = vpop.f32.mrb[26].mxu1 }
0x1352   :  { %v6200_v47 = vpop.f32.mrb[27].mxu1 }
0x135b   :  { %v2699_v9 = vpop.permute.xlu1 %2698 }
0x135c   :  { %6212 = vmatmul.mubr.msk.f32.vlgmr.msra.gmra.mrb[6].mxu1 %vm872_vm6, %v2699_v9 }
0x135d   :  { %6264 = vmatprep.mubr.msk.f32.mxu1 %vm7141_vm3, %v9389_v6 }
0x13be   :  { %v2619_v11 = vpop.f32.mrb[28].mxu1 }
0x13bf   :  { %v6203_v63 = vpop.f32.mrb[29].mxu1 }
0x13c2   :  { %v2624_v5 = vpop.f32.mrb[30].mxu1 }
0x13c3   :  { %v6206_v24 = vpop.f32.mrb[31].mxu1 }
0x142f   :  { %v2768_v18 = vpop.f32.mrb[6].mxu1 }
0x1430   :  { %v6785_v22 = vadd.f32 %v7833_v15, %v2768_v18  ;;  %v6213_v10 = vpop.f32.mrb[7].mxu1  ;;  %v7989_v18 = vld [vmem:[%s9340_s21] sm:$0xff] }
0x1432   :  { %7036 = vtanh.f32 %v6785_v22  ;;  %v2773_v42 = vmul.f32 0.5, %v6785_v22 }
0x1434   :  { %7038 = vtanh.f32 %v2773_v42 }
0x143c   :  { %v7037_v14 = vpop.eup %7036 }
0x143d   :  { %2780 = vrot.lane.b32.xlu0 %v7037_v14, %s9363_s3 }
0x143e   :  { %v7039_v38 = vpop.eup %7038 }
0x143f   :  { %v2775_v45 = vmul.f32 0.5, %v7039_v38 }
0x1441   :  { %v2776_v46 = vadd.f32 0.5, %v2775_v45 }
0x1443   :  { %v2778_v15 = vmul.f32 %v2776_v46, %v2526_v55 }
0x14af   :  { %v2781_v51 = vpop.permute.xlu0 %2780 }
0x14b0   :  { %v2783_v54 = vmul.f32 %v2781_v51, %v2776_v46 }
0x14b2   :  { %2785 = vrot.lane.b32.xlu1 %v2783_v54, %s9381_s6 }
0x14b6   :  { %837 = vperm.xlu1 %6879, %v7879_v31  }
0x14ba   :  { %845 = vperm.xlu1 %6879, %v7902_v44  }
0x1524   :  { %v2786_v8 = vpop.permute.xlu1 %2785 }
0x1525   :  { %v2788_v57 = vadd.f32 %v2786_v8, %v2778_v15 }
0x1527   :  { %7040 = vtanh.f32 %v2788_v57 }
0x1531   :  { %v7041_v59 = vpop.eup %7040 }
0x1532   :  { %2791 = vrot.lane.b32.xlu0 %v7041_v59, %s9414_s20 }
0x1535   :  { %v838_v62 = vpop.permute.xlu1 %837 }
0x1536   :  { %v848_v0 = vmul.f32 %v7816_v48, %v838_v62  ;;  %841 = vperm.xlu0 %6880, %v7893_v61  }
0x1538   :  { %v851_v19 = vadd.f32 %v7822_v49, %v848_v0 }
0x1539   :  { %v846_v50 = vpop.permute.xlu1 %845 }
0x153a   :  { %v2628_v1 = vadd.f32 %v2614_v13, %v851_v19  ;;  %v850_v47 = vmul.f32 %v7816_v48, %v846_v50  ;;  %v3150_v13 = vld [vmem:[%s9340_s21 + $0x8] sm:$0xff]  ;;  %s9379_s21 = smov 108  }
0x153b   :  { %v6503_v22 = vpack.c.bf16 %v3150_v13, %v7989_v18 }
0x153c   :  { %7042 = vtanh.f32 %v2628_v1  ;;  %v853_v55 = vadd.f32 %v7822_v49, %v850_v47  ;;  %v2631_v33 = vmul.f32 0.5, %v2628_v1 }
0x153d   :  { %6504 = vmatpush3.bf16.msra.mxu1 %v6503_v22 }
0x153e   :  { %v2630_v9 = vadd.f32 %v2624_v5, %v853_v55  ;;  %6505 = vmatprep.subr.bf16.mxu1 %v9387_v3 }
0x1540   :  { %7044 = vtanh.f32 %v2630_v9  ;;  %v2633_v42 = vmul.f32 0.5, %v2630_v9 }
0x1541   :  { %7046 = vtanh.f32 %v2631_v33 }
0x1542   :  { %7048 = vtanh.f32 %v2633_v42 }
0x1546   :  { %v7043_v63 = vpop.eup %7042 }
0x1547   :  { %2652 = vrot.lane.b32.xlu0 %v7043_v63, %s7147_s30 }
0x154a   :  { %v7045_v24 = vpop.eup %7044 }
0x154b   :  { %2656 = vrot.lane.b32.xlu0 %v7045_v24, %s7147_s30  ;;  %v7047_v54 = vpop.eup %7046 }
0x154c   :  { %v2637_v15 = vmul.f32 0.5, %v7047_v54  ;;  %v7049_v8 = vpop.eup %7048  ;;  %v3181_v54 = vld [vmem:[%s9343_s24 + $0x8] sm:$0xff] }
0x154d   :  { %v2639_v62 = vmul.f32 0.5, %v7049_v8  ;;  %v3183_v8 = vld [vmem:[%s9343_s24 + $0x18] sm:$0xff] }
0x154e   :  { %v8002_v59 = vadd.f32 0.5, %v2637_v15  ;;  %v3182_v15 = vld [vmem:[%s9343_s24 + $0x10] sm:$0xff] }
0x154f   :  { %v8006_v50 = vadd.f32 0.5, %v2639_v62  ;;  %v3185_v62 = vld [vmem:[%s9343_s24 + $0x28] sm:$0xff] }
0x1550   :  { %v2646_v22 = vmul.f32 %v8002_v59, %v7926_v7  ;;  %v3180_v7 = vld [vmem:[%s9343_s24] sm:$0xff] }
0x15a4   :  { %v2792_v5 = vpop.permute.xlu0 %2791 }
0x15a5   :  { %v7996_v10 = vmul.f32 %v2792_v5, %v2776_v46 }
0x15a7   :  { %3386 = vrot.lane.b32.xlu1 %v7996_v10, %s9415_s12  ;;  %s9418_s12 = sld [smem:[#allocation16_spill]] }
0x15b5   :  { %v842_v14 = vpop.permute.xlu0 %841 }
0x15b6   :  { %v849_v38 = vmul.f32 %v7816_v48, %v842_v14  ;;  %v2648_v14 = vmul.f32 %v8006_v50, %v7936_v40  ;;  %v6506_v40 = vpack.c.bf16 %v3181_v54, %v3180_v7  ;;  %v3195_v7 = vld [vmem:[%s9343_s24 + $0x78] sm:$0xff] }
0x15b8   :  { %v852_v45 = vadd.f32 %v7822_v49, %v849_v38 }
0x15b9   :  { %v2653_v57 = vpop.permute.xlu0 %2652 }
0x15ba   :  { %v2629_v51 = vadd.f32 %v2619_v11, %v852_v45  ;;  %v2661_v0 = vmul.f32 %v2653_v57, %v8002_v59  ;;  %v6509_v57 = vpack.c.bf16 %v3183_v8, %v3182_v15 }
0x15bc   :  { %7050 = vtanh.f32 %v2629_v51  ;;  %v2632_v47 = vmul.f32 0.5, %v2629_v51 }
0x15bd   :  { %v2657_v19 = vpop.permute.xlu0 %2656 }
0x15be   :  { %v2663_v11 = vmul.f32 %v2657_v19, %v8006_v50  ;;  %7052 = vtanh.f32 %v2632_v47  ;;  %v3186_v19 = vld [vmem:[%s9343_s24 + $0x30] sm:$0xff] }
0x15c6   :  { %v7051_v46 = vpop.eup %7050 }
0x15c7   :  { %2654 = vrot.lane.b32.xlu1 %v7051_v46, %s7147_s30  ;;  %v3184_v46 = vld [vmem:[%s9343_s24 + $0x20] sm:$0xff] }
0x15c8   :  { %v7053_v55 = vpop.eup %7052 }
0x15c9   :  { %v2638_v9 = vmul.f32 0.5, %v7053_v55  ;;  %v3188_v55 = vld [vmem:[%s9343_s24 + $0x40] sm:$0xff] }
0x15cb   :  { %2667 = vrot.lane.b32.xlu1 %v2661_v0, %s9361_s5  ;;  %v8017_v63 = vadd.f32 0.5, %v2638_v9  ;;  %v6512_v0 = vpack.c.bf16 %v3185_v62, %v3184_v46  ;;  %v3189_v9 = vld [vmem:[%s9343_s24 + $0x48] sm:$0xff] }
0x15cd   :  { %v2647_v15 = vmul.f32 %v8017_v63, %v7932_v39 }
0x15cf   :  { %2671 = vrot.lane.b32.xlu1 %v2663_v11, %s9361_s5  ;;  %v3187_v11 = vld [vmem:[%s9343_s24 + $0x38] sm:$0xff] }
0x15d0   :  { %v6515_v47 = vpack.c.bf16 %v3187_v11, %v3186_v19 }
0x1619   :  { %v8011_v1 = vpop.permute.xlu1 %3386 }
0x161a   :  { %6265 = vmatmul.mubr.msk.f32.vlgmr.msra.gmra.mrb[32].mxu1 %vm872_vm6, %v8011_v1 }
0x161b   :  { %6299 = vmatprep.mubr.msk.f32.mxu1 %vm7141_vm3, %v9389_v6  ;;  %6507 = vmatpush3.bf16.msra.mxu1 %v6506_v40 }
0x161c   :  { %6508 = vmatprep.subr.bf16.mxu1 %v9387_v3 }
0x161f   :  { %6510 = vmatpush3.bf16.msra.mxu1 %v6509_v57 }
0x1620   :  { %6511 = vmatprep.subr.bf16.mxu1 %v9387_v3 }
0x1623   :  { %6513 = vmatpush3.bf16.msra.mxu1 %v6512_v0 }
0x1624   :  { %6514 = vmatprep.subr.bf16.mxu1 %v9387_v3 }
0x1627   :  { %6516 = vmatpush3.bf16.msra.mxu1 %v6515_v47 }
0x1628   :  { %6517 = vmatprep.subr.bf16.mxu1 %v9387_v3 }
0x1639   :  { %v2655_v24 = vpop.permute.xlu1 %2654 }
0x163a   :  { %v2662_v13 = vmul.f32 %v2655_v24, %v8017_v63  ;;  %v6518_v24 = vpack.c.bf16 %v3189_v9, %v3188_v55 }
0x163c   :  { %2669 = vrot.lane.b32.xlu0 %v2662_v13, %s9361_s5  ;;  %v3190_v13 = vld [vmem:[%s9343_s24 + $0x50] sm:$0xff]  ;;  %6519 = vmatpush3.bf16.msra.mxu1 %v6518_v24  ;;  %s9373_s5 = smov 9  }
0x163d   :  { %v2668_v5 = vpop.permute.xlu1 %2667  ;;  %6520 = vmatprep.subr.bf16.mxu1 %v9387_v3 }
0x163e   :  { %v8023_v33 = vadd.f32 %v2668_v5, %v2646_v22  ;;  %v3191_v22 = vld [vmem:[%s9343_s24 + $0x58] sm:$0xff] }
0x163f   :  { %v6521_v5 = vpack.c.bf16 %v3191_v22, %v3190_v13 }
0x1640   :  { %7054 = vtanh.f32 %v8023_v33 }
0x1641   :  { %v2672_v42 = vpop.permute.xlu1 %2671  ;;  %6522 = vmatpush3.bf16.msra.mxu1 %v6521_v5  ;;  %v3297_v5 = vld [vmem:[%s9417_s10 + $0x28] sm:$0xff] }
0x1642   :  { %v8028_v38 = vadd.f32 %v2672_v42, %v2648_v14  ;;  %v3192_v14 = vld [vmem:[%s9343_s24 + $0x60] sm:$0xff]  ;;  %v3193_v42 = vld [vmem:[%s9343_s24 + $0x68] sm:$0xff]  ;;  %6523 = vmatprep.subr.bf16.mxu1 %v9387_v3 }
0x1644   :  { %7056 = vtanh.f32 %v8028_v38 }
0x164a   :  { %v7055_v45 = vpop.eup %7054 }
0x164b   :  { %2685 = vrot.lane.b32.xlu0 %v7055_v45, %s7150_s0  ;;  %v6524_v45 = vpack.c.bf16 %v3193_v42, %v3192_v14  ;;  %v3299_v42 = vld [vmem:[%s9417_s10 + $0x38] sm:$0xff] }
0x164d   :  { %6525 = vmatpush3.bf16.msra.mxu1 %v6524_v45 }
0x164e   :  { %v7057_v51 = vpop.eup %7056  ;;  %6526 = vmatprep.subr.bf16.mxu1 %v9387_v3 }
0x164f   :  { %2689 = vrot.lane.b32.xlu0 %v7057_v51, %s7150_s0  ;;  %v3194_v51 = vld [vmem:[%s9343_s24 + $0x70] sm:$0xff]  ;;  %s9367_s24 = smov 64  }
0x1650   :  { %v6527_v54 = vpack.c.bf16 %v3195_v7, %v3194_v51  ;;  %v3301_v51 = vld [vmem:[%s9417_s10 + $0x48] sm:$0xff] }
0x1652   :  { %6528 = vmatpush3.bf16.msra.mxu1 %v6527_v54  ;;  %v3302_v54 = vld [vmem:[%s9417_s10 + $0x50] sm:$0xff] }
0x1653   :  { %6538 = vmatprep.subr.bf16.mxu1 %v9387_v3 }
0x16ae   :  { %v2670_v8 = vpop.permute.xlu0 %2669 }
0x16af   :  { %v8091_v46 = vadd.f32 %v2670_v8, %v2647_v15  ;;  %v3304_v8 = vld [vmem:[%s9417_s10 + $0x60] sm:$0xff] }
0x16b1   :  { %7058 = vtanh.f32 %v8091_v46 }
0x16bb   :  { %v7059_v62 = vpop.eup %7058 }
0x16bc   :  { %2687 = vrot.lane.b32.xlu1 %v7059_v62, %s7150_s0  ;;  %v3305_v62 = vld [vmem:[%s9417_s10 + $0x68] sm:$0xff] }
0x16bd   :  { %v2686_v19 = vpop.permute.xlu0 %2685 }
0x16be   :  { %v8096_v11 = vmul.f32 %v2686_v19, %v8002_v59  ;;  %v3460_v59 = vld [vmem:[%s9416_s4] sm:$0x3]  ;;  %v6497_v19 = vpack.c.bf16 %v3305_v62, %v3304_v8  ;;  %s7163_s4 = smov 40  }
0x16c0   :  { %2798 = vrot.lane.b32.xlu1 %v8096_v11, %s7151_s7 }
0x16c1   :  { %v2690_v47 = vpop.permute.xlu0 %2689 }
0x16c2   :  { %v8103_v39 = vmul.f32 %v2690_v47, %v8006_v50  ;;  %v3306_v47 = vld [vmem:[%s9417_s10 + $0x70] sm:$0xff] }
0x16c4   :  { %2960 = vrot.lane.b32.xlu1 %v7568_v2, %s9363_s3  ;;  %s9369_s3 = smov 27  }
0x16c8   :  { %2802 = vrot.lane.b32.xlu1 %v8103_v39, %s7151_s7 }
0x16cc   :  { %2969 = vrot.lane.b32.xlu1 %v7883_v35, %s9414_s20  ;;  %v3292_v35 = vld [vmem:[%s9417_s10] sm:$0xff] }
0x16d0   :  { %2976 = vrot.lane.b32.xlu1 %v7996_v10, %s9367_s24  ;;  %v3293_v10 = vld [vmem:[%s9417_s10 + $0x8] sm:$0xff]  ;;  %s9371_s24 = smov 18  }
0x16d1   :  { %v6479_v24 = vpack.c.bf16 %v3293_v10, %v3292_v35 }
0x16ed   :  { %v3456_v55 = vpop.f32.mrb[32].mxu1 }
0x16ee   :  { %v3461_v9 = vmul.f32 %v3460_v59, %v3456_v55  ;;  %v6266_v2 = vpop.f32.mrb[33].mxu1  ;;  %v3307_v59 = vld [vmem:[%s9417_s10 + $0x78] sm:$0xff]  ;;  %v7161_v55 = vmov 7  }
0x16ef   :  { %6881 = vset.pattern.permute.xlu1 %v7161_v55  ;;  %6882 = vset.pattern.permute.xlu0 %v7161_v55 }
0x16f0   :  { %6300 = vmatmul.mubr.f32.vlgmr.msra.gmra.mrb[34].mxu1 %v3461_v9  ;;  %v6500_v9 = vpack.c.bf16 %v3307_v59, %v3306_v47 }
0x16f1   :  { %6540 = vmatpush3.bf16.msra.mxu1 %v6506_v40  ;;  %6334 = vmatprep.mubr.msk.f32.mxu1 %vm7141_vm3, %v9389_v6 }
0x16f2   :  { %6541 = vmatprep.subr.bf16.mxu1 %v9387_v3 }
0x16f5   :  { %6543 = vmatpush3.bf16.msra.mxu1 %v6509_v57  ;;  %v3294_v57 = vld [vmem:[%s9417_s10 + $0x10] sm:$0xff] }
0x16f6   :  { %6544 = vmatprep.subr.bf16.mxu1 %v9387_v3 }
0x16f9   :  { %6546 = vmatpush3.bf16.msra.mxu1 %v6512_v0  ;;  %v3295_v0 = vld [vmem:[%s9417_s10 + $0x18] sm:$0xff] }
0x16fa   :  { %v6482_v22 = vpack.c.bf16 %v3295_v0, %v3294_v57 }
0x172e   :  { %v2688_v50 = vpop.permute.xlu1 %2687 }
0x172f   :  { %v8125_v40 = vmul.f32 %v2688_v50, %v8017_v63  ;;  %v3296_v63 = vld [vmem:[%s9417_s10 + $0x20] sm:$0xff] }
0x1730   :  { %v6485_v14 = vpack.c.bf16 %v3297_v5, %v3296_v63 }
0x1731   :  { %2800 = vrot.lane.b32.xlu0 %v8125_v40, %s7151_s7 }
0x1732   :  { %v2799_v13 = vpop.permute.xlu1 %2798 }
0x1733   :  { %6217 = vmatmul.mubr.msk.f32.vlgmr.msra.gmra.mrb[26].mxu0 %vm969_vm7, %v2799_v13 }
0x1734   :  { %6480 = vmatpush3.bf16.msra.mxu0 %v6479_v24  ;;  %6219 = vmatprep.mubr.msk.f32.mxu0 %vm7141_vm3, %v9389_v6 }
0x1735   :  { %2963 = vrot.lane.b32.xlu0 %v7645_v43, %s9365_s29  ;;  %6481 = vmatprep.subr.bf16.mxu0 %v9387_v3  ;;  %v3298_v43 = vld [vmem:[%s9417_s10 + $0x30] sm:$0xff]  ;;  %s9421_s29 = smov 96  }
0x1736   :  { %v6488_v45 = vpack.c.bf16 %v3299_v42, %v3298_v43  ;;  %v2961_v2 = vpop.permute.xlu1 %2960 }
0x1737   :  { %v2979_v50 = vsel %vm872_vm6, %v7518_v53, %v2961_v2 }
0x1738   :  { %6483 = vmatpush3.bf16.msra.mxu0 %v6482_v22 }
0x1739   :  { %2966 = vrot.lane.b32.xlu0 %v7787_v32, %s9381_s6  ;;  %6484 = vmatprep.subr.bf16.mxu0 %v9387_v3  ;;  %v3300_v32 = vld [vmem:[%s9417_s10 + $0x40] sm:$0xff] }
0x173a   :  { %v6491_v7 = vpack.c.bf16 %v3301_v51, %v3300_v32  ;;  %v2803_v10 = vpop.permute.xlu1 %2802  ;;  %v3286_v32 = vld [vmem:[%s9346_s27] sm:$0xff]  ;;  %v3287_v51 = vld [vmem:[%s9346_s27 + $0x8] sm:$0xff] }
0x173c   :  { %6486 = vmatpush3.bf16.msra.mxu0 %v6485_v14 }
0x173d   :  { %2972 = vrot.lane.b32.xlu0 %v7960_v60, %s7160_s2  ;;  %6487 = vmatprep.subr.bf16.mxu0 %v9387_v3  ;;  %v3303_v60 = vld [vmem:[%s9417_s10 + $0x58] sm:$0xff]  ;;  %s7162_s10 = smov 24   ;;  %s7166_s2 = smov 20  }
0x173e   :  { %v6494_v15 = vpack.c.bf16 %v3303_v60, %v3302_v54  ;;  %v2970_v0 = vpop.permute.xlu1 %2969  ;;  %v3290_v54 = vld [vmem:[%s9346_s27 + $0x20] sm:$0xff]  ;;  %v3291_v60 = vld [vmem:[%s9346_s27 + $0x28] sm:$0xff] }
0x173f   :  { %v6536_v8 = vpack.c.bf16 %v3291_v60, %v3290_v54 }
0x1740   :  { %6489 = vmatpush3.bf16.msra.mxu0 %v6488_v45 }
0x1741   :  { %6490 = vmatprep.subr.bf16.mxu0 %v9387_v3 }
0x1742   :  { %v2977_v14 = vpop.permute.xlu1 %2976 }
0x1744   :  { %6492 = vmatpush3.bf16.msra.mxu0 %v6491_v7 }
0x1745   :  { %6493 = vmatprep.subr.bf16.mxu0 %v9387_v3 }
0x1748   :  { %6495 = vmatpush3.bf16.msra.mxu0 %v6494_v15 }
0x1749   :  { %6496 = vmatprep.subr.bf16.mxu0 %v9387_v3 }
0x174c   :  { %6498 = vmatpush3.bf16.msra.mxu0 %v6497_v19 }
0x174d   :  { %6499 = vmatprep.subr.bf16.mxu0 %v9387_v3 }
0x1750   :  { %6501 = vmatpush3.bf16.msra.mxu0 %v6500_v9 }
0x1751   :  { %6529 = vmatprep.subr.bf16.mxu0 %v9387_v3 }
0x17a3   :  { %v2801_v35 = vpop.permute.xlu0 %2800 }
0x17a4   :  { %6220 = vmatmul.mubr.msk.f32.gmra.mrb[28].mxu0 %vm969_vm7, %v2801_v35 }
0x17a5   :  { %6222 = vmatprep.mubr.msk.f32.mxu0 %vm7141_vm3, %v9389_v6 }
0x17a7   :  { %v2964_v24 = vpop.permute.xlu0 %2963 }
0x17a8   :  { %v2981_v57 = vsel %vm2980_vm8, %v2979_v50, %v2964_v24  ;;  %6223 = vmatmul.mubr.msk.f32.gmra.mrb[30].mxu0 %vm969_vm7, %v2803_v10 }
0x17a9   :  { %6257 = vmatprep.mubr.msk.f32.mxu0 %vm7141_vm3, %v9389_v6  ;;  %v2983_v13 = vsel %vm2982_vm9, %v2981_v57, %v7716_v36  ;;  %v7109_v57 = vld [vmem:[%s9412_s1] ss:$0 sm:$0xff]  ;;  %s7174_s1 = smov 72  }
0x17ab   :  { %v2967_v22 = vpop.permute.xlu0 %2966 }
0x17ac   :  { %v2985_v63 = vsel %vm2984_vm10, %v2983_v13, %v2967_v22 }
0x17ad   :  { %v2987_v53 = vsel %vm2986_vm11, %v2985_v63, %v2970_v0  ;;  %vm3059_vm11 = vcmask 97280  }
0x17af   :  { %v2973_v5 = vpop.permute.xlu0 %2972 }
0x17b0   :  { %v2989_v43 = vsel %vm2988_vm12, %v2987_v53, %v2973_v5 }
0x17b1   :  { %v2991_v42 = vsel %vm2990_vm13, %v2989_v43, %v2977_v14  ;;  %vm3066_vm13 = vcmask 162816  }
0x17b2   :  { %6258 = vmatmul.mubr.f32.vlgmr.msra.gmra.mrb[32].mxu0 %v2991_v42 }
0x17b3   :  { %6314 = vmatprep.mubr.msk.f32.mxu0 %vm7141_vm3, %v9389_v6 }
0x17c3   :  { %v3528_v45 = vpop.f32.mrb[34].mxu1 }
0x17c4   :  { %3536 = vrot.lane.b32.xlu1 %v3528_v45, %s9381_s6  ;;  %3533 = vrot.lane.b32.xlu0 %v3528_v45, %s7150_s0  ;;  %v6301_v36 = vpop.f32.mrb[35].mxu1 }
0x17c8   :  { %3542 = vrot.lane.b32.xlu1 %v3528_v45, %s9414_s20  ;;  %3539 = vrot.lane.b32.xlu0 %v3528_v45, %s7162_s10  ;;  %s7164_s10 = smov 124  }
0x17cc   :  { %855 = vperm.xlu1 %6881, %v7879_v31   ;;  %3545 = vrot.lane.b32.xlu0 %v3528_v45, %s7163_s4  ;;  %v6530_v31 = vpack.c.bf16 %v3287_v51, %v3286_v32  ;;  %v5675_v51 = vld [vmem:[%s9418_s12] ss:$0 sm:$0xff]  ;;  %s9385_s12 = smov 119  }
0x17ce   :  { %6531 = vmatpush3.bf16.msra.mxu0 %v6530_v31 }
0x17cf   :  { %6532 = vmatprep.subr.bf16.mxu0 %v9387_v3 }
0x17d0   :  { %859 = vperm.xlu0 %6882, %v7893_v61   ;;  %863 = vperm.xlu1 %6881, %v7902_v44   ;;  %v3288_v61 = vld [vmem:[%s9346_s27 + $0x10] sm:$0xff] }
0x17d4   :  { %6883 = vset.pattern.permute.xlu1 %v7145_v30  ;;  %6884 = vset.pattern.permute.xlu0 %v7145_v30  ;;  %v3289_v30 = vld [vmem:[%s9346_s27 + $0x18] sm:$0xff]  ;;  %s7170_s27 = smov 110  }
0x17d5   :  { %v6533_v44 = vpack.c.bf16 %v3289_v30, %v3288_v61 }
0x17d7   :  { %6534 = vmatpush3.bf16.msra.mxu0 %v6533_v44 }
0x17d8   :  { %6535 = vmatprep.subr.bf16.mxu0 %v9387_v3 }
0x17db   :  { %6537 = vmatpush3.bf16.msra.mxu0 %v6536_v8 }
0x17dc   :  { %6317 = vmatprep.subr.mxu0 %v9389_v6 }
0x1806   :  { %v2876_v7 = vpop.f32.mrb[26].mxu0 }
0x1807   :  { %v6218_v15 = vpop.f32.mrb[27].mxu0 }
0x1836   :  { %v3537_v62 = vpop.permute.xlu1 %3536  ;;  %v3534_v35 = vpop.permute.xlu0 %3533 }
0x1837   :  { %v3548_v32 = vsel %vm3055_vm14, %v3528_v45, %v3534_v35 }
0x1838   :  { %v3549_v61 = vsel %vm872_vm6, %v3548_v32, %v3537_v62 }
0x183a   :  { %v3543_v19 = vpop.permute.xlu1 %3542  ;;  %v3540_v10 = vpop.permute.xlu0 %3539 }
0x183b   :  { %v3550_v30 = vsel %vm3070_vm15, %v3549_v61, %v3540_v10 }
0x183c   :  { %v3551_v45 = vsel %vm2980_vm8, %v3550_v30, %v3543_v19 }
0x183e   :  { %v3546_v50 = vpop.permute.xlu0 %3545 }
0x183f   :  { %v3553_v8 = vsel %vm3552_vm0, %v3551_v45, %v3546_v50  ;;  %vm3074_vm0 = vcmask 228352  }
0x184b   :  { %v856_v47 = vpop.permute.xlu1 %855 }
0x184c   :  { %v866_v59 = vmul.f32 %v7816_v48, %v856_v47  ;;  %v7110_v48 = vld [vmem:[%s9413_s9] ss:$0 sm:$0xff]  ;;  %s9419_s9 = smov 4  }
0x184e   :  { %v869_v55 = vadd.f32 %v7822_v49, %v866_v59 }
0x184f   :  { %v860_v24 = vpop.permute.xlu0 %859  ;;  %v864_v13 = vpop.permute.xlu1 %863 }
0x1850   :  { %v2890_v9 = vadd.f32 %v2876_v7, %v869_v55  ;;  %v867_v0 = vmul.f32 %v7109_v57, %v860_v24  ;;  %v868_v22 = vmul.f32 %v7109_v57, %v864_v13 }
0x1852   :  { %7060 = vtanh.f32 %v2890_v9  ;;  %v870_v49 = vadd.f32 %v7110_v48, %v867_v0  ;;  %v871_v14 = vadd.f32 %v7110_v48, %v868_v22  ;;  %v2893_v47 = vmul.f32 0.5, %v2890_v9 }
0x185c   :  { %v7061_v2 = vpop.eup %7060 }
0x185d   :  { %2914 = vrot.lane.b32.xlu1 %v7061_v2, %s7147_s30 }
0x1877   :  { %v2881_v63 = vpop.f32.mrb[28].mxu0 }
0x1878   :  { %v2891_v53 = vadd.f32 %v2881_v63, %v870_v49  ;;  %v6221_v5 = vpop.f32.mrb[29].mxu0 }
0x187a   :  { %7062 = vtanh.f32 %v2891_v53  ;;  %v2894_v10 = vmul.f32 0.5, %v2891_v53 }
0x187b   :  { %v2886_v43 = vpop.f32.mrb[30].mxu0 }
0x187c   :  { %v2892_v42 = vadd.f32 %v2886_v43, %v871_v14  ;;  %v6224_v36 = vpop.f32.mrb[31].mxu0 }
0x187e   :  { %7064 = vtanh.f32 %v2892_v42  ;;  %v2895_v50 = vmul.f32 0.5, %v2892_v42 }
0x187f   :  { %7066 = vtanh.f32 %v2893_v47 }
0x1880   :  { %7068 = vtanh.f32 %v2894_v10 }
0x1881   :  { %7070 = vtanh.f32 %v2895_v50 }
0x1884   :  { %v7063_v31 = vpop.eup %7062 }
0x1885   :  { %2916 = vrot.lane.b32.xlu0 %v7063_v31, %s7147_s30  ;;  %v3381_v44 = vpop.f32.mrb[32].mxu0 }
0x1886   :  { %v8248_v7 = vadd.f32 %v5675_v51, %v3381_v44  ;;  %v6259_v54 = vpop.f32.mrb[33].mxu0 }
0x1888   :  { %v7065_v60 = vpop.eup %7064  ;;  %v3385_v15 = vmax.f32 %v8248_v7, 0.0  ;;  %v3217_v7 = vld [vmem:[%s9344_s25 + $0xa8] sm:$0xff] }
0x1889   :  { %2918 = vrot.lane.b32.xlu1 %v7065_v60, %s7147_s30  ;;  %v7067_v59 = vpop.eup %7066 }
0x188a   :  { %v3554_v62 = vmul.f32 %v3553_v8, %v3385_v15  ;;  %v2899_v55 = vmul.f32 0.5, %v7067_v59  ;;  %v7069_v24 = vpop.eup %7068 }
0x188b   :  { %v2900_v57 = vmul.f32 0.5, %v7069_v24  ;;  %v7071_v0 = vpop.eup %7070 }
0x188c   :  { %6315 = vmatmul.mubr.msk.f32.vlgmr.msra.gmra.mrb[34].mxu0 %vm2982_vm9, %v3554_v62  ;;  %v2902_v2 = vadd.f32 0.5, %v2899_v55  ;;  %v2901_v13 = vmul.f32 0.5, %v7071_v0 }
0x188d   :  { %6319 = vmatprep.mubr.msk.f32.mxu0 %vm7141_vm3, %v9389_v6  ;;  %v2903_v22 = vadd.f32 0.5, %v2900_v57  ;;  %6318 = vmatpush3.msk.msra.mxu0 %vm3644_vm2, %v7989_v18  ;;  %vm4103_vm2 = vcmask 146432  }
0x188e   :  { %v2904_v9 = vadd.f32 0.5, %v2901_v13  ;;  %v2908_v14 = vmul.f32 %v2902_v2, %v8023_v33 }
0x188f   :  { %v2909_v31 = vmul.f32 %v2903_v22, %v8091_v46 }
0x1890   :  { %v2910_v44 = vmul.f32 %v2904_v9, %v8028_v38 }
0x18cf   :  { %v2915_v35 = vpop.permute.xlu1 %2914 }
0x18d0   :  { %v2923_v19 = vmul.f32 %v2915_v35, %v2902_v2 }
0x18d2   :  { %2929 = vrot.lane.b32.xlu0 %v2923_v19, %s9419_s9 }
0x18f7   :  { %v2917_v48 = vpop.permute.xlu0 %2916 }
0x18f8   :  { %v2924_v49 = vmul.f32 %v2917_v48, %v2903_v22  ;;  %v3157_v48 = vld [vmem:[%s9341_s22 + $0x30] sm:$0xff] }
0x18fa   :  { %2931 = vrot.lane.b32.xlu1 %v2924_v49, %s9419_s9 }
0x18fb   :  { %v2919_v63 = vpop.permute.xlu1 %2918 }
0x18fc   :  { %v2925_v5 = vmul.f32 %v2919_v63, %v2904_v9 }
0x18fe   :  { %2933 = vrot.lane.b32.xlu0 %v2925_v5, %s9419_s9 }
0x1944   :  { %v2930_v53 = vpop.permute.xlu0 %2929 }
0x1945   :  { %v2938_v43 = vadd.f32 %v2930_v53, %v2908_v14 }
0x1947   :  { %7072 = vtanh.f32 %v2938_v43 }
0x1951   :  { %v7073_v42 = vpop.eup %7072 }
0x1952   :  { %2947 = vrot.lane.b32.xlu0 %v7073_v42, %s7150_s0 }
0x195f   :  { %v3624_v36 = vpop.f32.mrb[34].mxu0 }
0x1960   :  { %v6316_v32 = vpop.f32.mrb[35].mxu0  ;;  %v3629_v51 = vsel %vm3628_vm1, %v3624_v36, -inf }
0x1961   :  { %3630 = vmax.xlane.f32.xlu1 %v3629_v51  ;;  %v3151_v51 = vld [vmem:[%s9341_s22] sm:$0xff] }
0x196c   :  { %v2932_v61 = vpop.permute.xlu1 %2931 }
0x196d   :  { %v2939_v30 = vadd.f32 %v2932_v61, %v2909_v31  ;;  %v3156_v31 = vld [vmem:[%s9341_s22 + $0x28] sm:$0xff] }
0x196f   :  { %7074 = vtanh.f32 %v2939_v30 }
0x1970   :  { %v2934_v33 = vpop.permute.xlu0 %2933 }
0x1971   :  { %v2940_v54 = vadd.f32 %v2934_v33, %v2910_v44 }
0x1973   :  { %7076 = vtanh.f32 %v2940_v54 }
0x1979   :  { %v7075_v60 = vpop.eup %7074 }
0x197a   :  { %2949 = vrot.lane.b32.xlu0 %v7075_v60, %s7150_s0 }
0x197d   :  { %v7077_v45 = vpop.eup %7076 }
0x197e   :  { %2951 = vrot.lane.b32.xlu0 %v7077_v45, %s7150_s0  ;;  %v8319_v45 = vpack.c.bf16 %v3156_v31, %v3151_v51 }
0x19c4   :  { %v2948_v8 = vpop.permute.xlu0 %2947 }
0x19c5   :  { %v8268_v62 = vmul.f32 %v2948_v8, %v2902_v2 }
0x19c7   :  { %3110 = vrot.lane.b32.xlu1 %v8268_v62, %s7151_s7  ;;  %v3117_v46 = vrot.slane %v8268_v62, 4  ;;  %s7165_s7 = smov 12   ;;  %v3113_v0 = vrot.slane %v8268_v62, 2  ;;  %v3121_v42 = vrot.slane %v8268_v62, 6 }
0x19cb   :  { %3118 = vrot.lane.b32.xlu1 %v3117_v46, %s7164_s10 }
0x19ec   :  { %v2950_v38 = vpop.permute.xlu0 %2949 }
0x19ed   :  { %v8274_v47 = vmul.f32 %v2950_v38, %v2903_v22  ;;  %v3152_v22 = vld [vmem:[%s9341_s22 + $0x8] sm:$0xff] }
0x19ee   :  { %v3631_v59 = vpop.xlane.xlu1 %3630  ;;  %v8298_v49 = vpack.c.bf16 %v3157_v48, %v3152_v22  ;;  %v5684_v22 = vld [vmem:[%s9333_s14 + $0x2] sm:$0x3] }
0x19ef   :  { %v3632_v55 = vsub.f32 %v3624_v36, %v3631_v59  ;;  %3123 = vrot.lane.b32.xlu1 %v8274_v47, %s9419_s9  ;;  %v3126_v2 = vrot.slane %v8274_v47, 2  ;;  %v3130_v19 = vrot.slane %v8274_v47, 4  ;;  %v3134_v13 = vrot.slane %v8274_v47, 6 }
0x19f0   :  { %v2952_v10 = vpop.permute.xlu0 %2951  ;;  %6548 = vmatprep.subr.bf16.mxu0 %v8298_v49 }
0x19f1   :  { %v3633_v35 = vmul.f32 1.442695, %v3632_v55  ;;  %v8282_v50 = vmul.f32 %v2952_v10, %v2904_v9 }
0x19f3   :  { %7078 = vpow2.f32 %v3633_v35  ;;  %3127 = vrot.lane.b32.xlu1 %v3126_v2, %s7150_s0 }
0x19f7   :  { %3131 = vrot.lane.b32.xlu1 %v3130_v19, %s7165_s7 }
0x19fb   :  { %3138 = vrot.lane.b32.xlu1 %v8282_v50, %s7166_s2 }
0x19fd   :  { %v7079_v24 = vpop.eup %7078 }
0x19fe   :  { %v3635_v57 = vsel %vm3628_vm1, %v7079_v24, 0.0  ;;  %vm3640_vm1 = vcmask 48128  }
0x19ff   :  { %3004 = vrot.lane.b32.xlu1 %v7693_v17, %s7164_s10  ;;  %3636 = vadd.xlane.f32.xlu0 %v3635_v57 }
0x1a15   :  { %3114 = vrot.lane.b32.xlu0 %v3113_v0, %s7147_s30 }
0x1a19   :  { %3135 = vrot.lane.b32.xlu0 %v3134_v13, %s9381_s6 }
0x1a1d   :  { %2995 = vrot.lane.b32.xlu0 %v7622_v28, %s7147_s30 }
0x1a39   :  { %v3111_v17 = vpop.permute.xlu1 %3110 }
0x1a3d   :  { %v3119_v9 = vpop.permute.xlu1 %3118 }
0x1a61   :  { %v3124_v63 = vpop.permute.xlu1 %3123 }
0x1a65   :  { %v3128_v5 = vpop.permute.xlu1 %3127 }
0x1a69   :  { %v3132_v43 = vpop.permute.xlu1 %3131 }
0x1a6d   :  { %v3139_v54 = vpop.permute.xlu1 %3138 }
0x1a8c   :  { %v3637_v14 = vpop.xlane.xlu0 %3636 }
0x1a8d   :  { %7080 = vrcp.f32 %v3637_v14  ;;  %v5685_v14 = vld [vmem:[%s9333_s14 + $0x4] sm:$0x3] }
0x1a90   :  { %v3115_v53 = vpop.permute.xlu0 %3114 }
0x1a91   :  { %v3141_v36 = vsel %vm969_vm7, %v3111_v17, %v3115_v53 }
0x1a92   :  { %v3142_v18 = vsel %vm3055_vm14, %v3141_v36, %v3119_v9 }
0x1a93   :  { %v3143_v32 = vsel %vm3059_vm11, %v3142_v18, %v3121_v42 }
0x1a94   :  { %v3144_v28 = vsel %vm872_vm6, %v3143_v32, %v3124_v63  ;;  %v3136_v30 = vpop.permute.xlu0 %3135 }
0x1a95   :  { %v3145_v61 = vsel %vm3066_vm13, %v3144_v28, %v3128_v5 }
0x1a96   :  { %v3146_v44 = vsel %vm3070_vm15, %v3145_v61, %v3132_v43 }
0x1a97   :  { %v7081_v33 = vpop.eup %7080  ;;  %v3147_v60 = vsel %vm3074_vm0, %v3146_v44, %v3136_v30 }
0x1a98   :  { %v8322_v8 = vsel %vm2980_vm8, %v3147_v60, %v3139_v54  ;;  %v3639_v46 = vmul.f32 %v7081_v33, %v7079_v24  ;;  %v4125_v24 = vld [vmem:[%s9333_s14] sm:$0x3] }
0x1a99   :  { %4107 = vrot.lane.b32.xlu1 %v8322_v8, %s9385_s12  ;;  %4093 = vrot.lane.b32.xlu0 %v8322_v8, %s9373_s5  ;;  %s7180_s5 = smov 76  }
0x1a9a   :  { %6320 = vmatmul.mubr.msk.f32.vlgmr.msra.gmra.mrb[36].mxu0 %vm3640_vm1, %v3639_v46  ;;  %vm4105_vm1 = vcmask 220160  }
0x1a9b   :  { %6550 = vmatpush1.bf16.msra.mxu0 %v8319_v45  ;;  %3856 = vmatprep.mubr.f32.mxu0 %v9389_v6 }
0x1a9c   :  { %6337 = vmatprep.subr.mxu0 %v9389_v6 }
0x1a9d   :  { %3013 = vrot.lane.b32.xlu1 %v7855_v16, %s9419_s9  ;;  %4096 = vrot.lane.b32.xlu0 %v8322_v8, %s9371_s24  ;;  %s9424_s24 = smov 36  }
0x1a9e   :  { %5681 = vmatmul.mubr.msk.f32.vlgmr.msra.gmra.mrb[38].mxu0 %vm872_vm6, %v8011_v1 }
0x1a9f   :  { %6338 = vmatpush3.msra.mxu0 %v3151_v51  ;;  %6339 = vmatprep.mubr.msk.f32.mxu0 %vm7141_vm3, %v9389_v6 }
0x1aa0   :  { %6551 = vmatprep.subr.bf16.mxu0 %v9387_v3 }
0x1aa1   :  { %4113 = vrot.lane.b32.xlu1 %v8322_v8, %s7170_s27  ;;  %4099 = vrot.lane.b32.xlu0 %v8322_v8, %s9369_s3  ;;  %s9383_s3 = smov 36  }
0x1aa5   :  { %2997 = vrot.lane.b32.xlu1 %v7631_v37, %s7147_s30  ;;  %3022 = vrot.lane.b32.xlu0 %v7941_v56, %s7150_s0  ;;  %v3212_v37 = vld [vmem:[%s9344_s25 + $0x80] sm:$0xff]  ;;  %v3005_v56 = vpop.permute.xlu1 %3004 }
0x1aa9   :  { %4119 = vrot.lane.b32.xlu1 %v8322_v8, %s7172_s8  ;;  %3031 = vrot.lane.b32.xlu0 %v8096_v11, %s7165_s7 }
0x1aad   :  { %3043 = vrot.lane.b32.xlu1 %v8268_v62, %s9381_s6  ;;  %3006 = vrot.lane.b32.xlu0 %v7702_v26, %s7164_s10  ;;  %v3213_v26 = vld [vmem:[%s9344_s25 + $0x88] sm:$0xff] }
0x1aae   :  { %v8370_v16 = vpack.c.bf16 %v3213_v26, %v3212_v37 }
0x1ab0   :  { %6576 = vmatprep.subr.bf16.mxu1 %v8370_v16 }
0x1ab1   :  { %3024 = vrot.lane.b32.xlu1 %v7947_v20, %s7150_s0  ;;  %3015 = vrot.lane.b32.xlu0 %v7864_v52, %s9419_s9  ;;  %v2996_v52 = vpop.permute.xlu0 %2995 }
0x1ab5   :  { %3045 = vrot.lane.b32.xlu1 %v8274_v47, %s9381_s6  ;;  %3033 = vrot.lane.b32.xlu0 %v8125_v40, %s7165_s7  ;;  %v3052_v47 = vsel %vm969_vm7, %v7553_v58, %v2996_v52 }
0x1ab6   :  { %v3056_v58 = vsel %vm3055_vm14, %v3052_v47, %v3005_v56 }
0x1ab7   :  { %v3060_v5 = vsel %vm3059_vm11, %v3056_v58, %v7764_v12  ;;  %v5686_v12 = vld [vmem:[%s9333_s14 + $0x6] sm:$0x3]  ;;  %s9420_s14 = smov 64   ;;  %v3198_v58 = vld [vmem:[%s9344_s25 + $0x10] sm:$0xff] }
0x1b0b   :  { %v4094_v20 = vpop.permute.xlu0 %4093  ;;  %v4108_v1 = vpop.permute.xlu1 %4107 }
0x1b0c   :  { %v4110_v59 = vsel %vm107_vm4, %v4108_v1, %v8322_v8  ;;  %v4102_v55 = vsel %vm107_vm4, %v8322_v8, %v4094_v20 }
0x1b0d   :  { %v4111_v0 = vsel %vm4103_vm2, %v4110_v59, %v4094_v20 }
0x1b0f   :  { %v4097_v11 = vpop.permute.xlu0 %4096  ;;  %v3014_v62 = vpop.permute.xlu1 %3013 }
0x1b10   :  { %v4104_v2 = vsel %vm4103_vm2, %v4102_v55, %v4097_v11  ;;  %v8395_v48 = vsel %vm4105_vm1, %v4111_v0, %v4097_v11  ;;  %v3063_v36 = vsel %vm872_vm6, %v3060_v5, %v3014_v62  ;;  %v3199_v0 = vld [vmem:[%s9344_s25 + $0x18] sm:$0xff]  ;;  %v3200_v5 = vld [vmem:[%s9344_s25 + $0x20] sm:$0xff] }
0x1b11   :  { %v4129_v42 = vmul.f32 %v5684_v22, %v8395_v48  ;;  %v3216_v22 = vld [vmem:[%s9344_s25 + $0xa0] sm:$0xff] }
0x1b13   :  { %v4100_v38 = vpop.permute.xlu0 %4099  ;;  %v4114_v40 = vpop.permute.xlu1 %4113 }
0x1b14   :  { %v4116_v35 = vsel %vm107_vm4, %v4114_v40, %v4108_v1  ;;  %v8385_v57 = vsel %vm4105_vm1, %v4104_v2, %v4100_v38 }
0x1b15   :  { %v4117_v13 = vsel %vm4103_vm2, %v4116_v35, %v8322_v8  ;;  %v4126_v17 = vmul.f32 %v4125_v24, %v8385_v57 }
0x1b16   :  { %v8404_v53 = vsel %vm4105_vm1, %v4117_v13, %v4094_v20 }
0x1b17   :  { %v3023_v19 = vpop.permute.xlu0 %3022  ;;  %v2998_v10 = vpop.permute.xlu1 %2997  ;;  %v4130_v51 = vadd.f32 %v4129_v42, %v4126_v17  ;;  %v4133_v31 = vmul.f32 %v5685_v14, %v8404_v53  ;;  %v8514_v17 = vpack.c.bf16 %v3199_v0, %v3198_v58  ;;  %v3201_v14 = vld [vmem:[%s9344_s25 + $0x28] sm:$0xff]  ;;  %v3218_v42 = vld [vmem:[%s9344_s25 + $0xb0] sm:$0xff] }
0x1b18   :  { %v3067_v32 = vsel %vm3066_vm13, %v3063_v36, %v3023_v19  ;;  %v3053_v61 = vsel %vm969_vm7, %v7572_v4, %v2998_v10  ;;  %v3219_v36 = vld [vmem:[%s9344_s25 + $0xb8] sm:$0xff] }
0x1b19   :  { %v4134_v26 = vadd.f32 %v4133_v31, %v4130_v51  ;;  %v3203_v51 = vld [vmem:[%s9344_s25 + $0x38] sm:$0xff]  ;;  %v3220_v31 = vld [vmem:[%s9344_s25 + $0xc0] sm:$0xff] }
0x1b1b   :  { %v3032_v9 = vpop.permute.xlu0 %3031  ;;  %v4120_v63 = vpop.permute.xlu1 %4119 }
0x1b1c   :  { %v4122_v43 = vsel %vm107_vm4, %v4120_v63, %v4114_v40  ;;  %v3071_v30 = vsel %vm3070_vm15, %v3067_v32, %v3032_v9  ;;  %v8517_v63 = vpack.c.bf16 %v3217_v7, %v3216_v22  ;;  %v8535_v32 = vpack.c.bf16 %v3219_v36, %v3218_v42 }
0x1b1d   :  { %v4123_v18 = vsel %vm4103_vm2, %v4122_v43, %v4108_v1 }
0x1b1e   :  { %v8416_v28 = vsel %vm4105_vm1, %v4123_v18, %v8322_v8  ;;  %v8532_v18 = vpack.c.bf16 %v3201_v14, %v3200_v5 }
0x1b1f   :  { %v3007_v44 = vpop.permute.xlu0 %3006  ;;  %v3044_v33 = vpop.permute.xlu1 %3043  ;;  %v4137_v46 = vmul.f32 %v5686_v12, %v8416_v28  ;;  %v3202_v12 = vld [vmem:[%s9344_s25 + $0x30] sm:$0xff] }
0x1b20   :  { %v3057_v54 = vsel %vm3055_vm14, %v3053_v61, %v3007_v44  ;;  %v8424_v60 = vsel %vm3074_vm0, %v3071_v30, %v3044_v33  ;;  %v3221_v61 = vld [vmem:[%s9344_s25 + $0xc8] sm:$0xff]  ;;  %v8550_v30 = vpack.c.bf16 %v3203_v51, %v3202_v12  ;;  %v3204_v33 = vld [vmem:[%s9344_s25 + $0x40] sm:$0xff] }
0x1b21   :  { %v3079_v8 = vrot.slane %v8424_v60, 2  ;;  %v3083_v37 = vrot.slane %v8424_v60, 4  ;;  %v3061_v4 = vsel %vm3059_vm11, %v3057_v54, %v7773_v23  ;;  %v8434_v1 = vadd.f32 %v4137_v46, %v4134_v26  ;;  %v3205_v54 = vld [vmem:[%s9344_s25 + $0x48] sm:$0xff]  ;;  %v3222_v46 = vld [vmem:[%s9344_s25 + $0xd0] sm:$0xff] }
0x1b22   :  { %v3087_v11 = vrot.slane %v8424_v60, 6  ;;  %v8553_v44 = vpack.c.bf16 %v3221_v61, %v3220_v31 }
0x1b23   :  { %v3016_v56 = vpop.permute.xlu0 %3015  ;;  %3084 = vrot.lane.b32.xlu1 %v3083_v37, %s9420_s14  ;;  %3080 = vrot.lane.b32.xlu0 %v3079_v8, %s9414_s20  ;;  %v3025_v52 = vpop.permute.xlu1 %3024  ;;  %v3223_v8 = vld [vmem:[%s9344_s25 + $0xd8] sm:$0xff]  ;;  %v8568_v37 = vpack.c.bf16 %v3205_v54, %v3204_v33 }
0x1b24   :  { %v3064_v20 = vsel %vm872_vm6, %v3061_v4, %v3016_v56  ;;  %v8571_v26 = vpack.c.bf16 %v3223_v8, %v3222_v46  ;;  %v3206_v56 = vld [vmem:[%s9344_s25 + $0x50] sm:$0xff]  ;;  %v3207_v4 = vld [vmem:[%s9344_s25 + $0x58] sm:$0xff] }
0x1b25   :  { %v3068_v62 = vsel %vm3066_vm13, %v3064_v20, %v3025_v52  ;;  %v3224_v52 = vld [vmem:[%s9344_s25 + $0xe0] sm:$0xff]  ;;  %v3225_v20 = vld [vmem:[%s9344_s25 + $0xe8] sm:$0xff] }
0x1b27   :  { %v3034_v38 = vpop.permute.xlu0 %3033  ;;  %4154 = vrot.lane.b32.xlu1 %v8434_v1, %s9383_s3  ;;  %3088 = vrot.lane.b32.xlu0 %v3087_v11, %s9421_s29  ;;  %v3046_v23 = vpop.permute.xlu1 %3045  ;;  %s9422_s3 = sld [smem:[#allocation18_spill]]  ;;  %v8586_v11 = vpack.c.bf16 %v3207_v4, %v3206_v56 }
0x1b28   :  { %v3072_v40 = vsel %vm3070_vm15, %v3068_v62, %v3034_v38  ;;  %v8589_v62 = vpack.c.bf16 %v3225_v20, %v3224_v52  ;;  %v3208_v38 = vld [vmem:[%s9344_s25 + $0x60] sm:$0xff] }
0x1b29   :  { %v8443_v47 = vsel %vm3074_vm0, %v3072_v40, %v3046_v23  ;;  %v3209_v23 = vld [vmem:[%s9344_s25 + $0x68] sm:$0xff]  ;;  %v3226_v40 = vld [vmem:[%s9344_s25 + $0xf0] sm:$0xff] }
0x1b2a   :  { %v3092_v59 = vrot.slane %v8443_v47, 2  ;;  %v3096_v55 = vrot.slane %v8443_v47, 4  ;;  %v3100_v35 = vrot.slane %v8443_v47, 6 }
0x1b2b   :  { %4171 = vrot.lane.b32.xlu1 %v8434_v1, %s7174_s1 }
0x1b2c   :  { %3093 = vrot.lane.b32.xlu0 %v3092_v59, %s9414_s20  ;;  %s9377_s20 = smov 88   ;;  %v3227_v59 = vld [vmem:[%s9344_s25 + $0xf8] sm:$0xff] }
0x1b2f   :  { %2999 = vrot.lane.b32.xlu1 %v7635_v41, %s7147_s30  ;;  %s9375_s30 = smov 52   ;;  %v3196_v41 = vld [vmem:[%s9344_s25] sm:$0xff] }
0x1b30   :  { %3097 = vrot.lane.b32.xlu0 %v3096_v55, %s9420_s14  ;;  %v8604_v55 = vpack.c.bf16 %v3209_v23, %v3208_v38  ;;  %s7178_s14 = smov 92  }
0x1b33   :  { %4188 = vrot.lane.b32.xlu1 %v8434_v1, %s9379_s21  ;;  %s7185_s21 = smov 38  }
0x1b34   :  { %3101 = vrot.lane.b32.xlu0 %v3100_v35, %s9421_s29  ;;  %v8607_v35 = vpack.c.bf16 %v3227_v59, %v3226_v40  ;;  %s7179_s29 = smov 56  }
0x1b37   :  { %4211 = vrot.lane.b32.xlu1 %v8434_v1, %s9381_s6 }
0x1b38   :  { %3008 = vrot.lane.b32.xlu0 %v7706_v27, %s7164_s10  ;;  %v3197_v27 = vld [vmem:[%s9344_s25 + $0x8] sm:$0xff] }
0x1b39   :  { %v8492_v2 = vpack.c.bf16 %v3197_v27, %v3196_v41  ;;  %v3210_v41 = vld [vmem:[%s9344_s25 + $0x70] sm:$0xff]  ;;  %v3211_v27 = vld [vmem:[%s9344_s25 + $0x78] sm:$0xff] }
0x1b3b   :  { %3026 = vrot.lane.b32.xlu1 %v7951_v21, %s7150_s0  ;;  %v3215_v21 = vld [vmem:[%s9344_s25 + $0x98] sm:$0xff]  ;;  %s7186_s0 = smov 47  }
0x1b3c   :  { %3017 = vrot.lane.b32.xlu0 %v7868_v29, %s9419_s9  ;;  %v3214_v29 = vld [vmem:[%s9344_s25 + $0x90] sm:$0xff] }
0x1b3d   :  { %v8496_v24 = vpack.c.bf16 %v3215_v21, %v3214_v29  ;;  %v8616_v29 = vpack.c.bf16 %v3211_v27, %v3210_v41 }
0x1b3f   :  { %3035 = vrot.lane.b32.xlu1 %v8103_v39, %s7165_s7  ;;  %v8490_v39 = vld.sshfl [vmem:[%s9422_s3] sm:$0x33 pattern:$0x76325410]  ;;  %s9423_s7 = smov 112   ;;  %s9428_s3 = smov 52  }
0x1b40   :  { %4228 = vrot.lane.b32.xlu0 %v8434_v1, %s9375_s30  ;;  %v3872_v13 = vcombine.high %v8490_v39, %v8490_v39  ;;  %s9425_s30 = smov 16  }
0x1b43   :  { %4245 = vrot.lane.b32.xlu1 %v8434_v1, %s9377_s20  ;;  %s9426_s20 = smov 108  }
0x1b44   :  { %3047 = vrot.lane.b32.xlu0 %v8282_v50, %s9381_s6  ;;  %s9427_s6 = smov 88  }
0x1b48   :  { %4262 = vrot.lane.b32.xlu0 %v8434_v1, %s7164_s10 }
0x1b6d   :  { %v3714_v50 = vpop.f32.mrb[36].mxu0 }
0x1b6e   :  { %v3718_v19 = vmul.f32 %v3714_v50, %v3385_v15  ;;  %v6321_v10 = vpop.f32.mrb[37].mxu0 }
0x1b70   :  { %6335 = vmatmul.mubr.msk.f32.vlgmr.msra.gmra.mrb[36].mxu1 %vm2982_vm9, %v3718_v19  ;;  %vm4600_vm9 = vcmask 105472  }
0x1b71   :  { %6578 = vmatpush3.bf16.msra.mxu1 %v8492_v2  ;;  %v3858_v15 = vpop.f32.mrb[38].mxu0 }
0x1b72   :  { %v3860_v9 = vpop.f32.mrb[39].mxu0  ;;  %6580 = vmatprep.subr.bf16.mxu1 %v8496_v24  ;;  %v3875_v21 = vmul.f32 %v8490_v39, %v3858_v15 }
0x1b73   :  { %v3876_v43 = vmul.f32 %v3872_v13, %v3860_v9 }
0x1b75   :  { %6582 = vmatpush3.bf16.msra.mxu1 %v8514_v17  ;;  %4086 = vmatprep.mubr.f32.mxu1 %v3876_v43 }
0x1b76   :  { %6584 = vmatprep.subr.bf16.mxu1 %v8517_v63 }
0x1b79   :  { %6586 = vmatpush3.bf16.msra.mxu1 %v8532_v18 }
0x1b7a   :  { %6588 = vmatprep.subr.bf16.mxu1 %v8535_v32 }
0x1b7d   :  { %6590 = vmatpush3.bf16.msra.mxu1 %v8550_v30 }
0x1b7e   :  { %6592 = vmatprep.subr.bf16.mxu1 %v8553_v44 }
0x1b81   :  { %6594 = vmatpush3.bf16.msra.mxu1 %v8568_v37 }
0x1b82   :  { %6596 = vmatprep.subr.bf16.mxu1 %v8571_v26 }
0x1b85   :  { %6598 = vmatpush3.bf16.msra.mxu1 %v8586_v11 }
0x1b86   :  { %6600 = vmatprep.subr.bf16.mxu1 %v8589_v62 }
0x1b89   :  { %6602 = vmatpush3.bf16.msra.mxu1 %v8604_v55 }
0x1b8a   :  { %6604 = vmatprep.subr.bf16.mxu1 %v8607_v35 }
0x1b8d   :  { %6606 = vmatpush3.bf16.msra.mxu1 %v8616_v29 }
0x1b8e   :  { %6630 = vmatprep.subr.bf16.mxu1 %v8370_v16 }
0x1b90   :  { %4087 = vmatmul.mubr.f32.vlgmr.msra.gmra.mrb[38].mxu1 %v3875_v21 }
0x1b91   :  { %6632 = vmatpush3.bf16.msra.mxu1 %v8492_v2 }
0x1b92   :  { %6634 = vmatprep.subr.bf16.mxu1 %v8496_v24 }
0x1b95   :  { %v3081_v50 = vpop.permute.xlu0 %3080  ;;  %v3085_v19 = vpop.permute.xlu1 %3084  ;;  %6636 = vmatpush3.bf16.msra.mxu1 %v8514_v17 }
0x1b96   :  { %v3104_v10 = vsel %vm2980_vm8, %v8424_v60, %v3081_v50  ;;  %6638 = vmatprep.subr.bf16.mxu1 %v8517_v63 }
0x1b97   :  { %v3105_v58 = vsel %vm2984_vm10, %v3104_v10, %v3085_v19 }
0x1b99   :  { %v3089_v0 = vpop.permute.xlu0 %3088  ;;  %v4155_v39 = vpop.permute.xlu1 %4154  ;;  %6640 = vmatpush3.bf16.msra.mxu1 %v8532_v18 }
0x1b9a   :  { %v8631_v13 = vsel %vm2988_vm12, %v3105_v58, %v3089_v0  ;;  %6642 = vmatprep.subr.bf16.mxu1 %v8535_v32 }
0x1b9b   :  { %v8635_v22 = vmul.f32 %v4155_v39, %v8631_v13  ;;  %v8711_v19 = vmul.f32 %v8434_v1, %v8631_v13 }
0x1b9d   :  { %4163 = vrot.lane.b32.xlu0 %v8635_v22, %s7170_s27  ;;  %4159 = vrot.lane.b32.xlu1 %v8635_v22, %s9385_s12  ;;  %v4172_v60 = vpop.permute.xlu1 %4171 }
0x1b9e   :  { %v8642_v7 = vmul.f32 %v4172_v60, %v8631_v13  ;;  %v3094_v15 = vpop.permute.xlu0 %3093  ;;  %6644 = vmatpush3.bf16.msra.mxu1 %v8550_v30 }
0x1b9f   :  { %6646 = vmatprep.subr.bf16.mxu1 %v8553_v44  ;;  %v3107_v14 = vsel %vm2980_vm8, %v8443_v47, %v3094_v15  ;;  %vm4203_vm8 = vcmask 900096  }
0x1ba1   :  { %4167 = vrot.lane.b32.xlu0 %v8635_v22, %s7172_s8  ;;  %4176 = vrot.lane.b32.xlu1 %v8642_v7, %s9385_s12  ;;  %v3000_v9 = vpop.permute.xlu1 %2999 }
0x1ba2   :  { %v3098_v5 = vpop.permute.xlu0 %3097  ;;  %6648 = vmatpush3.bf16.msra.mxu1 %v8568_v37  ;;  %v3054_v54 = vsel %vm969_vm7, %v7579_v34, %v3000_v9 }
0x1ba3   :  { %6650 = vmatprep.subr.bf16.mxu1 %v8571_v26  ;;  %v3108_v42 = vsel %vm2984_vm10, %v3107_v14, %v3098_v5 }
0x1ba5   :  { %4180 = vrot.lane.b32.xlu1 %v8642_v7, %s7170_s27  ;;  %v4189_v43 = vpop.permute.xlu1 %4188 }
0x1ba6   :  { %v8658_v36 = vmul.f32 %v4189_v43, %v8631_v13  ;;  %v3102_v12 = vpop.permute.xlu0 %3101  ;;  %6652 = vmatpush3.bf16.msra.mxu1 %v8586_v11 }
0x1ba7   :  { %v8662_v51 = vsel %vm2988_vm12, %v3108_v42, %v3102_v12  ;;  %6654 = vmatprep.subr.bf16.mxu1 %v8589_v62  ;;  %vm4607_vm12 = vcmask 179200  }
0x1ba8   :  { %4194 = vrot.lane.b32.xlu0 %v8658_v36, %s9385_s12  ;;  %v4192_v61 = vmul.f32 %v4189_v43, %v8662_v51 }
0x1ba9   :  { %4199 = vrot.lane.b32.xlu1 %v8658_v36, %s7170_s27  ;;  %v4212_v47 = vpop.permute.xlu1 %4211 }
0x1baa   :  { %v3009_v31 = vpop.permute.xlu0 %3008  ;;  %6656 = vmatpush3.bf16.msra.mxu1 %v8604_v55  ;;  %v8678_v46 = vmul.f32 %v4212_v47, %v8662_v51 }
0x1bab   :  { %6658 = vmatprep.subr.bf16.mxu1 %v8607_v35  ;;  %v3058_v56 = vsel %vm3055_vm14, %v3054_v54, %v3009_v31 }
0x1bac   :  { %4201 = vrot.lane.b32.xlu0 %v4192_v61, %s7170_s27  ;;  %v3062_v52 = vsel %vm3059_vm11, %v3058_v56, %v7777_v25 }
0x1bad   :  { %4184 = vrot.lane.b32.xlu1 %v8642_v7, %s7172_s8  ;;  %v3027_v33 = vpop.permute.xlu1 %3026 }
0x1bae   :  { %v3018_v8 = vpop.permute.xlu0 %3017  ;;  %6660 = vmatpush3.bf16.msra.mxu1 %v8616_v29 }
0x1baf   :  { %6693 = vmatprep.subr.bf16.mxu1 %v9387_v3  ;;  %v3065_v20 = vsel %vm872_vm6, %v3062_v52, %v3018_v8 }
0x1bb0   :  { %4216 = vrot.lane.b32.xlu0 %v8678_v46, %s9385_s12  ;;  %v3069_v23 = vsel %vm3066_vm13, %v3065_v20, %v3027_v33 }
0x1bb1   :  { %4207 = vrot.lane.b32.xlu1 %v4192_v61, %s7172_s8  ;;  %v3036_v4 = vpop.permute.xlu1 %3035 }
0x1bb2   :  { %v4229_v34 = vpop.permute.xlu0 %4228  ;;  %v3073_v41 = vsel %vm3070_vm15, %v3069_v23, %v3036_v4 }
0x1bb3   :  { %v4231_v38 = vmul.f32 %v4229_v34, %v8662_v51 }
0x1bb4   :  { %4220 = vrot.lane.b32.xlu0 %v8678_v46, %s7170_s27 }
0x1bb5   :  { %4233 = vrot.lane.b32.xlu1 %v4231_v38, %s9385_s12  ;;  %v4246_v59 = vpop.permute.xlu1 %4245 }
0x1bb6   :  { %v3048_v40 = vpop.permute.xlu0 %3047  ;;  %v4248_v25 = vmul.f32 %v4246_v59, %v8662_v51 }
0x1bb7   :  { %v8700_v27 = vsel %vm3074_vm0, %v3073_v41, %v3048_v40 }
0x1bb8   :  { %4224 = vrot.lane.b32.xlu0 %v8678_v46, %s7172_s8 }
0x1bb9   :  { %4237 = vrot.lane.b32.xlu1 %v4231_v38, %s7170_s27 }
0x1bba   :  { %v4263_v21 = vpop.permute.xlu0 %4262 }
0x1bbb   :  { %v4266_v50 = vmul.f32 %v4263_v21, %v8700_v27 }
0x1bbc   :  { %4250 = vrot.lane.b32.xlu0 %v4248_v25, %s9385_s12 }
0x1bbd   :  { %4268 = vrot.lane.b32.xlu1 %v4266_v50, %s9385_s12 }
0x1bc0   :  { %4241 = vrot.lane.b32.xlu0 %v4231_v38, %s7172_s8 }
0x1bc1   :  { %4254 = vrot.lane.b32.xlu1 %v4248_v25, %s7170_s27 }
0x1bc4   :  { %4273 = vrot.lane.b32.xlu0 %v4266_v50, %s7170_s27 }
0x1bc5   :  { %4258 = vrot.lane.b32.xlu1 %v4248_v25, %s7172_s8 }
0x1bc8   :  { %4278 = vrot.lane.b32.xlu0 %v4266_v50, %s7172_s8 }
0x1bc9   :  { %4141 = vrot.lane.b32.xlu1 %v8711_v19, %s9385_s12  ;;  %s9429_s12 = sld [smem:[#allocation19_spill]] }
0x1bcc   :  { %4145 = vrot.lane.b32.xlu0 %v8711_v19, %s7170_s27 }
0x1bcd   :  { %4149 = vrot.lane.b32.xlu1 %v8711_v19, %s7172_s8 }
0x1c0f   :  { %v4164_v10 = vpop.permute.xlu0 %4163  ;;  %v4160_v58 = vpop.permute.xlu1 %4159 }
0x1c10   :  { %v4162_v0 = vadd.f32 %v4160_v58, %v8635_v22 }
0x1c12   :  { %v4166_v39 = vadd.f32 %v4164_v10, %v4162_v0 }
0x1c13   :  { %v4168_v60 = vpop.permute.xlu0 %4167  ;;  %v4177_v15 = vpop.permute.xlu1 %4176 }
0x1c14   :  { %v8721_v1 = vadd.f32 %v4168_v60, %v4166_v39  ;;  %v4179_v43 = vadd.f32 %v4177_v15, %v8642_v7 }
0x1c16   :  { %4284 = vrot.lane.b32.xlu0 %v8721_v1, %s7178_s14 }
0x1c17   :  { %v4181_v9 = vpop.permute.xlu1 %4180 }
0x1c18   :  { %v4183_v42 = vadd.f32 %v4181_v9, %v4179_v43 }
0x1c1a   :  { %v4195_v5 = vpop.permute.xlu0 %4194 }
0x1c1b   :  { %v4200_v14 = vpop.permute.xlu1 %4199  ;;  %v4197_v22 = vadd.f32 %v4195_v5, %v8658_v36 }
0x1c1e   :  { %v4202_v12 = vpop.permute.xlu0 %4201 }
0x1c1f   :  { %v4204_v47 = vsel %vm4203_vm8, %v4200_v14, %v4202_v12  ;;  %v4185_v31 = vpop.permute.xlu1 %4184 }
0x1c20   :  { %v8727_v61 = vadd.f32 %v4185_v31, %v4183_v42  ;;  %v4206_v33 = vadd.f32 %v4204_v47, %v4197_v22 }
0x1c22   :  { %v4217_v54 = vpop.permute.xlu0 %4216  ;;  %4289 = vrot.lane.b32.xlu1 %v8727_v61, %s7179_s29 }
0x1c23   :  { %v4208_v8 = vpop.permute.xlu1 %4207  ;;  %v4219_v7 = vadd.f32 %v4217_v54, %v8678_v46  ;;  %v4265_v46 = vmul.f32 %v4263_v21, %v8662_v51 }
0x1c24   :  { %v8731_v56 = vadd.f32 %v4208_v8, %v4206_v33 }
0x1c26   :  { %v4221_v4 = vpop.permute.xlu0 %4220  ;;  %4294 = vrot.lane.b32.xlu0 %v8731_v56, %s7166_s2 }
0x1c27   :  { %v4234_v52 = vpop.permute.xlu1 %4233  ;;  %v4223_v34 = vadd.f32 %v4221_v4, %v4219_v7 }
0x1c28   :  { %v4236_v59 = vadd.f32 %v4234_v52, %v4231_v38 }
0x1c2a   :  { %v4225_v36 = vpop.permute.xlu0 %4224 }
0x1c2b   :  { %v8736_v20 = vadd.f32 %v4225_v36, %v4223_v34  ;;  %v4238_v23 = vpop.permute.xlu1 %4237 }
0x1c2c   :  { %v4240_v10 = vadd.f32 %v4238_v23, %v4236_v59 }
0x1c2d   :  { %4299 = vrot.lane.b32.xlu1 %v8736_v20, %s9423_s7 }
0x1c2e   :  { %v4251_v40 = vpop.permute.xlu0 %4250 }
0x1c2f   :  { %v4269_v41 = vpop.permute.xlu1 %4268  ;;  %v4253_v60 = vadd.f32 %v4251_v40, %v4248_v25 }
0x1c30   :  { %v4271_v5 = vadd.f32 %v4269_v41, %v4265_v46  ;;  %v4272_v14 = vadd.f32 %v4269_v41, %v4266_v50 }
0x1c32   :  { %v4242_v58 = vpop.permute.xlu0 %4241 }
0x1c33   :  { %v8740_v0 = vadd.f32 %v4242_v58, %v4240_v10  ;;  %v4255_v39 = vpop.permute.xlu1 %4254 }
0x1c34   :  { %v4257_v15 = vadd.f32 %v4255_v39, %v4253_v60 }
0x1c35   :  { %4304 = vrot.lane.b32.xlu0 %v8740_v0, %s7180_s5 }
0x1c36   :  { %v4274_v9 = vpop.permute.xlu0 %4273 }
0x1c37   :  { %v4259_v43 = vpop.permute.xlu1 %4258  ;;  %v4276_v38 = vadd.f32 %v4274_v9, %v4271_v5  ;;  %v4277_v12 = vadd.f32 %v4274_v9, %v4272_v14 }
0x1c38   :  { %v8745_v42 = vadd.f32 %v4259_v43, %v4257_v15 }
0x1c3a   :  { %v4279_v47 = vpop.permute.xlu0 %4278  ;;  %4309 = vrot.lane.b32.xlu1 %v8745_v42, %s7163_s4 }
0x1c3b   :  { %v8749_v25 = vadd.f32 %v4279_v47, %v4276_v38  ;;  %v8751_v21 = vadd.f32 %v4279_v47, %v4277_v12  ;;  %v4142_v8 = vpop.permute.xlu1 %4141  ;;  %v3950_v47 = vld [vmem:[%s9429_s12] sm:$0x3]  ;;  %s9430_s12 = smov 9  }
0x1c3c   :  { %v4144_v4 = vadd.f32 %v4142_v8, %v8711_v19 }
0x1c3d   :  { %4315 = vrot.lane.b32.xlu0 %v8749_v25, %s9419_s9 }
0x1c3e   :  { %4317 = vrot.lane.b32.xlu1 %v8751_v21, %s9419_s9  ;;  %v4146_v7 = vpop.permute.xlu0 %4145 }
0x1c3f   :  { %v4148_v52 = vadd.f32 %v4146_v7, %v4144_v4  ;;  %v4150_v34 = vpop.permute.xlu1 %4149 }
0x1c41   :  { %v8779_v23 = vadd.f32 %v4150_v34, %v4148_v52 }
0x1c43   :  { %v3788_v50 = vpop.f32.mrb[36].mxu1 }
0x1c44   :  { %v6336_v31 = vpop.f32.mrb[37].mxu1  ;;  %6340 = vmatmul.mubr.msk.f32.vlgmr.msra.gmra.mrb[40].mxu0 %vm3055_vm14, %v3788_v50  ;;  %vm4614_vm14 = vcmask 252928  }
0x1c45   :  { %6553 = vmatpush3.bf16.msra.mxu0 %v8492_v2  ;;  %6374 = vmatprep.mubr.msk.f32.mxu0 %vm7141_vm3, %v9389_v6 }
0x1c46   :  { %6554 = vmatprep.subr.bf16.mxu0 %v9387_v3 }
0x1c49   :  { %6556 = vmatpush3.bf16.msra.mxu0 %v8514_v17 }
0x1c4a   :  { %6557 = vmatprep.subr.bf16.mxu0 %v9387_v3 }
0x1c4d   :  { %6559 = vmatpush3.bf16.msra.mxu0 %v8532_v18 }
0x1c4e   :  { %6560 = vmatprep.subr.bf16.mxu0 %v9387_v3 }
0x1c51   :  { %6562 = vmatpush3.bf16.msra.mxu0 %v8550_v30 }
0x1c52   :  { %6563 = vmatprep.subr.bf16.mxu0 %v9387_v3 }
0x1c55   :  { %6565 = vmatpush3.bf16.msra.mxu0 %v8568_v37 }
0x1c56   :  { %6566 = vmatprep.subr.bf16.mxu0 %v9387_v3 }
0x1c59   :  { %6568 = vmatpush3.bf16.msra.mxu0 %v8586_v11 }
0x1c5a   :  { %6569 = vmatprep.subr.bf16.mxu0 %v9387_v3 }
0x1c5d   :  { %6571 = vmatpush3.bf16.msra.mxu0 %v8604_v55 }
0x1c5e   :  { %6572 = vmatprep.subr.bf16.mxu0 %v9387_v3 }
0x1c61   :  { %6574 = vmatpush3.bf16.msra.mxu0 %v8616_v29 }
0x1c62   :  { %6608 = vmatprep.subr.bf16.mxu0 %v8298_v49 }
0x1c63   :  { %v5896_v22 = vpop.f32.mrb[38].mxu1 }
0x1c64   :  { %v5897_v33 = vpop.f32.mrb[39].mxu1 }
0x1c65   :  { %v8776_v54 = vadd.f32 %v5897_v33, %v5896_v22 }
0x1c88   :  { %v4285_v36 = vpop.permute.xlu0 %4284 }
0x1c89   :  { %v4287_v59 = vmax.f32 %v8779_v23, %v4285_v36 }
0x1c94   :  { %v4290_v40 = vpop.permute.xlu1 %4289 }
0x1c95   :  { %v4292_v10 = vmax.f32 %v4287_v59, %v4290_v40 }
0x1c98   :  { %v4295_v41 = vpop.permute.xlu0 %4294 }
0x1c99   :  { %v4297_v39 = vmax.f32 %v4292_v10, %v4295_v41 }
0x1c9f   :  { %v4300_v58 = vpop.permute.xlu1 %4299 }
0x1ca0   :  { %v4302_v46 = vmax.f32 %v4297_v39, %v4300_v58 }
0x1ca7   :  { %v4305_v60 = vpop.permute.xlu0 %4304 }
0x1ca8   :  { %v4307_v9 = vmax.f32 %v4302_v46, %v4305_v60 }
0x1cac   :  { %v4310_v15 = vpop.permute.xlu1 %4309 }
0x1cad   :  { %v4312_v14 = vmax.f32 %v4307_v9, %v4310_v15 }
0x1caf   :  { %v4316_v5 = vpop.permute.xlu0 %4315 }
0x1cb0   :  { %v4318_v19 = vpop.permute.xlu1 %4317 }
0x1cb1   :  { %v4319_v43 = vsel %vm969_vm7, %v4316_v5, %v4318_v19 }
0x1cb2   :  { %v8783_v38 = vmax.f32 %v4312_v14, %v4319_v43 }
0x1cb4   :  { %4332 = vrot.lane.b32.xlu1 %v8783_v38, %s7174_s1  ;;  %4326 = vrot.lane.b32.xlu0 %v8783_v38, %s9424_s24  ;;  %v4322_v12 = vsub.f32 %v8779_v23, %v8783_v38 }
0x1cb8   :  { %4344 = vrot.lane.b32.xlu1 %v8783_v38, %s9425_s30  ;;  %4338 = vrot.lane.b32.xlu0 %v8783_v38, %s9426_s20 }
0x1cbc   :  { %4356 = vrot.lane.b32.xlu1 %v8783_v38, %s9427_s6  ;;  %4350 = vrot.lane.b32.xlu0 %v8783_v38, %s9428_s3 }
0x1cc0   :  { %4362 = vrot.lane.b32.xlu0 %v8783_v38, %s7164_s10 }
0x1d17   :  { %v3946_v50 = vpop.f32.mrb[40].mxu0 }
0x1d18   :  { %v3951_v31 = vmul.f32 %v3950_v47, %v3946_v50  ;;  %v6341_v22 = vpop.f32.mrb[41].mxu0  ;;  %v4323_v47 = vmul.f32 1.442695, %v4322_v12 }
0x1d1a   :  { %6375 = vmatmul.mubr.f32.vlgmr.msra.gmra.mrb[42].mxu0 %v3951_v31 }
0x1d1b   :  { %6610 = vmatpush1.bf16.msra.mxu0 %v8319_v45  ;;  %4772 = vmatprep.mubr.f32.mxu0 %v9389_v6 }
0x1d26   :  { %v4333_v33 = vpop.permute.xlu1 %4332  ;;  %v4327_v8 = vpop.permute.xlu0 %4326 }
0x1d27   :  { %v4335_v4 = vsub.f32 %v8727_v61, %v4333_v33  ;;  %v4329_v7 = vsub.f32 %v8721_v1, %v4327_v8 }
0x1d29   :  { %v4336_v52 = vmul.f32 1.442695, %v4335_v4  ;;  %v4330_v34 = vmul.f32 1.442695, %v4329_v7 }
0x1d2a   :  { %v4345_v36 = vpop.permute.xlu1 %4344  ;;  %v4339_v23 = vpop.permute.xlu0 %4338 }
0x1d2b   :  { %7082 = vpow2.f32 %v4336_v52  ;;  %v4347_v40 = vsub.f32 %v8736_v20, %v4345_v36  ;;  %v4341_v59 = vsub.f32 %v8731_v56, %v4339_v23 }
0x1d2c   :  { %7084 = vpow2.f32 %v4330_v34 }
0x1d2d   :  { %v4348_v41 = vmul.f32 1.442695, %v4347_v40  ;;  %v4342_v10 = vmul.f32 1.442695, %v4341_v59 }
0x1d2e   :  { %v4357_v58 = vpop.permute.xlu1 %4356  ;;  %v4351_v39 = vpop.permute.xlu0 %4350 }
0x1d2f   :  { %7086 = vpow2.f32 %v4348_v41  ;;  %v4359_v60 = vsub.f32 %v8745_v42, %v4357_v58  ;;  %v4353_v61 = vsub.f32 %v8740_v0, %v4351_v39 }
0x1d30   :  { %7088 = vpow2.f32 %v4342_v10 }
0x1d31   :  { %v4360_v1 = vmul.f32 1.442695, %v4359_v60  ;;  %v4354_v46 = vmul.f32 1.442695, %v4353_v61 }
0x1d32   :  { %v4363_v15 = vpop.permute.xlu0 %4362 }
0x1d33   :  { %7090 = vpow2.f32 %v4360_v1  ;;  %v4365_v9 = vsub.f32 %v8749_v25, %v4363_v15  ;;  %v4366_v20 = vsub.f32 %v8751_v21, %v4363_v15 }
0x1d34   :  { %7092 = vpow2.f32 %v4354_v46 }
0x1d35   :  { %v7083_v56 = vpop.eup %7082  ;;  %v4367_v5 = vmul.f32 1.442695, %v4365_v9  ;;  %v4369_v14 = vmul.f32 1.442695, %v4366_v20 }
0x1d36   :  { %v7085_v19 = vpop.eup %7084  ;;  %4377 = vrot.lane.b32.xlu0 %v7083_v56, %s7179_s29 }
0x1d37   :  { %7094 = vpow2.f32 %v4367_v5  ;;  %4372 = vrot.lane.b32.xlu1 %v7085_v19, %s7178_s14 }
0x1d38   :  { %7096 = vpow2.f32 %v4369_v14 }
0x1d39   :  { %v8816_v0 = vpop.eup %7086  ;;  %7098 = vpow2.f32 %v4323_v47 }
0x1d3a   :  { %v7089_v42 = vpop.eup %7088  ;;  %4387 = vrot.lane.b32.xlu0 %v8816_v0, %s9423_s7 }
0x1d3b   :  { %4382 = vrot.lane.b32.xlu1 %v7089_v42, %s7166_s2 }
0x1d3d   :  { %v8821_v25 = vpop.eup %7090 }
0x1d3e   :  { %v8823_v21 = vpop.eup %7092  ;;  %4397 = vrot.lane.b32.xlu0 %v8821_v25, %s7163_s4 }
0x1d3f   :  { %4392 = vrot.lane.b32.xlu1 %v8823_v21, %s7180_s5 }
0x1d41   :  { %v8829_v43 = vpop.eup %7094 }
0x1d42   :  { %v8831_v38 = vpop.eup %7096 }
0x1d43   :  { %4405 = vrot.lane.b32.xlu0 %v8831_v38, %s9419_s9  ;;  %4403 = vrot.lane.b32.xlu1 %v8829_v43, %s9419_s9  ;;  %v7099_v31 = vpop.eup %7098 }
0x1da8   :  { %v4378_v50 = vpop.permute.xlu0 %4377 }
0x1da9   :  { %v4373_v22 = vpop.permute.xlu1 %4372 }
0x1daa   :  { %v4375_v33 = vadd.f32 %v7099_v31, %v4373_v22 }
0x1dac   :  { %v4380_v8 = vadd.f32 %v4378_v50, %v4375_v33  ;;  %v4388_v4 = vpop.permute.xlu0 %4387 }
0x1dad   :  { %v4383_v7 = vpop.permute.xlu1 %4382 }
0x1dae   :  { %v4385_v52 = vadd.f32 %v4383_v7, %v4380_v8 }
0x1db0   :  { %v4390_v34 = vadd.f32 %v4388_v4, %v4385_v52  ;;  %v4398_v36 = vpop.permute.xlu0 %4397 }
0x1db1   :  { %v4393_v23 = vpop.permute.xlu1 %4392 }
0x1db2   :  { %v4395_v40 = vadd.f32 %v4393_v23, %v4390_v34 }
0x1db4   :  { %v4400_v59 = vadd.f32 %v4398_v36, %v4395_v40 }
0x1db5   :  { %v4404_v41 = vpop.permute.xlu1 %4403  ;;  %v4406_v10 = vpop.permute.xlu0 %4405 }
0x1db6   :  { %v4407_v58 = vsel %vm969_vm7, %v4404_v41, %v4406_v10 }
0x1db7   :  { %v4409_v39 = vadd.f32 %v4407_v58, %v4400_v59 }
0x1db9   :  { %7100 = vrcp.f32 %v4409_v39 }
0x1dc3   :  { %v7101_v12 = vpop.eup %7100 }
0x1dc4   :  { %4418 = vrot.lane.b32.xlu0 %v7101_v12, %s7174_s1  ;;  %4414 = vrot.lane.b32.xlu1 %v7101_v12, %s9424_s24  ;;  %v8844_v60 = vmul.f32 %v7101_v12, %v7099_v31  ;;  %s9432_s1 = smov 18   ;;  %s9434_s24 = smov 119  }
0x1dc8   :  { %4426 = vrot.lane.b32.xlu0 %v7101_v12, %s9425_s30  ;;  %4422 = vrot.lane.b32.xlu1 %v7101_v12, %s9426_s20  ;;  %s7181_s30 = smov 65   ;;  %s7182_s20 = smov 74  }
0x1dcc   :  { %4434 = vrot.lane.b32.xlu0 %v7101_v12, %s9427_s6  ;;  %4430 = vrot.lane.b32.xlu1 %v7101_v12, %s9428_s3  ;;  %s7183_s6 = smov 83   ;;  %s7184_s3 = smov 29  }
0x1dd0   :  { %4438 = vrot.lane.b32.xlu1 %v7101_v12, %s7164_s10  ;;  %4444 = vrot.lane.b32.xlu0 %v8844_v60, %s9430_s12  ;;  %s9433_s10 = smov 27  }
0x1ded   :  { %v4018_v61 = vpop.f32.mrb[42].mxu0 }
0x1dee   :  { %v8850_v1 = vadd.f32 %v8776_v54, %v4018_v61  ;;  %v6376_v46 = vpop.f32.mrb[43].mxu0 }
0x1df0   :  { %9431 = vst [vmem:[#allocation6_spill] sm:$0xff] %v8850_v1 }
0x1e36   :  { %v4415_v15 = vpop.permute.xlu1 %4414  ;;  %v4419_v20 = vpop.permute.xlu0 %4418 }
0x1e37   :  { %v4417_v9 = vmul.f32 %v7085_v19, %v4415_v15  ;;  %v4421_v54 = vmul.f32 %v7083_v56, %v4419_v20 }
0x1e39   :  { %4458 = vrot.lane.b32.xlu1 %v4417_v9, %s7178_s14  ;;  %4461 = vrot.lane.b32.xlu0 %v4417_v9, %s7172_s8 }
0x1e3a   :  { %v4423_v5 = vpop.permute.xlu1 %4422  ;;  %v4427_v56 = vpop.permute.xlu0 %4426 }
0x1e3b   :  { %v4425_v14 = vmul.f32 %v7089_v42, %v4423_v5  ;;  %v4429_v19 = vmul.f32 %v8816_v0, %v4427_v56 }
0x1e3d   :  { %4447 = vrot.lane.b32.xlu1 %v8844_v60, %s9432_s1  ;;  %4464 = vrot.lane.b32.xlu0 %v4417_v9, %s7170_s27 }
0x1e3e   :  { %v4431_v42 = vpop.permute.xlu1 %4430  ;;  %v4435_v50 = vpop.permute.xlu0 %4434 }
0x1e3f   :  { %v4433_v47 = vmul.f32 %v8823_v21, %v4431_v42  ;;  %v4437_v0 = vmul.f32 %v8821_v25, %v4435_v50 }
0x1e41   :  { %4450 = vrot.lane.b32.xlu1 %v8844_v60, %s9433_s10  ;;  %4467 = vrot.lane.b32.xlu0 %v4417_v9, %s9434_s24 }
0x1e42   :  { %v4439_v31 = vpop.permute.xlu1 %4438  ;;  %v4445_v25 = vpop.permute.xlu0 %4444 }
0x1e43   :  { %v4441_v21 = vmul.f32 %v8829_v43, %v4439_v31  ;;  %v4442_v22 = vmul.f32 %v8831_v38, %v4439_v31  ;;  %v4453_v7 = vsel %vm107_vm4, %v8844_v60, %v4445_v25 }
0x1e45   :  { %4480 = vrot.lane.b32.xlu1 %v4421_v54, %s7179_s29  ;;  %4483 = vrot.lane.b32.xlu0 %v4421_v54, %s7181_s30  ;;  %s7188_s30 = smov 2  }
0x1e49   :  { %4474 = vrot.lane.b32.xlu1 %v8631_v13, %s7178_s14  ;;  %4486 = vrot.lane.b32.xlu0 %v4421_v54, %s7182_s20  ;;  %s7187_s14 = smov 121   ;;  %s7190_s20 = smov 85  }
0x1e4d   :  { %4489 = vrot.lane.b32.xlu1 %v4421_v54, %s7183_s6  ;;  %4501 = vrot.lane.b32.xlu0 %v4425_v14, %s7166_s2  ;;  %s7192_s6 = smov 103  }
0x1e51   :  { %4504 = vrot.lane.b32.xlu1 %v4425_v14, %s7184_s3  ;;  %4495 = vrot.lane.b32.xlu0 %v8631_v13, %s7179_s29  ;;  %s7189_s29 = smov 11   ;;  %s7193_s3 = smov 49  }
0x1e55   :  { %4507 = vrot.lane.b32.xlu1 %v4425_v14, %s7185_s21  ;;  %4510 = vrot.lane.b32.xlu0 %v4425_v14, %s7186_s0  ;;  %s7194_s21 = smov 58   ;;  %s7196_s0 = smov 67  }
0x1e59   :  { %4517 = vrot.lane.b32.xlu1 %v8631_v13, %s7166_s2  ;;  %4519 = vrot.lane.b32.xlu0 %v8662_v51, %s7166_s2  ;;  %s7191_s2 = smov 94  }
0x1e5d   :  { %4526 = vrot.lane.b32.xlu1 %v4429_v19, %s9423_s7  ;;  %4529 = vrot.lane.b32.xlu0 %v4429_v19, %s7187_s14  ;;  %s7197_s14 = smov 22  }
0x1e61   :  { %4532 = vrot.lane.b32.xlu1 %v4429_v19, %s7188_s30  ;;  %4535 = vrot.lane.b32.xlu0 %v4429_v19, %s7189_s29 }
0x1e65   :  { %4547 = vrot.lane.b32.xlu1 %v4433_v47, %s7180_s5  ;;  %4550 = vrot.lane.b32.xlu0 %v4433_v47, %s7190_s20  ;;  %s7200_s20 = smov [#allocation3]  }
0x1e69   :  { %4541 = vrot.lane.b32.xlu1 %v8662_v51, %s9423_s7  ;;  %4553 = vrot.lane.b32.xlu0 %v4433_v47, %s7191_s2  ;;  %s7195_s7 = smov 13   ;;  %s5605_s2 = sshll.u32 %s7200_s20, 4  ;;  %s5606_s2 = int_to_ptr.vmem [resolvable:$true] %s5605_s2 }
0x1e6a   :  { %p7120_p1 = scmp.lt.s32.totalorder %s5606_s2, %s5606_s2 }
0x1e6d   :  { %4556 = vrot.lane.b32.xlu1 %v4433_v47, %s7192_s6  ;;  %4568 = vrot.lane.b32.xlu0 %v4437_v0, %s7163_s4 }
0x1e71   :  { %4571 = vrot.lane.b32.xlu1 %v4437_v0, %s7193_s3  ;;  %4562 = vrot.lane.b32.xlu0 %v8662_v51, %s7180_s5  ;;  %s7198_s5 = smov 31  }
0x1e75   :  { %4574 = vrot.lane.b32.xlu1 %v4437_v0, %s7194_s21  ;;  %4590 = vrot.lane.b32.xlu0 %v4441_v21, %s9419_s9 }
0x1e79   :  { %4592 = vrot.lane.b32.xlu1 %v4442_v22, %s9419_s9  ;;  %4596 = vrot.lane.b32.xlu0 %v4441_v21, %s7195_s7 }
0x1e7d   :  { %4598 = vrot.lane.b32.xlu1 %v4442_v22, %s7195_s7  ;;  %4577 = vrot.lane.b32.xlu0 %v4437_v0, %s7196_s0 }
0x1e81   :  { %4603 = vrot.lane.b32.xlu1 %v4441_v21, %s7197_s14  ;;  %4605 = vrot.lane.b32.xlu0 %v4442_v22, %s7197_s14 }
0x1e85   :  { %4583 = vrot.lane.b32.xlu1 %v8662_v51, %s7163_s4  ;;  %4610 = vrot.lane.b32.xlu0 %v4441_v21, %s7198_s5 }
0x1e89   :  { %4612 = vrot.lane.b32.xlu1 %v4442_v22, %s7198_s5  ;;  %4621 = vrot.lane.b32.xlu0 %v8662_v51, %s9419_s9 }
0x1e8d   :  { %4623 = vrot.lane.b32.xlu1 %v8700_v27, %s9419_s9 }
0x1eab   :  { %v4459_v43 = vpop.permute.xlu1 %4458  ;;  %v4462_v38 = vpop.permute.xlu0 %4461 }
0x1eac   :  { %v4470_v33 = vsel %vm107_vm4, %v4459_v43, %v4462_v38 }
0x1eaf   :  { %v4448_v8 = vpop.permute.xlu1 %4447  ;;  %v4465_v4 = vpop.permute.xlu0 %4464 }
0x1eb0   :  { %v4454_v52 = vsel %vm4103_vm2, %v4453_v7, %v4448_v8  ;;  %v4471_v27 = vsel %vm4103_vm2, %v4470_v33, %v4465_v4 }
0x1eb3   :  { %v4451_v34 = vpop.permute.xlu1 %4450  ;;  %v4468_v36 = vpop.permute.xlu0 %4467 }
0x1eb4   :  { %v4455_v23 = vsel %vm4105_vm1, %v4454_v52, %v4451_v34  ;;  %v4472_v41 = vsel %vm4105_vm1, %v4471_v27, %v4468_v36 }
0x1eb5   :  { %v4456_v58 = vmul.f32 %v4455_v23, %v8631_v13 }
0x1eb7   :  { %v4481_v51 = vpop.permute.xlu1 %4480  ;;  %v4484_v40 = vpop.permute.xlu0 %4483 }
0x1eb8   :  { %v4492_v52 = vsel %vm107_vm4, %v4481_v51, %v4484_v40 }
0x1ebb   :  { %v4475_v59 = vpop.permute.xlu1 %4474  ;;  %v4487_v10 = vpop.permute.xlu0 %4486 }
0x1ebc   :  { %v4477_v39 = vmul.f32 %v4475_v59, %v4472_v41  ;;  %v4493_v36 = vsel %vm4103_vm2, %v4492_v52, %v4487_v10 }
0x1ebe   :  { %v4478_v12 = vadd.f32 %v4477_v39, %v4456_v58 }
0x1ebf   :  { %v4490_v61 = vpop.permute.xlu1 %4489  ;;  %v4502_v60 = vpop.permute.xlu0 %4501 }
0x1ec0   :  { %v4494_v41 = vsel %vm4105_vm1, %v4493_v36, %v4490_v61  ;;  %v3166_v36 = vld [vmem:[%s9341_s22 + $0x78] sm:$0xff] }
0x1ec3   :  { %v4505_v46 = vpop.permute.xlu1 %4504  ;;  %v4496_v15 = vpop.permute.xlu0 %4495 }
0x1ec4   :  { %v4513_v34 = vsel %vm107_vm4, %v4502_v60, %v4505_v46  ;;  %v4498_v3 = vmul.f32 %v4496_v15, %v4494_v41  ;;  %v3171_v41 = vld [vmem:[%s9341_s22 + $0xa0] sm:$0xf] }
0x1ec6   :  { %v4499_v46 = vadd.f32 %v4498_v3, %v4478_v12 }
0x1ec7   :  { %v4508_v9 = vpop.permute.xlu1 %4507  ;;  %v4511_v20 = vpop.permute.xlu0 %4510 }
0x1ec8   :  { %v4514_v23 = vsel %vm4103_vm2, %v4513_v34, %v4508_v9  ;;  %v3161_v34 = vld [vmem:[%s9341_s22 + $0x50] sm:$0xff] }
0x1ec9   :  { %v4515_v1 = vsel %vm4105_vm1, %v4514_v23, %v4511_v20  ;;  %v6613_v23 = vpack.c.bf16 %v3166_v36, %v3161_v34  ;;  %v5691_v34 = vld [vmem:[%s9334_s15 + $0x6] sm:$0x3] }
0x1ecb   :  { %v4518_v54 = vpop.permute.xlu1 %4517  ;;  %v4520_v5 = vpop.permute.xlu0 %4519 }
0x1ecc   :  { %v4521_v58 = vsel %vm3066_vm13, %v4518_v54, %v4520_v5 }
0x1ecd   :  { %v4523_v51 = vmul.f32 %v4521_v58, %v4515_v1  ;;  %v3159_v58 = vld [vmem:[%s9341_s22 + $0x40] sm:$0xff] }
0x1ecf   :  { %v4527_v14 = vpop.permute.xlu1 %4526  ;;  %v4530_v56 = vpop.permute.xlu0 %4529 }
0x1ed0   :  { %v4538_v39 = vsel %vm107_vm4, %v4527_v14, %v4530_v56  ;;  %v4524_v14 = vadd.f32 %v4523_v51, %v4499_v46  ;;  %v7111_v51 = vld [vmem:[%s9407_s11 + $0xa] sm:$0x3] }
0x1ed3   :  { %v4533_v19 = vpop.permute.xlu1 %4532  ;;  %v4536_v42 = vpop.permute.xlu0 %4535 }
0x1ed4   :  { %v4539_v6 = vsel %vm4103_vm2, %v4538_v39, %v4533_v19 }
0x1ed5   :  { %v4540_v10 = vsel %vm4105_vm1, %v4539_v6, %v4536_v42 }
0x1ed7   :  { %v4548_v47 = vpop.permute.xlu1 %4547  ;;  %v4551_v50 = vpop.permute.xlu0 %4550 }
0x1ed8   :  { %v4559_v60 = vsel %vm107_vm4, %v4548_v47, %v4551_v50 }
0x1edb   :  { %v4542_v0 = vpop.permute.xlu1 %4541  ;;  %v4554_v31 = vpop.permute.xlu0 %4553 }
0x1edc   :  { %v4544_v9 = vmul.f32 %v4542_v0, %v4540_v10  ;;  %v4560_v61 = vsel %vm4103_vm2, %v4559_v60, %v4554_v31  ;;  %v7113_v60 = vld [vmem:[%s9407_s11 + $0xe] sm:$0x3] }
0x1ede   :  { %v4545_v3 = vadd.f32 %v4544_v9, %v4524_v14 }
0x1edf   :  { %v4557_v21 = vpop.permute.xlu1 %4556  ;;  %v4569_v13 = vpop.permute.xlu0 %4568 }
0x1ee0   :  { %v4561_v15 = vsel %vm4105_vm1, %v4560_v61, %v4557_v21  ;;  %v4662_v61 = vld [vmem:[%s9335_s16] sm:$0x3] }
0x1ee3   :  { %v4572_v22 = vpop.permute.xlu1 %4571  ;;  %v4563_v25 = vpop.permute.xlu0 %4562 }
0x1ee4   :  { %v4580_v5 = vsel %vm107_vm4, %v4569_v13, %v4572_v22  ;;  %v4565_v20 = vmul.f32 %v4563_v25, %v4561_v15 }
0x1ee6   :  { %v4566_v31 = vadd.f32 %v4565_v20, %v4545_v3  ;;  %v5688_v3 = vld [vmem:[%s9335_s16 + $0x2] sm:$0x3] }
0x1ee7   :  { %v4575_v43 = vpop.permute.xlu1 %4574  ;;  %v4591_v38 = vpop.permute.xlu0 %4590 }
0x1ee8   :  { %v4581_v1 = vsel %vm4103_vm2, %v4580_v5, %v4575_v43 }
0x1eeb   :  { %v4593_v33 = vpop.permute.xlu1 %4592  ;;  %v4597_v8 = vpop.permute.xlu0 %4596 }
0x1eec   :  { %v4594_v12 = vsel %vm969_vm7, %v4591_v38, %v4593_v33  ;;  %v3162_v38 = vld [vmem:[%s9341_s22 + $0x58] sm:$0xff]  ;;  %v3167_v33 = vld [vmem:[%s9341_s22 + $0x80] sm:$0xff] }
0x1eef   :  { %v4599_v4 = vpop.permute.xlu1 %4598  ;;  %v4578_v7 = vpop.permute.xlu0 %4577 }
0x1ef0   :  { %v4601_v56 = vsel %vm4600_vm9, %v4597_v8, %v4599_v4  ;;  %v4582_v6 = vsel %vm4105_vm1, %v4581_v1, %v4578_v7  ;;  %v6611_v7 = vpack.c.bf16 %v3167_v33, %v3162_v38  ;;  %v5687_v1 = vld [vmem:[%s9334_s15 + $0x2] sm:$0x3] }
0x1ef1   :  { %v4617_v0 = vsel %vm107_vm4, %v4594_v12, %v4601_v56 }
0x1ef2   :  { %6612 = vmatprep.subr.bf16.mxu0 %v6611_v7 }
0x1ef3   :  { %v4604_v27 = vpop.permute.xlu1 %4603  ;;  %v4606_v59 = vpop.permute.xlu0 %4605  ;;  %6614 = vmatpush1.bf16.msra.mxu0 %v6613_v23 }
0x1ef4   :  { %v4608_v47 = vsel %vm4607_vm12, %v4604_v27, %v4606_v59  ;;  %v3172_v27 = vld [vmem:[%s9341_s22 + $0xa8] sm:$0xf]  ;;  %v3154_v59 = vld [vmem:[%s9341_s22 + $0x18] sm:$0xff] }
0x1ef5   :  { %v4618_v21 = vsel %vm4103_vm2, %v4617_v0, %v4608_v47  ;;  %5693 = vmatprep.subr.msk.mxu0 %vm972_vm5, %v3172_v27  ;;  %v6615_v39 = vpack.c.bf16 %v3159_v58, %v3154_v59  ;;  %v5692_v27 = vld [vmem:[%s9335_s16 + $0x6] sm:$0x3]  ;;  %v3153_v58 = vld [vmem:[%s9341_s22 + $0x10] sm:$0xff] }
0x1ef7   :  { %v4584_v40 = vpop.permute.xlu1 %4583  ;;  %v4611_v54 = vpop.permute.xlu0 %4610  ;;  %5694 = vmatpush1.msk.msra.mxu0 %vm972_vm5, %v3171_v41 }
0x1ef8   :  { %v4586_v42 = vmul.f32 %v4584_v40, %v4582_v6  ;;  %6616 = vmatprep.subr.bf16.mxu0 %v6615_v39  ;;  %v7112_v40 = vld [vmem:[%s9407_s11 + $0xc] sm:$0x3]  ;;  %v3158_v39 = vld [vmem:[%s9341_s22 + $0x38] sm:$0xff] }
0x1efa   :  { %v4587_v8 = vadd.f32 %v4586_v42, %v4566_v31 }
0x1efb   :  { %v4613_v19 = vpop.permute.xlu1 %4612  ;;  %v4622_v13 = vpop.permute.xlu0 %4621 }
0x1efc   :  { %v4615_v50 = vsel %vm4614_vm14, %v4611_v54, %v4613_v19  ;;  %v4660_v54 = vld [vmem:[%s9334_s15] sm:$0x3]  ;;  %v4663_v19 = vmul.f32 %v4662_v61, %v8385_v57  ;;  %v3168_v61 = vld [vmem:[%s9341_s22 + $0x88] sm:$0xff] }
0x1efd   :  { %v4619_v25 = vsel %vm4105_vm1, %v4618_v21, %v4615_v50  ;;  %v5689_v21 = vld [vmem:[%s9334_s15 + $0x4] sm:$0x3] }
0x1eff   :  { %v4624_v22 = vpop.permute.xlu1 %4623 }
0x1f00   :  { %v4625_v43 = vsel %vm969_vm7, %v4622_v13, %v4624_v22  ;;  %v4671_v22 = vmul.f32 %v5688_v3, %v8395_v48  ;;  %vm4689_vm7 = vcmask 293888   ;;  %v3244_v3 = vld [vmem:[%s9344_s25 + $0x180] sm:$0xff] }
0x1f01   :  { %v4627_v4 = vmul.f32 %v4625_v43, %v4619_v25 }
0x1f03   :  { %v4628_v52 = vadd.f32 %v4627_v4, %v4587_v8  ;;  %v5690_v4 = vld [vmem:[%s9335_s16 + $0x4] sm:$0x3] }
0x1f04   :  { %v4679_v48 = vmul.f32 %v5690_v4, %v8404_v53  ;;  %v3169_v53 = vld [vmem:[%s9341_s22 + $0x90] sm:$0xff]  ;;  %v3249_v4 = vld [vmem:[%s9344_s25 + $0x1a8] sm:$0xff] }
0x1f05   :  { %4633 = vrot.lane.b32.xlu1 %v4628_v52, %s9432_s1  ;;  %4630 = vrot.lane.b32.xlu0 %v4628_v52, %s9430_s12 }
0x1f09   :  { %4642 = vrot.lane.b32.xlu1 %v4628_v52, %s9434_s24  ;;  %4636 = vrot.lane.b32.xlu0 %v4628_v52, %s9433_s10 }
0x1f0d   :  { %4654 = vrot.lane.b32.xlu1 %v4628_v52, %s7172_s8  ;;  %4648 = vrot.lane.b32.xlu0 %v4628_v52, %s7170_s27 }
0x1f11   :  { %5418 = vrot.lane.b32.xlu0 %v7111_v51, %s9430_s12  ;;  %5421 = vrot.lane.b32.xlu1 %v7112_v40, %s9432_s1  ;;  %v4687_v51 = vmul.f32 %v5692_v27, %v8416_v28  ;;  %v3174_v28 = vld [vmem:[%s9341_s22 + $0xb8] sm:$0xf] }
0x1f15   :  { %5424 = vrot.lane.b32.xlu0 %v7113_v60, %s9433_s10  ;;  %v6617_v60 = vpack.c.bf16 %v3158_v39, %v3153_v58  ;;  %v3252_v58 = vld [vmem:[%s9344_s25 + $0x1c0] sm:$0xff]  ;;  %v3253_v39 = vld [vmem:[%s9344_s25 + $0x1c8] sm:$0xff] }
0x1f77   :  { %v4634_v10 = vpop.permute.xlu1 %4633  ;;  %v4631_v46 = vpop.permute.xlu0 %4630 }
0x1f78   :  { %v4639_v9 = vsel %vm107_vm4, %v4628_v52, %v4631_v46 }
0x1f79   :  { %v4640_v15 = vsel %vm4103_vm2, %v4639_v9, %v4634_v10  ;;  %v3163_v9 = vld [vmem:[%s9341_s22 + $0x60] sm:$0xff] }
0x1f7b   :  { %v4643_v5 = vpop.permute.xlu1 %4642  ;;  %v4637_v14 = vpop.permute.xlu0 %4636 }
0x1f7c   :  { %v4645_v20 = vsel %vm107_vm4, %v4643_v5, %v4628_v52  ;;  %v4641_v56 = vsel %vm4105_vm1, %v4640_v15, %v4637_v14  ;;  %v3155_v15 = vld [vmem:[%s9341_s22 + $0x20] sm:$0xff]  ;;  %v3160_v14 = vld [vmem:[%s9341_s22 + $0x48] sm:$0xff] }
0x1f7d   :  { %v4646_v47 = vsel %vm4103_vm2, %v4645_v20, %v4631_v46  ;;  %v4661_v6 = vmul.f32 %v4660_v54, %v4641_v56  ;;  %v6621_v54 = vpack.c.bf16 %v3168_v61, %v3163_v9  ;;  %v3173_v20 = vld [vmem:[%s9341_s22 + $0xb0] sm:$0xf] }
0x1f7e   :  { %v4647_v12 = vsel %vm4105_vm1, %v4646_v47, %v4634_v10  ;;  %v3165_v56 = vld [vmem:[%s9341_s22 + $0x70] sm:$0xff]  ;;  %v9436_v47 = vmov 0.0|0.0  }
0x1f7f   :  { %v4667_v42 = vmul.f32 %v5687_v1, %v4647_v12  ;;  %v4664_v50 = vadd.f32 %v4663_v19, %v4661_v6  ;;  %v4655_v0 = vpop.permute.xlu1 %4654  ;;  %v4649_v31 = vpop.permute.xlu0 %4648  ;;  %v6624_v1 = vpack.c.bf16 %v3160_v14, %v3155_v15  ;;  %v3170_v19 = vld [vmem:[%s9341_s22 + $0x98] sm:$0xff]  ;;  %v3245_v12 = vld [vmem:[%s9344_s25 + $0x188] sm:$0xff]  ;;  %v3238_v61 = vld [vmem:[%s9344_s25 + $0x150] sm:$0xff] }
0x1f80   :  { %v4651_v13 = vsel %vm107_vm4, %v4649_v31, %v4643_v5  ;;  %v4657_v57 = vsel %vm107_vm4, %v4655_v0, %v4649_v31  ;;  %v6627_v6 = vpack.c.bf16 %v3170_v19, %v3165_v56  ;;  %v3246_v0 = vld [vmem:[%s9344_s25 + $0x190] sm:$0xff]  ;;  %v3247_v31 = vld [vmem:[%s9344_s25 + $0x198] sm:$0xff]  ;;  %v3256_v15 = vld [vmem:[%s9344_s25 + $0x1e0] sm:$0xff] }
0x1f81   :  { %v4668_v25 = vadd.f32 %v4667_v42, %v4664_v50  ;;  %v4652_v43 = vsel %vm4103_vm2, %v4651_v13, %v4628_v52  ;;  %v4658_v8 = vsel %vm4103_vm2, %v4657_v57, %v4643_v5  ;;  %v9435_v5 = vmov 0.0   ;;  %v3228_v42 = vld [vmem:[%s9344_s25 + $0x100] sm:$0xff]  ;;  %v3229_v50 = vld [vmem:[%s9344_s25 + $0x108] sm:$0xff] }
0x1f82   :  { %v4653_v38 = vsel %vm4105_vm1, %v4652_v43, %v4631_v46  ;;  %v4659_v36 = vsel %vm4105_vm1, %v4658_v8, %v4628_v52  ;;  %v3164_v52 = vld [vmem:[%s9341_s22 + $0x68] sm:$0xff]  ;;  %v6661_v13 = vpack.c.bf16 %v3245_v12, %v3244_v3  ;;  %v6663_v57 = vpack.c.bf16 %v3229_v50, %v3228_v42  ;;  %v3231_v43 = vld [vmem:[%s9344_s25 + $0x118] sm:$0xff]  ;;  %v3248_v8 = vld [vmem:[%s9344_s25 + $0x1a0] sm:$0xff] }
0x1f83   :  { %v4672_v33 = vadd.f32 %v4671_v22, %v4668_v25  ;;  %v4675_v7 = vmul.f32 %v5689_v21, %v4653_v38  ;;  %v4683_v41 = vmul.f32 %v5691_v34, %v4659_v36  ;;  %v6619_v46 = vpack.c.bf16 %v3169_v53, %v3164_v52  ;;  %v3175_v21 = vld [vmem:[%s9341_s22 + $0xc0] sm:$0xf]  ;;  %v3230_v25 = vld [vmem:[%s9344_s25 + $0x110] sm:$0xff]  ;;  %v3233_v34 = vld [vmem:[%s9344_s25 + $0x128] sm:$0xff] }
0x1f84   :  { %v6665_v22 = vpack.c.bf16 %v3247_v31, %v3246_v0  ;;  %v6667_v38 = vpack.c.bf16 %v3231_v43, %v3230_v25  ;;  %v3250_v36 = vld [vmem:[%s9344_s25 + $0x1b0] sm:$0xff]  ;;  %v6677_v53 = vpack.c.bf16 %v3253_v39, %v3252_v58  ;;  %v3257_v14 = vld [vmem:[%s9344_s25 + $0x1e8] sm:$0xff]  ;;  %v3259_v3 = vld [vmem:[%s9344_s25 + $0x1f8] sm:$0xff]  ;;  %v7199_v31 = vmov 1983009808  }
0x1f85   :  { %v4676_v23 = vadd.f32 %v4675_v7, %v4672_v33  ;;  %v6669_v33 = vpack.c.bf16 %v3249_v4, %v3248_v8  ;;  %v3232_v7 = vld [vmem:[%s9344_s25 + $0x120] sm:$0xff]  ;;  %v3241_v56 = vld [vmem:[%s9344_s25 + $0x168] sm:$0xff]  ;;  %v3242_v42 = vld [vmem:[%s9344_s25 + $0x170] sm:$0xff] }
0x1f86   :  { %v3243_v50 = vld [vmem:[%s9344_s25 + $0x178] sm:$0xff]  ;;  %v4920_v43 = vld [vmem:[%s9336_s17] sm:$0xff] }
0x1f87   :  { %v4680_v59 = vadd.f32 %v4679_v48, %v4676_v23  ;;  %v3251_v48 = vld [vmem:[%s9344_s25 + $0x1b8] sm:$0xff]  ;;  %v6671_v23 = vpack.c.bf16 %v3233_v34, %v3232_v7  ;;  %v6691_v0 = vpack.c.bf16 %v3243_v50, %v3242_v42  ;;  %v4924_v7 = vcombine.high %v4920_v43, %v4920_v43  ;;  %v3264_v39 = vld [vmem:[%s9344_s25 + $0x220] sm:$0xff] }
0x1f88   :  { %v6673_v27 = vpack.c.bf16 %v3251_v48, %v3250_v36 }
0x1f89   :  { %v4684_v40 = vadd.f32 %v4683_v41, %v4680_v59  ;;  %v3234_v59 = vld [vmem:[%s9344_s25 + $0x130] sm:$0xff]  ;;  %v3235_v41 = vld [vmem:[%s9344_s25 + $0x138] sm:$0xff] }
0x1f8a   :  { %v6675_v52 = vpack.c.bf16 %v3235_v41, %v3234_v59  ;;  %v3263_v59 = vld [vmem:[%s9344_s25 + $0x218] sm:$0xff] }
0x1f8b   :  { %v4688_v10 = vadd.f32 %v4687_v51, %v4684_v40  ;;  %v3236_v51 = vld [vmem:[%s9344_s25 + $0x140] sm:$0xff]  ;;  %v3237_v40 = vld [vmem:[%s9344_s25 + $0x148] sm:$0xff] }
0x1f8d   :  { %5695 = vmatmul.mubr.msk.f32.vlgmr.msra.gmra.mrb[44].mxu0 %vm4689_vm7, %v4688_v10 }
0x1f8e   :  { %6618 = vmatpush1.bf16.msra.mxu0 %v6617_v60  ;;  %4843 = vmatprep.mubr.f32.mxu0 %v9435_v5  ;;  %v6679_v60 = vpack.c.bf16 %v3237_v40, %v3236_v51 }
0x1f8f   :  { %6620 = vmatprep.subr.bf16.mxu0 %v6619_v46  ;;  %v3255_v46 = vld [vmem:[%s9344_s25 + $0x1d8] sm:$0xff] }
0x1f92   :  { %6622 = vmatpush1.bf16.msra.mxu0 %v6621_v54  ;;  %v3239_v54 = vld [vmem:[%s9344_s25 + $0x158] sm:$0xff] }
0x1f93   :  { %5696 = vmatprep.subr.msk.mxu0 %vm972_vm5, %v3174_v28  ;;  %v6683_v28 = vpack.c.bf16 %v3239_v54, %v3238_v61 }
0x1f96   :  { %5697 = vmatpush1.msk.msra.mxu0 %vm972_vm5, %v3173_v20  ;;  %v6685_v20 = vpack.c.bf16 %v3257_v14, %v3256_v15 }
0x1f97   :  { %5698 = vmatmul.mubr.msk.f32.vlgmr.msra.gmra.mrb[46].mxu0 %vm4689_vm7, %v4688_v10  ;;  %6623 = vmatprep.subr.bf16.mxu0 %v9436_v47 }
0x1f98   :  { %6625 = vmatpush3.bf16.msra.mxu0 %v6624_v1  ;;  %6387 = vmatprep.mubr.msk.f32.mxu0 %vm7141_vm3, %v9435_v5  ;;  %v3240_v1 = vld [vmem:[%s9344_s25 + $0x160] sm:$0xff] }
0x1f99   :  { %6626 = vmatprep.subr.bf16.mxu0 %v9436_v47  ;;  %v6687_v19 = vpack.c.bf16 %v3241_v56, %v3240_v1 }
0x1f9c   :  { %6628 = vmatpush3.bf16.msra.mxu0 %v6627_v6  ;;  %v3258_v6 = vld [vmem:[%s9344_s25 + $0x1f0] sm:$0xff] }
0x1f9d   :  { %6385 = vmatprep.subr.mxu0 %v9435_v5  ;;  %v6689_v12 = vpack.c.bf16 %v3259_v3, %v3258_v6 }
0x1fa0   :  { %6386 = vmatpush3.msk.msra.mxu0 %vm972_vm5, %v3175_v21  ;;  %v4926_v21 = vunpack.c.l.s4 %v7199_v31 }
0x1fa1   :  { %6388 = vmatmul.mubr.msk.f32.vlgmr.msra.gmra.mrb[48].mxu0 %vm4689_vm7, %v4688_v10  ;;  %6662 = vmatprep.subr.bf16.mxu0 %v6661_v13  ;;  %v3254_v10 = vld [vmem:[%s9344_s25 + $0x1d0] sm:$0xff]  ;;  %v4928_v13 = vlaneseq }
0x1fa2   :  { %6664 = vmatpush3.bf16.msra.mxu0 %v6663_v57  ;;  %v6681_v9 = vpack.c.bf16 %v3255_v46, %v3254_v10  ;;  %v4927_v57 = vunpack.c.0.s8 %v4926_v21  ;;  %v3266_v10 = vld [vmem:[%s9344_s25 + $0x230] sm:$0xff]  ;;  %v3267_v46 = vld [vmem:[%s9344_s25 + $0x238] sm:$0xff] }
0x1fa3   :  { %6666 = vmatprep.subr.bf16.mxu0 %v6665_v22  ;;  %v4929_v22 = vshrl.u32 %v4928_v13, 7  ;;  %v6703_v54 = vpack.c.bf16 %v3267_v46, %v3266_v10  ;;  %v3280_v10 = vld [vmem:[%s9345_s26 + $0x60] sm:$0xff]  ;;  %v3281_v46 = vld [vmem:[%s9345_s26 + $0x68] sm:$0xff] }
0x1fa5   :  { %v4930_v25 = vsub.s32 %v4927_v57, %v4929_v22  ;;  %v7114_v57 = vld [vmem:[%s9407_s11 + $0x8] sm:$0x3] }
0x1fa6   :  { %6668 = vmatpush3.bf16.msra.mxu0 %v6667_v38  ;;  %v3260_v38 = vld [vmem:[%s9344_s25 + $0x200] sm:$0xff] }
0x1fa7   :  { %6670 = vmatprep.subr.bf16.mxu0 %v6669_v33  ;;  %v4931_v8 = vrot.slane %v4920_v43, %v4930_v25  ;;  %v4938_v41 = vrot.slane %v4924_v7, %v4930_v25  ;;  %v5422_v25 = vpop.permute.xlu1 %5421  ;;  %v9437_v43 = vld [vmem:[#allocation6_spill] sm:$0xff] }
0x1fa9   :  { %v4939_v4 = vcombine.high %v4931_v8, %v4931_v8 }
0x1faa   :  { %6672 = vmatpush3.bf16.msra.mxu0 %v6671_v23 }
0x1fab   :  { %6674 = vmatprep.subr.bf16.mxu0 %v6673_v27  ;;  %v3262_v27 = vld [vmem:[%s9344_s25 + $0x210] sm:$0xff] }
0x1fac   :  { %v6697_v58 = vpack.c.bf16 %v3263_v59, %v3262_v27  ;;  %v3273_v27 = vld [vmem:[%s9345_s26 + $0x28] sm:$0xff] }
0x1fae   :  { %6676 = vmatpush3.bf16.msra.mxu0 %v6675_v52  ;;  %v3265_v52 = vld [vmem:[%s9344_s25 + $0x228] sm:$0xff] }
0x1faf   :  { %6678 = vmatprep.subr.bf16.mxu0 %v6677_v53  ;;  %v4940_v53 = vcombine.high %v4938_v41, %v4938_v41  ;;  %v6700_v40 = vpack.c.bf16 %v3265_v52, %v3264_v39  ;;  %v3276_v39 = vld [vmem:[%s9345_s26 + $0x40] sm:$0xff]  ;;  %v3277_v52 = vld [vmem:[%s9345_s26 + $0x48] sm:$0xff] }
0x1fb2   :  { %6680 = vmatpush3.bf16.msra.mxu0 %v6679_v60 }
0x1fb3   :  { %6682 = vmatprep.subr.bf16.mxu0 %v6681_v9 }
0x1fb6   :  { %6684 = vmatpush3.bf16.msra.mxu0 %v6683_v28  ;;  %v5701_v28 = vld.sshfl [vmem:[%s9336_s17 + $0x8] sm:$0x3 pattern:$0x76325410] }
0x1fb7   :  { %6686 = vmatprep.subr.bf16.mxu0 %v6685_v20 }
0x1fba   :  { %6688 = vmatpush3.bf16.msra.mxu0 %v6687_v19 }
0x1fbb   :  { %6690 = vmatprep.subr.bf16.mxu0 %v6689_v12 }
0x1fbe   :  { %6692 = vmatpush3.bf16.msra.mxu0 %v6691_v0  ;;  %v5419_v0 = vpop.permute.xlu0 %5418 }
0x1fbf   :  { %6706 = vmatprep.subr.bf16.mxu0 %v8298_v49  ;;  %v3261_v49 = vld [vmem:[%s9344_s25 + $0x208] sm:$0xff]  ;;  %v5427_v22 = vsel %vm107_vm4, %v7114_v57, %v5419_v0 }
0x1fc0   :  { %v6694_v48 = vpack.c.bf16 %v3261_v49, %v3260_v38  ;;  %v3271_v38 = vld [vmem:[%s9345_s26 + $0x18] sm:$0xff]  ;;  %v5428_v49 = vsel %vm4103_vm2, %v5427_v22, %v5422_v25 }
0x2060   :  { %v4774_v33 = vpop.f32.mrb[44].mxu0 }
0x2061   :  { %v4776_v34 = vpop.f32.mrb[45].mxu0  ;;  %v4953_v23 = vmul.f32 %v4931_v8, %v4774_v33  ;;  %v5425_v33 = vpop.permute.xlu0 %5424 }
0x2062   :  { %v4954_v36 = vmul.f32 %v4939_v4, %v4776_v34  ;;  %v3270_v4 = vld [vmem:[%s9345_s26 + $0x10] sm:$0xff]  ;;  %v5707_v34 = vld [vmem:[%s9338_s19] ss:$0 sm:$0xff] }
0x2063   :  { %v6749_v7 = vpack.c.bf16 %v3271_v38, %v3270_v4 }
0x2064   :  { %5025 = vmatprep.mubr.f32.mxu1 %v4954_v36  ;;  %v5429_v36 = vsel %vm4105_vm1, %v5428_v49, %v5425_v33 }
0x2065   :  { %5026 = vmatmul.mubr.f32.vlgmr.msra.gmra.mrb[40].mxu1 %v4953_v23  ;;  %v3272_v23 = vld [vmem:[%s9345_s26 + $0x20] sm:$0xff] }
0x2066   :  { %6695 = vmatpush3.bf16.msra.mxu1 %v6694_v48  ;;  %6406 = vmatprep.mubr.msk.f32.mxu1 %vm7141_vm3, %v9435_v5  ;;  %v5437_v48 = vmul.f32 %v5707_v34, %v5429_v36  ;;  %v6758_v59 = vpack.c.bf16 %v3273_v27, %v3272_v23 }
0x2067   :  { %6696 = vmatprep.subr.bf16.mxu1 %v9436_v47 }
0x206a   :  { %v4845_v51 = vpop.f32.mrb[46].mxu0  ;;  %6698 = vmatpush3.bf16.msra.mxu1 %v6697_v58 }
0x206b   :  { %v4847_v60 = vpop.f32.mrb[47].mxu0  ;;  %6699 = vmatprep.subr.bf16.mxu1 %v9436_v47  ;;  %v4955_v61 = vmul.f32 %v4938_v41, %v4845_v51  ;;  %v3275_v41 = vld [vmem:[%s9345_s26 + $0x38] sm:$0xff]  ;;  %v3278_v51 = vld [vmem:[%s9345_s26 + $0x50] sm:$0xff] }
0x206c   :  { %v4956_v9 = vmul.f32 %v4940_v53, %v4847_v60  ;;  %v6764_v53 = vpack.c.bf16 %v3277_v52, %v3276_v39 }
0x206e   :  { %5095 = vmatprep.mubr.f32.mxu0 %v4956_v9  ;;  %6701 = vmatpush3.bf16.msra.mxu1 %v6700_v40  ;;  %v3279_v40 = vld [vmem:[%s9345_s26 + $0x58] sm:$0xff]  ;;  %v6770_v9 = vpack.c.bf16 %v3281_v46, %v3280_v10 }
0x206f   :  { %5096 = vmatmul.mubr.f32.vlgmr.msra.gmra.mrb[50].mxu0 %v4955_v61  ;;  %6702 = vmatprep.subr.bf16.mxu1 %v9436_v47  ;;  %v6767_v60 = vpack.c.bf16 %v3279_v40, %v3278_v51  ;;  %v3282_v61 = vld [vmem:[%s9345_s26 + $0x70] sm:$0xff] }
0x2070   :  { %6708 = vmatpush1.bf16.msra.mxu0 %v8319_v45  ;;  %5238 = vmatprep.mubr.f32.mxu0 %v9435_v5 }
0x2071   :  { %6710 = vmatprep.subr.bf16.mxu0 %v8370_v16 }
0x2072   :  { %6704 = vmatpush3.bf16.msra.mxu1 %v6703_v54  ;;  %v3283_v54 = vld [vmem:[%s9345_s26 + $0x78] sm:$0xff] }
0x2074   :  { %v4916_v15 = vpop.f32.mrb[48].mxu0 }
0x2075   :  { %v4957_v14 = vmul.f32 %v5701_v28, %v4916_v15  ;;  %v6389_v20 = vpop.f32.mrb[49].mxu0  ;;  %v6773_v28 = vpack.c.bf16 %v3283_v54, %v3282_v61  ;;  %v3284_v15 = vld [vmem:[%s9345_s26 + $0x80] sm:$0xff] }
0x2077   :  { %6407 = vmatmul.mubr.msk.f32.vlgmr.msra.gmra.mrb[42].mxu1 %vm2984_vm10, %v4957_v14  ;;  %v3285_v14 = vld [vmem:[%s9345_s26 + $0x88] sm:$0xff] }
0x2078   :  { %5397 = vmatprep.mubr.f32.mxu1 %v9435_v5  ;;  %v6776_v20 = vpack.c.bf16 %v3285_v14, %v3284_v15 }
0x2138   :  { %v5937_v1 = vpop.f32.mrb[40].mxu1 }
0x2139   :  { %v5938_v56 = vpop.f32.mrb[41].mxu1 }
0x213a   :  { %v5939_v19 = vadd.f32 %v5938_v56, %v5937_v1  ;;  %v5708_v1 = vld [vmem:[#allocation2] ss:$0 sm:$0xff] }
0x213b   :  { %5445 = vperm.xlu1 %6883, %v5708_v1   ;;  %v5706_v56 = vld.sshfl [vmem:[%s9332_s13] sm:$0x33 pattern:$0x76325410] }
0x2142   :  { %v5972_v45 = vpop.f32.mrb[50].mxu0 }
0x2143   :  { %v5973_v6 = vpop.f32.mrb[51].mxu0 }
0x2144   :  { %v5974_v3 = vadd.f32 %v5973_v6, %v5972_v45 }
0x2146   :  { %v5098_v12 = vadd.f32 %v5974_v3, %v5939_v19  ;;  %v5413_v19 = vcombine.high %v5706_v56, %v5706_v56 }
0x214a   :  { %v5167_v16 = vpop.f32.mrb[42].mxu1 }
0x214b   :  { %v5168_v42 = vadd.f32 %v5167_v16, %v5098_v12  ;;  %v6408_v50 = vpop.f32.mrb[43].mxu1 }
0x214d   :  { %5703 = vmatmul.mubr.msk.f32.vlgmr.msra.gmra.mrb[52].mxu0 %vm872_vm6, %v5168_v42 }
0x214e   :  { %6712 = vmatpush3.bf16.msra.mxu0 %v8492_v2  ;;  %v5704_v2 = vld.sshfl [vmem:[%s9337_s18] sm:$0x33 pattern:$0x76325410] }
0x214f   :  { %6714 = vmatprep.subr.bf16.mxu0 %v8496_v24  ;;  %v5254_v24 = vcombine.high %v5704_v2, %v5704_v2 }
0x2152   :  { %6716 = vmatpush3.bf16.msra.mxu0 %v8514_v17 }
0x2153   :  { %6718 = vmatprep.subr.bf16.mxu0 %v8517_v63 }
0x2156   :  { %6720 = vmatpush3.bf16.msra.mxu0 %v8532_v18 }
0x2157   :  { %6722 = vmatprep.subr.bf16.mxu0 %v8535_v32 }
0x215a   :  { %6724 = vmatpush3.bf16.msra.mxu0 %v8550_v30  ;;  %v3177_v30 = vld [vmem:[%s9342_s23 + $0x8] sm:$0xff] }
0x215b   :  { %6726 = vmatprep.subr.bf16.mxu0 %v8553_v44  ;;  %v3179_v44 = vld [vmem:[%s9342_s23 + $0x18] sm:$0xff] }
0x215e   :  { %6728 = vmatpush3.bf16.msra.mxu0 %v8568_v37  ;;  %v6741_v37 = vpack.c.bf16 %v3179_v44, %v3177_v30 }
0x215f   :  { %6730 = vmatprep.subr.bf16.mxu0 %v8571_v26  ;;  %v3176_v26 = vld [vmem:[%s9342_s23] sm:$0xff] }
0x2160   :  { %6742 = vmatprep.subr.bf16.mxu1 %v6741_v37 }
0x2162   :  { %6732 = vmatpush3.bf16.msra.mxu0 %v8586_v11  ;;  %v3178_v11 = vld [vmem:[%s9342_s23 + $0x10] sm:$0xff] }
0x2163   :  { %6734 = vmatprep.subr.bf16.mxu0 %v8589_v62  ;;  %v6743_v62 = vpack.c.bf16 %v3178_v11, %v3176_v26 }
0x2165   :  { %6744 = vmatpush1.bf16.msra.mxu1 %v6743_v62 }
0x2166   :  { %6736 = vmatpush3.bf16.msra.mxu0 %v8604_v55  ;;  %6745 = vmatprep.subr.bf16.mxu1 %v9436_v47 }
0x2167   :  { %6738 = vmatprep.subr.bf16.mxu0 %v8607_v35  ;;  %v3268_v35 = vld [vmem:[%s9345_s26] sm:$0xff] }
0x216a   :  { %6740 = vmatpush3.bf16.msra.mxu0 %v8616_v29  ;;  %v3269_v29 = vld [vmem:[%s9345_s26 + $0x8] sm:$0xff] }
0x216b   :  { %v6746_v13 = vpack.c.bf16 %v3269_v29, %v3268_v35 }
0x21ba   :  { %v5446_v12 = vpop.permute.xlu1 %5445 }
0x2220   :  { %v5240_v17 = vpop.f32.mrb[52].mxu0 }
0x2221   :  { %v5242_v63 = vpop.f32.mrb[53].mxu0  ;;  %v5257_v32 = vmul.f32 %v5704_v2, %v5240_v17 }
0x2222   :  { %v5258_v18 = vmul.f32 %v5254_v24, %v5242_v63 }
0x2224   :  { %5323 = vmatprep.mubr.f32.mxu0 %v5258_v18 }
0x2225   :  { %5324 = vmatmul.mubr.f32.vlgmr.msra.gmra.mrb[54].mxu0 %v5257_v32 }
0x22f8   :  { %v6016_v55 = vpop.f32.mrb[54].mxu0 }
0x22f9   :  { %v6017_v31 = vpop.f32.mrb[55].mxu0 }
0x22fa   :  { %v6018_v21 = vadd.f32 %v6017_v31, %v6016_v55 }
0x22fc   :  { %v5329_v8 = vadd.f32 %v6018_v21, %v9437_v43 }
0x22fe   :  { %5705 = vmatmul.mubr.msk.f32.vlgmr.msra.gmra.mrb[44].mxu1 %vm872_vm6, %v5329_v8 }
0x22ff   :  { %6747 = vmatpush3.bf16.msra.mxu1 %v6746_v13  ;;  %6419 = vmatprep.mubr.msk.f32.mxu1 %vm7141_vm3, %v9435_v5  ;;  %vm5597_vm3 = vcmask 66560  }
0x2300   :  { %6748 = vmatprep.subr.bf16.mxu1 %v9436_v47 }
0x2303   :  { %6750 = vmatpush3.bf16.msra.mxu1 %v6749_v7 }
0x2304   :  { %6417 = vmatprep.subr.mxu1 %v9435_v5  ;;  %v3274_v5 = vld [vmem:[%s9345_s26 + $0x30] sm:$0xff]  ;;  %s7115_s26 = scalar_lea.vmem %s5606_s2, 32 }
0x2305   :  { %v6761_v58 = vpack.c.bf16 %v3275_v41, %v3274_v5  ;;  %p7116_p0 = scmp.ne.s32.totalorder %s5606_s2, %s7115_s26  ;;  %p7121_p2 = scmp.lt.s32.totalorder %s7115_s26, %s7115_s26 }
0x2307   :  { %6418 = vmatpush3.msk.msra.mxu1 %vm972_vm5, %v3272_v23  ;;  %p7122_p3 = por %p7121_p2, %p7120_p1 }
0x2308   :  { %6420 = vmatmul.mubr.msk.f32.vlgmr.msra.gmra.mrb[46].mxu1 %vm4689_vm7, %v5437_v48  ;;  %6751 = vmatprep.subr.bf16.mxu1 %v9436_v47 }
0x2309   :  { %6753 = vmatpush1.bf16.msra.mxu1 %v6746_v13  ;;  %p7123_p4 = pnand %p7122_p3, %p7116_p0 }
0x230a   :  { %6754 = vmatprep.subr.bf16.mxu1 %v9436_v47 }
0x230d   :  { %6756 = vmatpush1.bf16.msra.mxu1 %v6749_v7 }
0x230e   :  { %6757 = vmatprep.subr.bf16.mxu1 %v9436_v47 }
0x2311   :  { %6759 = vmatpush1.bf16.msra.mxu1 %v6758_v59 }
0x2312   :  { %6760 = vmatprep.subr.bf16.mxu1 %v9436_v47 }
0x2315   :  { %6762 = vmatpush1.bf16.msra.mxu1 %v6761_v58 }
0x2316   :  { %6763 = vmatprep.subr.bf16.mxu1 %v9436_v47 }
0x2319   :  { %6765 = vmatpush1.bf16.msra.mxu1 %v6764_v53 }
0x231a   :  { %6766 = vmatprep.subr.bf16.mxu1 %v9436_v47 }
0x231d   :  { %6768 = vmatpush1.bf16.msra.mxu1 %v6767_v60 }
0x231e   :  { %6769 = vmatprep.subr.bf16.mxu1 %v9436_v47 }
0x2321   :  { %6771 = vmatpush1.bf16.msra.mxu1 %v6770_v9 }
0x2322   :  { %6772 = vmatprep.subr.bf16.mxu1 %v9436_v47 }
0x2325   :  { %6774 = vmatpush1.bf16.msra.mxu1 %v6773_v28 }
0x2326   :  { %6775 = vmatprep.subr.bf16.mxu1 %v9436_v47 }
0x2329   :  { %6777 = vmatpush1.bf16.msra.mxu1 %v6776_v20 }
0x23d1   :  { %v5399_v45 = vpop.f32.mrb[44].mxu1 }
0x23d2   :  { %v5401_v6 = vpop.f32.mrb[45].mxu1  ;;  %v5416_v3 = vmul.f32 %v5706_v56, %v5399_v45 }
0x23d3   :  { %v5417_v47 = vmul.f32 %v5413_v19, %v5401_v6 }
0x23d5   :  { %5711 = vmatprep.mubr.msk.f32.mxu1 %vm872_vm6, %v5417_v47 }
0x23d6   :  { %5592 = vmatmul.mubr.f32.vlgmr.msra.gmra.mrb[46].mxu1 %v5416_v3 }
0x24a9   :  { %v5593_v16 = vpop.f32.mrb[46].mxu1 }
0x24aa   :  { %v6786_v42 = vadd.f32 %v5593_v16, %v5446_v12  ;;  %v5595_v50 = vpop.f32.mrb[47].mxu1 }
0x24ac   :  { %5598 = vst.msk [vmem:[#allocation3] sm:$0x3] %vm5597_vm3, %v6786_v42 }
0x24ad   :  { %7126 = shalt.err (!%p7123_p4)
}
0x24ae   :  { %s7127_s6 = scalar_lea.hbm %s9347_s28, 32 }
0x24af   :  { %p7128_p5 = scmp.ne.s32.totalorder %s9347_s28, %s7127_s6  ;;  %p7131_p6 = scmp.lt.u32.totalorder %s7127_s6, %s9347_s28 }
0x24b1   :  { %p7133_p7 = pnand %p7131_p6, %p7128_p5 }
0x24b3   :  { %7136 = shalt.err (!%p7133_p7)
}
0x24b4   :  { %5608 = dma.vmem_to_hbm [thread:$0]  %s5606_s2, 32, %s9347_s28, [#allocation4]  }
0x24b5   :  { %7137 = dma.done.wait [#allocation4], 32  }
0x24b6   :  { %7138 = vsyncadd [#allocation4], 4294967264 }
0x24b7   :  { %5612 = vsyncpa [#allocation4], 1 }

</bundles_post_ra>
